<compile_context>
chip_gen: v7x
topology: tpu7x:2x2x1
jax: 0.10.0
libtpu: 0.0.40
codegen_flags: <defaults>
</compile_context>

<pallas_src>
import jax
import jax.numpy as jnp
from jax.experimental import pallas as pl
from jax.experimental.pallas import tpu as pltpu

D_IN, D_H1, D_H2 = 1024, 512, 256
D_CAT = 2 * D_H1          # fused layer-1 output width (mean branch ++ weight branch)
ROW_TILE = 256            # rows (batch*seq positions) per grid step for the MLP stage


def _mlp_kernel(x_ref,
                w1_ref, b1_ref,
                w2m_ref, b2m_ref, w2w_ref, b2w_ref,
                w3m_ref, b3m_ref, w3w_ref, b3w_ref,
                mean_ref, z_ref):
    x = x_ref[...]                                                  # (TR, 1024)

    # Fused layer-1 of both branches: x streams through the MXU once.
    h = jnp.dot(x, w1_ref[...], preferred_element_type=jnp.float32) + b1_ref[...]
    h = jnp.maximum(h, 0.0)                                         # (TR, 1024)
    h_m = h[:, :D_H1]                                               # mean branch   (TR, 512)
    h_w = h[:, D_H1:]                                               # weight branch (TR, 512)

    hm2 = jnp.maximum(
        jnp.dot(h_m, w2m_ref[...], preferred_element_type=jnp.float32) + b2m_ref[...], 0.0)
    hw2 = jnp.maximum(
        jnp.dot(h_w, w2w_ref[...], preferred_element_type=jnp.float32) + b2w_ref[...], 0.0)

    # 256 -> 1 projections: VPU multiply + cross-lane (XLU) reduce instead of a
    # 1-output-column MXU matmul.
    mean_ref[...] = jnp.sum(hm2 * w3m_ref[...], axis=-1, keepdims=True) + b3m_ref[...]
    z_ref[...] = jnp.sum(hw2 * w3w_ref[...], axis=-1, keepdims=True) + b3w_ref[...]


def _softmax_reduce_kernel(mean_ref, z_ref, weight_ref, logits_ref):
    # z, mean are (B, N) with the sequence axis N on the lane axis (lane-dense).
    z = z_ref[...]
    z = z - jnp.max(z, axis=-1, keepdims=True)
    e = jnp.exp(z)
    w = e / jnp.sum(e, axis=-1, keepdims=True)                      # softmax over N
    weight_ref[...] = w
    logits_ref[...] = jnp.sum(mean_ref[...] * w, axis=-1, keepdims=True)   # (B, 1)


def evaluator_weighted(x, params):
    B, N, D = x.shape
    assert D == D_IN
    (w1m, b1m, w2m, b2m, w3m, b3m,
     w1w, b1w, w2w, b2w, w3w, b3w) = params

    # Fuse the two first-layer weights (they share the input x).
    w1_cat = jnp.concatenate([w1m, w1w], axis=1)                    # (1024, 1024)
    b1_cat = jnp.concatenate([b1m, b1w], axis=1)                    # (1, 1024)
    w3m_row = w3m.reshape(1, D_H2)                                  # (1, 256)
    w3w_row = w3w.reshape(1, D_H2)                                  # (1, 256)

    # ---------------- stage 1: row-batched MLP over all B*N positions ----------------
    R = B * N
    if R <= ROW_TILE:
        tr, r_pad = R, R
    else:
        tr = ROW_TILE
        r_pad = pl.cdiv(R, tr) * tr
    x_flat = x.reshape(R, D_IN)
    if r_pad != R:
        x_flat = jnp.pad(x_flat, ((0, r_pad - R), (0, 0)))

    def const_spec(shape):
        nd = len(shape)
        # Constant across the grid -> single-buffer to save VMEM (no re-DMA needed).
        return pl.BlockSpec(shape, lambda i, _nd=nd: (0,) * _nd,
                            pipeline_mode=pl.Buffered(1))

    flops = 2 * r_pad * (D_IN * D_CAT + 2 * D_H1 * D_H2 + 2 * D_H2)
    bytes_accessed = 4 * (r_pad * D_IN + D_IN * D_CAT + 2 * D_H1 * D_H2
                          + D_CAT + 2 * D_H2 + 2 * D_H2 + 2 + 2 * r_pad)

    mean_flat, z_flat = pl.pallas_call(
        _mlp_kernel,
        out_shape=(jax.ShapeDtypeStruct((r_pad, 1), jnp.float32),
                   jax.ShapeDtypeStruct((r_pad, 1), jnp.float32)),
        grid_spec=pltpu.PrefetchScalarGridSpec(
            num_scalar_prefetch=0,
            grid=(r_pad // tr,),
            in_specs=[
                pl.BlockSpec((tr, D_IN), lambda i: (i, 0)),
                const_spec(w1_cat.shape), const_spec(b1_cat.shape),
                const_spec(w2m.shape), const_spec(b2m.shape),
                const_spec(w2w.shape), const_spec(b2w.shape),
                const_spec(w3m_row.shape), const_spec(b3m.shape),
                const_spec(w3w_row.shape), const_spec(b3w.shape),
            ],
            out_specs=[
                pl.BlockSpec((tr, 1), lambda i: (i, 0)),
                pl.BlockSpec((tr, 1), lambda i: (i, 0)),
            ],
        ),
        compiler_params=pltpu.CompilerParams(
            dimension_semantics=("parallel",),
            vmem_limit_bytes=32 * 1024 * 1024),
        cost_estimate=pl.CostEstimate(flops=flops, transcendentals=0,
                                      bytes_accessed=bytes_accessed),
    )(x_flat, w1_cat, b1_cat, w2m, b2m, w2w, b2w, w3m_row, b3m, w3w_row, b3w)

    # Lane-dense (B, N) layout for the cheap per-batch epilogue.
    mean_bn = mean_flat[:R, 0].reshape(B, N)
    z_bn = z_flat[:R, 0].reshape(B, N)

    # -------- stage 2: softmax over the sequence axis + weighted reduction --------
    weight_bn, logits_b1 = pl.pallas_call(
        _softmax_reduce_kernel,
        out_shape=(jax.ShapeDtypeStruct((B, N), jnp.float32),
                   jax.ShapeDtypeStruct((B, 1), jnp.float32)),
        grid_spec=pltpu.PrefetchScalarGridSpec(
            num_scalar_prefetch=0,
            grid=(1,),
            in_specs=[pl.BlockSpec((B, N), lambda i: (0, 0)),
                      pl.BlockSpec((B, N), lambda i: (0, 0))],
            out_specs=[pl.BlockSpec((B, N), lambda i: (0, 0)),
                       pl.BlockSpec((B, 1), lambda i: (0, 0))],
        ),
        compiler_params=pltpu.CompilerParams(
            dimension_semantics=("arbitrary",)),
    )(mean_bn, z_bn)

    logits = logits_b1[:, 0]                      # (B,)
    x_weight = weight_bn.reshape(B, N, 1)         # match PyTorch output layout
    x_mean = mean_bn.reshape(B, N, 1)
    # TODO(synk): nn.Dropout(p=0.5) is declared in __init__ but never used in forward; omitted.
    return logits, x_weight, x_mean, None


def init_params(key):
    """Deterministic PyTorch-nn.Linear-style init: U(-1/sqrt(fan_in), 1/sqrt(fan_in))."""
    def linear(k, din, dout):
        kw, kb = jax.random.split(k)
        bound = 1.0 / (din ** 0.5)
        w = jax.random.uniform(kw, (din, dout), jnp.float32, -bound, bound)
        b = jax.random.uniform(kb, (1, dout), jnp.float32, -bound, bound)
        return w, b

    keys = jax.random.split(key, 6)
    w1m, b1m = linear(keys[0], D_IN, D_H1)
    w2m, b2m = linear(keys[1], D_H1, D_H2)
    w3m, b3m = linear(keys[2], D_H2, 1)
    w1w, b1w = linear(keys[3], D_IN, D_H1)
    w2w, b2w = linear(keys[4], D_H1, D_H2)
    w3w, b3w = linear(keys[5], D_H2, 1)
    return (w1m, b1m, w2m, b2m, w3m, b3m, w1w, b1w, w2w, b2w, w3w, b3w)


def reference(x, params):
    """Pure-JAX replica of the PyTorch forward for correctness checking."""
    (w1m, b1m, w2m, b2m, w3m, b3m,
     w1w, b1w, w2w, b2w, w3w, b3w) = params
    relu = jax.nn.relu
    h = relu(x @ w1m + b1m[0])
    h = relu(h @ w2m + b2m[0])
    x_mean = h @ w3m + b3m[0]                              # (B, N, 1)
    g = relu(x @ w1w + b1w[0])
    g = relu(g @ w2w + b2w[0])
    x_weight = jax.nn.softmax(g @ w3w + b3w[0], axis=-2)   # (B, N, 1)
    logits = jnp.sum(x_mean[..., 0] * x_weight[..., 0], axis=1)
    return logits, x_weight, x_mean, None


if __name__ == "__main__":
    key = jax.random.PRNGKey(0)
    kx, kp = jax.random.split(key)

    B, N = 2, 8
    x = jax.random.normal(kx, (B, N, D_IN), jnp.float32)
    params = init_params(kp)

    logits, x_weight, x_mean, _ = evaluator_weighted(x, params)
    jax.block_until_ready((logits, x_weight, x_mean))

    ref_logits, ref_weight, ref_mean, _ = reference(x, params)
    assert jnp.allclose(logits, ref_logits, rtol=1e-4, atol=1e-4)
    assert jnp.allclose(x_weight, ref_weight, rtol=1e-4, atol=1e-4)
    assert jnp.allclose(x_mean, ref_mean, rtol=1e-4, atol=1e-4)

    print("KERNEL_OK")
</pallas_src>

<mosaic_0001>
module attributes {stable_mosaic.version = 11 : i64} {
  func.func @_mlp_kernel(%arg0: i32, %arg1: memref<16x1024xf32, #tpu.memory_space<vmem>>, %arg2: memref<1024x1024xf32, #tpu.memory_space<vmem>>, %arg3: memref<1x1024xf32, #tpu.memory_space<vmem>>, %arg4: memref<512x256xf32, #tpu.memory_space<vmem>>, %arg5: memref<1x256xf32, #tpu.memory_space<vmem>>, %arg6: memref<512x256xf32, #tpu.memory_space<vmem>>, %arg7: memref<1x256xf32, #tpu.memory_space<vmem>>, %arg8: memref<1x256xf32, #tpu.memory_space<vmem>>, %arg9: memref<1x1xf32, #tpu.memory_space<vmem>>, %arg10: memref<1x256xf32, #tpu.memory_space<vmem>>, %arg11: memref<1x1xf32, #tpu.memory_space<vmem>>, %arg12: memref<16x1xf32, #tpu.memory_space<vmem>>, %arg13: memref<16x1xf32, #tpu.memory_space<vmem>>) attributes {dimension_semantics = [#tpu.dimension_semantics<parallel>], iteration_bounds = array<i64: 1>, scalar_prefetch = 0 : i64, scratch_operands = 0 : i64, tpu.core_type = #tpu.core_type<tc>, window_params = [{transform_indices = @transform_0, window_bounds = array<i64: 16, 1024>}, {pipeline_mode = #tpu.pipeline_mode<synchronous>, transform_indices = @transform_1, window_bounds = array<i64: 1024, 1024>}, {pipeline_mode = #tpu.pipeline_mode<synchronous>, transform_indices = @transform_2, window_bounds = array<i64: 1, 1024>}, {pipeline_mode = #tpu.pipeline_mode<synchronous>, transform_indices = @transform_3, window_bounds = array<i64: 512, 256>}, {pipeline_mode = #tpu.pipeline_mode<synchronous>, transform_indices = @transform_4, window_bounds = array<i64: 1, 256>}, {pipeline_mode = #tpu.pipeline_mode<synchronous>, transform_indices = @transform_5, window_bounds = array<i64: 512, 256>}, {pipeline_mode = #tpu.pipeline_mode<synchronous>, transform_indices = @transform_6, window_bounds = array<i64: 1, 256>}, {pipeline_mode = #tpu.pipeline_mode<synchronous>, transform_indices = @transform_7, window_bounds = array<i64: 1, 256>}, {pipeline_mode = #tpu.pipeline_mode<synchronous>, transform_indices = @transform_8, window_bounds = array<i64: 1, 1>}, {pipeline_mode = #tpu.pipeline_mode<synchronous>, transform_indices = @transform_9, window_bounds = array<i64: 1, 256>}, {pipeline_mode = #tpu.pipeline_mode<synchronous>, transform_indices = @transform_10, window_bounds = array<i64: 1, 1>}, {transform_indices = @transform_11, window_bounds = array<i64: 16, 1>}, {transform_indices = @transform_12, window_bounds = array<i64: 16, 1>}]} {
    %c0 = arith.constant 0 : index
    %c0_0 = arith.constant 0 : index
    %0 = vector.load %arg1[%c0, %c0_0] : memref<16x1024xf32, #tpu.memory_space<vmem>>, vector<16x1024xf32>
    %c0_1 = arith.constant 0 : index
    %c0_2 = arith.constant 0 : index
    %1 = vector.load %arg2[%c0_1, %c0_2] : memref<1024x1024xf32, #tpu.memory_space<vmem>>, vector<1024x1024xf32>
    %cst = arith.constant dense<0.000000e+00> : vector<16x1024xf32>
    %2 = tpu.matmul %0, %1, %cst {dimension_numbers = #tpu.dot_dimension_numbers<[1], [0], [0], [1], [0, 0, 1, 1], [], []>} : vector<16x1024xf32>, vector<1024x1024xf32>, vector<16x1024xf32> -> vector<16x1024xf32>
    %c0_3 = arith.constant 0 : index
    %c0_4 = arith.constant 0 : index
    %3 = vector.load %arg3[%c0_3, %c0_4] : memref<1x1024xf32, #tpu.memory_space<vmem>>, vector<1x1024xf32>
    %4 = vector.broadcast %3 : vector<1x1024xf32> to vector<16x1024xf32>
    %5 = arith.addf %2, %4 : vector<16x1024xf32>
    %cst_5 = arith.constant 0.000000e+00 : f32
    %6 = vector.broadcast %cst_5 : f32 to vector<16x1024xf32>
    %7 = arith.maximumf %5, %6 : vector<16x1024xf32>
    %8 = vector.extract_strided_slice %7 {offsets = [0, 0], sizes = [16, 512], strides = [1, 1]} : vector<16x1024xf32> to vector<16x512xf32>
    %9 = vector.extract_strided_slice %7 {offsets = [0, 512], sizes = [16, 512], strides = [1, 1]} : vector<16x1024xf32> to vector<16x512xf32>
    %c0_6 = arith.constant 0 : index
    %c0_7 = arith.constant 0 : index
    %10 = vector.load %arg4[%c0_6, %c0_7] : memref<512x256xf32, #tpu.memory_space<vmem>>, vector<512x256xf32>
    %cst_8 = arith.constant dense<0.000000e+00> : vector<16x256xf32>
    %11 = tpu.matmul %8, %10, %cst_8 {dimension_numbers = #tpu.dot_dimension_numbers<[1], [0], [0], [1], [0, 0, 1, 1], [], []>} : vector<16x512xf32>, vector<512x256xf32>, vector<16x256xf32> -> vector<16x256xf32>
    %c0_9 = arith.constant 0 : index
    %c0_10 = arith.constant 0 : index
    %12 = vector.load %arg5[%c0_9, %c0_10] : memref<1x256xf32, #tpu.memory_space<vmem>>, vector<1x256xf32>
    %13 = vector.broadcast %12 : vector<1x256xf32> to vector<16x256xf32>
    %14 = arith.addf %11, %13 : vector<16x256xf32>
    %cst_11 = arith.constant 0.000000e+00 : f32
    %15 = vector.broadcast %cst_11 : f32 to vector<16x256xf32>
    %16 = arith.maximumf %14, %15 : vector<16x256xf32>
    %c0_12 = arith.constant 0 : index
    %c0_13 = arith.constant 0 : index
    %17 = vector.load %arg6[%c0_12, %c0_13] : memref<512x256xf32, #tpu.memory_space<vmem>>, vector<512x256xf32>
    %cst_14 = arith.constant dense<0.000000e+00> : vector<16x256xf32>
    %18 = tpu.matmul %9, %17, %cst_14 {dimension_numbers = #tpu.dot_dimension_numbers<[1], [0], [0], [1], [0, 0, 1, 1], [], []>} : vector<16x512xf32>, vector<512x256xf32>, vector<16x256xf32> -> vector<16x256xf32>
    %c0_15 = arith.constant 0 : index
    %c0_16 = arith.constant 0 : index
    %19 = vector.load %arg7[%c0_15, %c0_16] : memref<1x256xf32, #tpu.memory_space<vmem>>, vector<1x256xf32>
    %20 = vector.broadcast %19 : vector<1x256xf32> to vector<16x256xf32>
    %21 = arith.addf %18, %20 : vector<16x256xf32>
    %cst_17 = arith.constant 0.000000e+00 : f32
    %22 = vector.broadcast %cst_17 : f32 to vector<16x256xf32>
    %23 = arith.maximumf %21, %22 : vector<16x256xf32>
    %c0_18 = arith.constant 0 : index
    %c0_19 = arith.constant 0 : index
    %24 = vector.load %arg8[%c0_18, %c0_19] : memref<1x256xf32, #tpu.memory_space<vmem>>, vector<1x256xf32>
    %25 = vector.broadcast %24 : vector<1x256xf32> to vector<16x256xf32>
    %26 = arith.mulf %16, %25 : vector<16x256xf32>
    %cst_20 = arith.constant dense<0.000000e+00> : vector<16xf32>
    %27 = vector.multi_reduction <add>, %26, %cst_20 [1] : vector<16x256xf32> to vector<16xf32>
    %28 = vector.shape_cast %27 : vector<16xf32> to vector<16x1xf32>
    %c0_21 = arith.constant 0 : index
    %c0_22 = arith.constant 0 : index
    %29 = vector.load %arg9[%c0_21, %c0_22] : memref<1x1xf32, #tpu.memory_space<vmem>>, vector<1x1xf32>
    %30 = vector.broadcast %29 : vector<1x1xf32> to vector<16x1xf32>
    %31 = arith.addf %28, %30 : vector<16x1xf32>
    %c0_23 = arith.constant 0 : index
    %c0_24 = arith.constant 0 : index
    %32 = vector.load %arg12[%c0_23, %c0_24] : memref<16x1xf32, #tpu.memory_space<vmem>>, vector<16x1xf32>
    tpu.vector_store %arg12[%c0_23, %c0_24], %31 {strides = array<i32>} : memref<16x1xf32, #tpu.memory_space<vmem>>, vector<16x1xf32>,
    %c0_25 = arith.constant 0 : index
    %c0_26 = arith.constant 0 : index
    %33 = vector.load %arg10[%c0_25, %c0_26] : memref<1x256xf32, #tpu.memory_space<vmem>>, vector<1x256xf32>
    %34 = vector.broadcast %33 : vector<1x256xf32> to vector<16x256xf32>
    %35 = arith.mulf %23, %34 : vector<16x256xf32>
    %cst_27 = arith.constant dense<0.000000e+00> : vector<16xf32>
    %36 = vector.multi_reduction <add>, %35, %cst_27 [1] : vector<16x256xf32> to vector<16xf32>
    %37 = vector.shape_cast %36 : vector<16xf32> to vector<16x1xf32>
    %c0_28 = arith.constant 0 : index
    %c0_29 = arith.constant 0 : index
    %38 = vector.load %arg11[%c0_28, %c0_29] : memref<1x1xf32, #tpu.memory_space<vmem>>, vector<1x1xf32>
    %39 = vector.broadcast %38 : vector<1x1xf32> to vector<16x1xf32>
    %40 = arith.addf %37, %39 : vector<16x1xf32>
    %c0_30 = arith.constant 0 : index
    %c0_31 = arith.constant 0 : index
    %41 = vector.load %arg13[%c0_30, %c0_31] : memref<16x1xf32, #tpu.memory_space<vmem>>, vector<16x1xf32>
    tpu.vector_store %arg13[%c0_30, %c0_31], %40 {strides = array<i32>} : memref<16x1xf32, #tpu.memory_space<vmem>>, vector<16x1xf32>,
    return
  }
  func.func @transform_0(%arg0: i32) -> (i32, i32) {
    %c0_i32 = arith.constant 0 : i32
    %c0_i32_0 = arith.constant 0 : i32
    return %arg0, %c0_i32 : i32, i32
  }
  func.func @transform_1(%arg0: i32) -> (i32, i32) {
    %c0_i32 = arith.constant 0 : i32
    %c0_i32_0 = arith.constant 0 : i32
    %c0_i32_1 = arith.constant 0 : i32
    return %c0_i32, %c0_i32_0 : i32, i32
  }
  func.func @transform_2(%arg0: i32) -> (i32, i32) {
    %c0_i32 = arith.constant 0 : i32
    %c0_i32_0 = arith.constant 0 : i32
    %c0_i32_1 = arith.constant 0 : i32
    return %c0_i32, %c0_i32_0 : i32, i32
  }
  func.func @transform_3(%arg0: i32) -> (i32, i32) {
    %c0_i32 = arith.constant 0 : i32
    %c0_i32_0 = arith.constant 0 : i32
    %c0_i32_1 = arith.constant 0 : i32
    return %c0_i32, %c0_i32_0 : i32, i32
  }
  func.func @transform_4(%arg0: i32) -> (i32, i32) {
    %c0_i32 = arith.constant 0 : i32
    %c0_i32_0 = arith.constant 0 : i32
    %c0_i32_1 = arith.constant 0 : i32
    return %c0_i32, %c0_i32_0 : i32, i32
  }
  func.func @transform_5(%arg0: i32) -> (i32, i32) {
    %c0_i32 = arith.constant 0 : i32
    %c0_i32_0 = arith.constant 0 : i32
    %c0_i32_1 = arith.constant 0 : i32
    return %c0_i32, %c0_i32_0 : i32, i32
  }
  func.func @transform_6(%arg0: i32) -> (i32, i32) {
    %c0_i32 = arith.constant 0 : i32
    %c0_i32_0 = arith.constant 0 : i32
    %c0_i32_1 = arith.constant 0 : i32
    return %c0_i32, %c0_i32_0 : i32, i32
  }
  func.func @transform_7(%arg0: i32) -> (i32, i32) {
    %c0_i32 = arith.constant 0 : i32
    %c0_i32_0 = arith.constant 0 : i32
    %c0_i32_1 = arith.constant 0 : i32
    return %c0_i32, %c0_i32_0 : i32, i32
  }
  func.func @transform_8(%arg0: i32) -> (i32, i32) {
    %c0_i32 = arith.constant 0 : i32
    %c0_i32_0 = arith.constant 0 : i32
    %c0_i32_1 = arith.constant 0 : i32
    return %c0_i32, %c0_i32_0 : i32, i32
  }
  func.func @transform_9(%arg0: i32) -> (i32, i32) {
    %c0_i32 = arith.constant 0 : i32
    %c0_i32_0 = arith.constant 0 : i32
    %c0_i32_1 = arith.constant 0 : i32
    return %c0_i32, %c0_i32_0 : i32, i32
  }
  func.func @transform_10(%arg0: i32) -> (i32, i32) {
    %c0_i32 = arith.constant 0 : i32
    %c0_i32_0 = arith.constant 0 : i32
    %c0_i32_1 = arith.constant 0 : i32
    return %c0_i32, %c0_i32_0 : i32, i32
  }
  func.func @transform_11(%arg0: i32) -> (i32, i32) {
    %c0_i32 = arith.constant 0 : i32
    %c0_i32_0 = arith.constant 0 : i32
    return %arg0, %c0_i32 : i32, i32
  }
  func.func @transform_12(%arg0: i32) -> (i32, i32) {
    %c0_i32 = arith.constant 0 : i32
    %c0_i32_0 = arith.constant 0 : i32
    return %arg0, %c0_i32 : i32, i32
  }
}

</mosaic_0001>

<bundles_post_ra>
// kernel: tpu_custom_call.1
= control target key start
LH: loop header
LB: loop body
LE: loop exit
PB: predicated region body
PF: predicated region fallthrough
CT: control target
= control target key end

     0   :  { %s5061_s0 = inlined_call_operand.hbm [shape: f32[16,1024], index: 0, kind: input, shape index: {}]   ;;  %s5062_s1 = inlined_call_operand.hbm [shape: f32[1024,1024], index: 1, kind: input, shape index: {}]   ;;  %s5063_s2 = inlined_call_operand.hbm [shape: f32[1,1024], index: 2, kind: input, shape index: {}]   ;;  %s5064_s3 = inlined_call_operand.hbm [shape: f32[512,256], index: 3, kind: input, shape index: {}]   ;;  %s5065_s4 = inlined_call_operand.hbm [shape: f32[1,256], index: 4, kind: input, shape index: {}]   ;;  %s5066_s5 = inlined_call_operand.hbm [shape: f32[512,256], index: 5, kind: input, shape index: {}]   ;;  %s5067_s6 = inlined_call_operand.hbm [shape: f32[1,256], index: 6, kind: input, shape index: {}]   ;;  %s5068_s7 = inlined_call_operand.hbm [shape: f32[1,256], index: 7, kind: input, shape index: {}]   ;;  %s5069_s8 = inlined_call_operand.<no memory space> [shape: f32[1,1], index: 8, kind: input, shape index: {}]   ;;  %s5070_s9 = inlined_call_operand.hbm [shape: f32[1,256], index: 9, kind: input, shape index: {}]   ;;  %s5071_s11 = inlined_call_operand.vmem [shape: f32[16,1], index: 11, kind: output, shape index: {0}]   ;;  %s5072_s12 = inlined_call_operand.vmem [shape: f32[16,1], index: 12, kind: output, shape index: {1}]   ;;  %s5073_s10 = inlined_call_operand.<no memory space> [shape: f32[1,1], index: 10, kind: input, shape index: {}]  }
   0x1   :  { %v18_v0 = vstv %s5069_s8  ;;  %v20_v1 = vstv %s5073_s10 }
   0x2   :  { %19 = vst [vmem:[#allocation2] sm:$0x1] %v18_v0  ;;  %21 = vst [vmem:[#allocation3] sm:$0x1] %v20_v1 }
   0x3   :  { %22 = vsyncpa [#allocation5], 0 }
   0x4   :  { %23 = vsyncpa [#allocation7], 0 }
   0x5   :  { %24 = vsyncpa [#allocation10], 0 }
   0x6   :  { %25 = vsyncpa [#allocation13], 0 }
   0x7   :  { %26 = vsyncpa [#allocation16], 0  ;;  %s4762_s25 = smov [#allocation6]   ;;  %s4763_s27 = smov [#allocation9]  }
   0x8   :  { %s44_s26 = sshll.u32 %s4762_s25, 4  ;;  %s66_s28 = sshll.u32 %s4763_s27, 4  ;;  %s45_s26 = int_to_ptr.vmem [resolvable:$true] %s44_s26  ;;  %s4846_s28 = int_to_ptr.vmem [resolvable:$true] %s66_s28 }
   0x9   :  { %s4554_s30 = scalar_lea.hbm %s5062_s1, 131072 }
   0xa   :  { %p4555_p0 = scmp.ne.s32.totalorder %s5062_s1, %s4554_s30  ;;  %p4558_p1 = scmp.lt.u32.totalorder %s4554_s30, %s5062_s1 }
   0xc   :  { %p4560_p2 = pnand %p4558_p1, %p4555_p0 }
   0xe   :  { %4563 = shalt.err (!%p4560_p2)
}
   0xf   :  { %s4564_s16 = scalar_lea.vmem %s45_s26, 131072  ;;  %p4569_p4 = scmp.lt.s32.totalorder %s45_s26, %s45_s26 }
  0x10   :  { %p4565_p3 = scmp.ne.s32.totalorder %s45_s26, %s4564_s16  ;;  %p4570_p5 = scmp.lt.s32.totalorder %s4564_s16, %s4564_s16 }
  0x12   :  { %p4571_p6 = por %p4570_p5, %p4569_p4 }
  0x14   :  { %p4572_p7 = pnand %p4571_p6, %p4565_p3 }
  0x16   :  { %4575 = shalt.err (!%p4572_p7)
}
  0x17   :  { %s4764_s17 = smov 1024   ;;  %s4765_s18 = smov 64  }
  0x18   :  { %50 = dma.hbm_to_vmem [thread:$0]  %s5062_s1, 131072, %s45_s26, [#allocation7], %s4764_s17, %s4764_s17, %s4765_s18  }
  0x19   :  { %s4576_s23 = scalar_lea.hbm %s5064_s3, 16384 }
  0x1a   :  { %p4577_p8 = scmp.ne.s32.totalorder %s5064_s3, %s4576_s23  ;;  %p4580_p9 = scmp.lt.u32.totalorder %s4576_s23, %s5064_s3 }
  0x1c   :  { %p4582_p10 = pnand %p4580_p9, %p4577_p8 }
  0x1e   :  { %4585 = shalt.err (!%p4582_p10)
}
  0x1f   :  { %s4586_s8 = scalar_lea.vmem %s4846_s28, 16384  ;;  %p4591_p12 = scmp.lt.s32.totalorder %s4846_s28, %s4846_s28 }
  0x20   :  { %p4587_p11 = scmp.ne.s32.totalorder %s4846_s28, %s4586_s8  ;;  %p4592_p13 = scmp.lt.s32.totalorder %s4586_s8, %s4586_s8 }
  0x22   :  { %p4593_p0 = por %p4592_p13, %p4591_p12 }
  0x24   :  { %p4594_p1 = pnand %p4593_p0, %p4587_p11 }
  0x26   :  { %4597 = shalt.err (!%p4594_p1)
}
  0x27   :  { %s4766_s1 = smov 256   ;;  %s4767_s26 = smov 16  }
  0x28   :  { %72 = dma.hbm_to_vmem [thread:$0]  %s5064_s3, 16384, %s4846_s28, [#allocation10], %s4766_s1, %s4766_s1, %s4767_s26  }
  0x29   :  { %s4768_s10 = smov [#allocation12]   ;;  %s4769_s15 = smov [#allocation15]  }
  0x2a   :  { %s88_s14 = sshll.u32 %s4768_s10, 4  ;;  %s111_s16 = sshll.u32 %s4769_s15, 4  ;;  %s89_s14 = int_to_ptr.vmem [resolvable:$true] %s88_s14  ;;  %s112_s16 = int_to_ptr.vmem [resolvable:$true] %s111_s16 }
  0x2b   :  { %s4598_s21 = scalar_lea.hbm %s5066_s5, 16384 }
  0x2c   :  { %p4599_p2 = scmp.ne.s32.totalorder %s5066_s5, %s4598_s21  ;;  %p4602_p3 = scmp.lt.u32.totalorder %s4598_s21, %s5066_s5 }
  0x2e   :  { %p4604_p4 = pnand %p4602_p3, %p4599_p2 }
  0x30   :  { %4607 = shalt.err (!%p4604_p4)
}
  0x31   :  { %s4608_s3 = scalar_lea.vmem %s89_s14, 16384  ;;  %p4613_p6 = scmp.lt.s32.totalorder %s89_s14, %s89_s14 }
  0x32   :  { %p4609_p5 = scmp.ne.s32.totalorder %s89_s14, %s4608_s3  ;;  %p4614_p7 = scmp.lt.s32.totalorder %s4608_s3, %s4608_s3 }
  0x34   :  { %p4615_p8 = por %p4614_p7, %p4613_p6 }
  0x36   :  { %p4616_p9 = pnand %p4615_p8, %p4609_p5 }
  0x38   :  { %4619 = shalt.err (!%p4616_p9)
}
  0x39   :  { %94 = dma.hbm_to_vmem [thread:$0]  %s5066_s5, 16384, %s89_s14, [#allocation13], %s4766_s1, %s4766_s1, %s4767_s26  }
  0x3a   :  { %s4620_s30 = scalar_lea.hbm %s5068_s7, 32 }
  0x3b   :  { %p4621_p10 = scmp.ne.s32.totalorder %s5068_s7, %s4620_s30  ;;  %p4624_p11 = scmp.lt.u32.totalorder %s4620_s30, %s5068_s7 }
  0x3d   :  { %p4626_p12 = pnand %p4624_p11, %p4621_p10 }
  0x3f   :  { %4629 = shalt.err (!%p4626_p12)
}
  0x40   :  { %s4630_s20 = scalar_lea.vmem %s112_s16, 32  ;;  %p4635_p0 = scmp.lt.s32.totalorder %s112_s16, %s112_s16 }
  0x41   :  { %p4631_p13 = scmp.ne.s32.totalorder %s112_s16, %s4630_s20  ;;  %p4636_p1 = scmp.lt.s32.totalorder %s4630_s20, %s4630_s20 }
  0x43   :  { %p4637_p2 = por %p4636_p1, %p4635_p0 }
  0x45   :  { %p4638_p3 = pnand %p4637_p2, %p4631_p13 }
  0x47   :  { %4641 = shalt.err (!%p4638_p3)
}
  0x48   :  { %114 = dma.hbm_to_vmem [thread:$0]  %s5068_s7, 32, %s112_s16, [#allocation16]  }
  0x49   :  { %s4770_s26 = smov [#allocation4]   ;;  %s4771_s21 = smov [#allocation8]  }
  0x4a   :  { %s32_s14 = sshll.u32 %s4770_s26, 4  ;;  %s57_s22 = sshll.u32 %s4771_s21, 4  ;;  %s33_s14 = int_to_ptr.vmem [resolvable:$true] %s32_s14  ;;  %s58_s22 = int_to_ptr.vmem [resolvable:$true] %s57_s22 }
  0x4b   :  { %s4642_s25 = scalar_lea.hbm %s5061_s0, 2048 }
  0x4c   :  { %p4643_p4 = scmp.ne.s32.totalorder %s5061_s0, %s4642_s25  ;;  %p4646_p5 = scmp.lt.u32.totalorder %s4642_s25, %s5061_s0 }
  0x4e   :  { %p4648_p6 = pnand %p4646_p5, %p4643_p4 }
  0x50   :  { %4651 = shalt.err (!%p4648_p6)
}
  0x51   :  { %s4652_s7 = scalar_lea.vmem %s33_s14, 2048  ;;  %p4657_p8 = scmp.lt.s32.totalorder %s33_s14, %s33_s14 }
  0x52   :  { %p4653_p7 = scmp.ne.s32.totalorder %s33_s14, %s4652_s7  ;;  %p4658_p9 = scmp.lt.s32.totalorder %s4652_s7, %s4652_s7 }
  0x54   :  { %p4659_p10 = por %p4658_p9, %p4657_p8 }
  0x56   :  { %p4660_p11 = pnand %p4659_p10, %p4653_p7 }
  0x58   :  { %4663 = shalt.err (!%p4660_p11)
}
  0x59   :  { %38 = dma.hbm_to_vmem [thread:$0]  %s5061_s0, 2048, %s33_s14, [#allocation5], %s4764_s17, %s4764_s17, %s4765_s18  }
  0x5a   :  { %s4664_s10 = scalar_lea.hbm %s5063_s2, 128 }
  0x5b   :  { %p4665_p12 = scmp.ne.s32.totalorder %s5063_s2, %s4664_s10  ;;  %p4668_p13 = scmp.lt.u32.totalorder %s4664_s10, %s5063_s2 }
  0x5d   :  { %p4670_p0 = pnand %p4668_p13, %p4665_p12 }
  0x5f   :  { %4673 = shalt.err (!%p4670_p0)
}
  0x60   :  { %s4674_s1 = scalar_lea.vmem %s58_s22, 128  ;;  %p4679_p2 = scmp.lt.s32.totalorder %s58_s22, %s58_s22 }
  0x61   :  { %p4675_p1 = scmp.ne.s32.totalorder %s58_s22, %s4674_s1  ;;  %p4680_p3 = scmp.lt.s32.totalorder %s4674_s1, %s4674_s1 }
  0x63   :  { %p4681_p4 = por %p4680_p3, %p4679_p2 }
  0x65   :  { %p4682_p5 = pnand %p4681_p4, %p4675_p1 }
  0x67   :  { %4685 = shalt.err (!%p4682_p5)
}
  0x68   :  { %60 = dma.hbm_to_vmem [thread:$0]  %s5063_s2, 128, %s58_s22, [#allocation7]  }
  0x69   :  { %s4772_s18 = smov [#allocation11]   ;;  %s4773_s14 = smov [#allocation14]  }
  0x6a   :  { %s79_s26 = sshll.u32 %s4772_s18, 4  ;;  %s101_s21 = sshll.u32 %s4773_s14, 4  ;;  %s80_s26 = int_to_ptr.vmem [resolvable:$true] %s79_s26  ;;  %s102_s21 = int_to_ptr.vmem [resolvable:$true] %s101_s21 }
  0x6b   :  { %s4686_s25 = scalar_lea.hbm %s5065_s4, 32 }
  0x6c   :  { %p4687_p6 = scmp.ne.s32.totalorder %s5065_s4, %s4686_s25  ;;  %p4690_p7 = scmp.lt.u32.totalorder %s4686_s25, %s5065_s4 }
  0x6e   :  { %p4692_p8 = pnand %p4690_p7, %p4687_p6 }
  0x70   :  { %4695 = shalt.err (!%p4692_p8)
}
  0x71   :  { %s4696_s2 = scalar_lea.vmem %s80_s26, 32  ;;  %p4701_p10 = scmp.lt.s32.totalorder %s80_s26, %s80_s26 }
  0x72   :  { %p4697_p9 = scmp.ne.s32.totalorder %s80_s26, %s4696_s2  ;;  %p4702_p11 = scmp.lt.s32.totalorder %s4696_s2, %s4696_s2 }
  0x74   :  { %p4703_p12 = por %p4702_p11, %p4701_p10 }
  0x76   :  { %p4704_p13 = pnand %p4703_p12, %p4697_p9 }
  0x78   :  { %4707 = shalt.err (!%p4704_p13)
}
  0x79   :  { %82 = dma.hbm_to_vmem [thread:$0]  %s5065_s4, 32, %s80_s26, [#allocation10]  }
  0x7a   :  { %s4708_s30 = scalar_lea.hbm %s5067_s6, 32 }
  0x7b   :  { %p4709_p0 = scmp.ne.s32.totalorder %s5067_s6, %s4708_s30  ;;  %p4712_p1 = scmp.lt.u32.totalorder %s4708_s30, %s5067_s6 }
  0x7d   :  { %p4714_p2 = pnand %p4712_p1, %p4709_p0 }
  0x7f   :  { %4717 = shalt.err (!%p4714_p2)
}
  0x80   :  { %s4718_s20 = scalar_lea.vmem %s102_s21, 32  ;;  %p4723_p4 = scmp.lt.s32.totalorder %s102_s21, %s102_s21 }
  0x81   :  { %p4719_p3 = scmp.ne.s32.totalorder %s102_s21, %s4718_s20  ;;  %p4724_p5 = scmp.lt.s32.totalorder %s4718_s20, %s4718_s20 }
  0x83   :  { %p4725_p6 = por %p4724_p5, %p4723_p4 }
  0x85   :  { %p4726_p7 = pnand %p4725_p6, %p4719_p3 }
  0x87   :  { %4729 = shalt.err (!%p4726_p7)
}
  0x88   :  { %104 = dma.hbm_to_vmem [thread:$0]  %s5067_s6, 32, %s102_s21, [#allocation13]  }
  0x89   :  { %s4774_s1 = smov [#allocation17]   ;;  %s4730_s26 = scalar_lea.hbm %s5070_s9, 32 }
  0x8a   :  { %s123_s0 = sshll.u32 %s4774_s1, 4  ;;  %p4731_p8 = scmp.ne.s32.totalorder %s5070_s9, %s4730_s26  ;;  %s124_s0 = int_to_ptr.vmem [resolvable:$true] %s123_s0 }
  0x8b   :  { %p4734_p9 = scmp.lt.u32.totalorder %s4730_s26, %s5070_s9 }
  0x8d   :  { %p4736_p10 = pnand %p4734_p9, %p4731_p8 }
  0x8f   :  { %4739 = shalt.err (!%p4736_p10)
}
  0x90   :  { %s4740_s3 = scalar_lea.vmem %s124_s0, 32  ;;  %p4745_p12 = scmp.lt.s32.totalorder %s124_s0, %s124_s0 }
  0x91   :  { %p4741_p11 = scmp.ne.s32.totalorder %s124_s0, %s4740_s3  ;;  %p4746_p13 = scmp.lt.s32.totalorder %s4740_s3, %s4740_s3 }
  0x93   :  { %p4747_p0 = por %p4746_p13, %p4745_p12 }
  0x95   :  { %p4748_p1 = pnand %p4747_p0, %p4741_p11 }
  0x97   :  { %4751 = shalt.err (!%p4748_p1)
}
  0x98   :  { %126 = dma.hbm_to_vmem [thread:$0]  %s5070_s9, 32, %s124_s0, [#allocation16]  }
  0x99   :  { %4752 = dma.done.wait [#allocation5], 2048  }
  0x9a   :  { %4753 = vsyncadd [#allocation5], 4294965248 }
  0x9b   :  { %4754 = dma.done.wait [#allocation7], 131200  }
  0x9c   :  { %4755 = vsyncadd [#allocation7], 4294836096 }
  0x9d   :  { %4756 = dma.done.wait [#allocation10], 16416  }
  0x9e   :  { %4757 = vsyncadd [#allocation10], 4294950880 }
  0x9f   :  { %4758 = dma.done.wait [#allocation13], 16416  }
  0xa0   :  { %4759 = vsyncadd [#allocation13], 4294950880 }
  0xa1   :  { %4760 = dma.done.wait [#allocation16], 64  }
  0xa2   :  { %4761 = vsyncadd [#allocation16], 4294967232  ;;  %v173_v2 = vld [vmem:[#allocation6 + $0x8] sm:$0xff]  ;;  %v175_v4 = vld [vmem:[#allocation6 + $0x18] sm:$0xff]  ;;  %vm3113_vm0 = vcmask 7168  }
  0xa3   :  { %v181_v3 = vld [vmem:[#allocation6 + $0x48] sm:$0xff]  ;;  %v183_v6 = vld [vmem:[#allocation6 + $0x58] sm:$0xff]  ;;  %v172_v7 = vld [vmem:[#allocation6] sm:$0xff] }
  0xa4   :  { %v3164_v5 = vpack.c.bf16 %v181_v3, %v173_v2  ;;  %v180_v8 = vld [vmem:[#allocation6 + $0x40] sm:$0xff]  ;;  %v3420_v9 = vpack.c.bf16 %v183_v6, %v175_v4  ;;  %v174_v11 = vld [vmem:[#allocation6 + $0x10] sm:$0xff]  ;;  %v189_v13 = vld [vmem:[#allocation6 + $0x88] sm:$0xff] }
  0xa5   :  { %v3166_v10 = vpack.c.bf16 %v180_v8, %v172_v7  ;;  %v182_v12 = vld [vmem:[#allocation6 + $0x50] sm:$0xff]  ;;  %v197_v15 = vld [vmem:[#allocation6 + $0xc8] sm:$0xff]  ;;  %v191_v16 = vld [vmem:[#allocation6 + $0x98] sm:$0xff] }
  0xa6   :  { %3165 = vmatprep.subr.bf16.mxu0 %v3164_v5  ;;  %v3422_v14 = vpack.c.bf16 %v182_v12, %v174_v11  ;;  %v199_v17 = vld [vmem:[#allocation6 + $0xd8] sm:$0xff]  ;;  %3421 = vmatprep.subr.bf16.mxu1 %v3420_v9  ;;  %v3168_v18 = vpack.c.bf16 %v197_v15, %v189_v13  ;;  %v188_v20 = vld [vmem:[#allocation6 + $0x80] sm:$0xff]  ;;  %v190_v22 = vld [vmem:[#allocation6 + $0x90] sm:$0xff] }
  0xa7   :  { %3167 = vmatpush1.bf16.msra.mxu0 %v3166_v10  ;;  %v3424_v19 = vpack.c.bf16 %v199_v17, %v191_v16  ;;  %v196_v21 = vld [vmem:[#allocation6 + $0xc0] sm:$0xff]  ;;  %v198_v24 = vld [vmem:[#allocation6 + $0xd0] sm:$0xff]  ;;  %v205_v25 = vld [vmem:[#allocation6 + $0x108] sm:$0xff] }
  0xa8   :  { %3423 = vmatpush1.bf16.msra.mxu1 %v3422_v14  ;;  %v3170_v23 = vpack.c.bf16 %v196_v21, %v188_v20  ;;  %v213_v26 = vld [vmem:[#allocation6 + $0x148] sm:$0xff]  ;;  %3169 = vmatprep.subr.bf16.mxu0 %v3168_v18  ;;  %v3426_v27 = vpack.c.bf16 %v198_v24, %v190_v22  ;;  %v207_v29 = vld [vmem:[#allocation6 + $0x118] sm:$0xff]  ;;  %v204_v31 = vld [vmem:[#allocation6 + $0x100] sm:$0xff] }
  0xa9   :  { %3425 = vmatprep.subr.bf16.mxu1 %v3424_v19  ;;  %v3172_v28 = vpack.c.bf16 %v213_v26, %v205_v25  ;;  %v215_v30 = vld [vmem:[#allocation6 + $0x158] sm:$0xff]  ;;  %v212_v33 = vld [vmem:[#allocation6 + $0x140] sm:$0xff]  ;;  %v206_v34 = vld [vmem:[#allocation6 + $0x110] sm:$0xff] }
  0xaa   :  { %v3428_v32 = vpack.c.bf16 %v215_v30, %v207_v29  ;;  %v214_v35 = vld [vmem:[#allocation6 + $0x150] sm:$0xff]  ;;  %v3174_v36 = vpack.c.bf16 %v212_v33, %v204_v31  ;;  %v221_v37 = vld [vmem:[#allocation6 + $0x188] sm:$0xff]  ;;  %v223_v39 = vld [vmem:[#allocation6 + $0x198] sm:$0xff] }
  0xab   :  { %3171 = vmatpush1.bf16.msra.mxu0 %v3170_v23  ;;  %v229_v38 = vld [vmem:[#allocation6 + $0x1c8] sm:$0xff]  ;;  %v3430_v40 = vpack.c.bf16 %v214_v35, %v206_v34  ;;  %v231_v42 = vld [vmem:[#allocation6 + $0x1d8] sm:$0xff]  ;;  %v220_v43 = vld [vmem:[#allocation6 + $0x180] sm:$0xff] }
  0xac   :  { %3427 = vmatpush1.bf16.msra.mxu1 %v3426_v27  ;;  %3173 = vmatprep.subr.bf16.mxu0 %v3172_v28  ;;  %v3176_v41 = vpack.c.bf16 %v229_v38, %v221_v37  ;;  %v228_v44 = vld [vmem:[#allocation6 + $0x1c0] sm:$0xff]  ;;  %v3432_v45 = vpack.c.bf16 %v231_v42, %v223_v39  ;;  %v222_v46 = vld [vmem:[#allocation6 + $0x190] sm:$0xff]  ;;  %v237_v48 = vld [vmem:[#allocation6 + $0x208] sm:$0xff] }
  0xad   :  { %3429 = vmatprep.subr.bf16.mxu1 %v3428_v32  ;;  %v230_v47 = vld [vmem:[#allocation6 + $0x1d0] sm:$0xff]  ;;  %v245_v49 = vld [vmem:[#allocation6 + $0x248] sm:$0xff]  ;;  %v239_v50 = vld [vmem:[#allocation6 + $0x218] sm:$0xff]  ;;  %v3178_v52 = vpack.c.bf16 %v228_v44, %v220_v43 }
  0xae   :  { %v247_v51 = vld [vmem:[#allocation6 + $0x258] sm:$0xff]  ;;  %v3434_v53 = vpack.c.bf16 %v230_v47, %v222_v46  ;;  %v3180_v54 = vpack.c.bf16 %v245_v49, %v237_v48  ;;  %v236_v55 = vld [vmem:[#allocation6 + $0x200] sm:$0xff]  ;;  %v238_v57 = vld [vmem:[#allocation6 + $0x210] sm:$0xff] }
  0xaf   :  { %3175 = vmatpush1.bf16.msra.mxu0 %v3174_v36  ;;  %v244_v56 = vld [vmem:[#allocation6 + $0x240] sm:$0xff]  ;;  %v3436_v58 = vpack.c.bf16 %v247_v51, %v239_v50  ;;  %v246_v59 = vld [vmem:[#allocation6 + $0x250] sm:$0xff]  ;;  %v253_v60 = vld [vmem:[#allocation6 + $0x288] sm:$0xff] }
  0xb0   :  { %3431 = vmatpush1.bf16.msra.mxu1 %v3430_v40  ;;  %3177 = vmatprep.subr.bf16.mxu0 %v3176_v41  ;;  %v261_v61 = vld [vmem:[#allocation6 + $0x2c8] sm:$0xff]  ;;  %v255_v62 = vld [vmem:[#allocation6 + $0x298] sm:$0xff]  ;;  %v3182_v0 = vpack.c.bf16 %v244_v56, %v236_v55  ;;  %v3438_v1 = vpack.c.bf16 %v246_v59, %v238_v57  ;;  %v252_v3 = vld [vmem:[#allocation6 + $0x280] sm:$0xff] }
  0xb1   :  { %3433 = vmatprep.subr.bf16.mxu1 %v3432_v45  ;;  %v263_v63 = vld [vmem:[#allocation6 + $0x2d8] sm:$0xff]  ;;  %v3184_v2 = vpack.c.bf16 %v261_v61, %v253_v60  ;;  %v260_v4 = vld [vmem:[#allocation6 + $0x2c0] sm:$0xff]  ;;  %v254_v5 = vld [vmem:[#allocation6 + $0x290] sm:$0xff] }
  0xb2   :  { %v3440_v6 = vpack.c.bf16 %v263_v63, %v255_v62  ;;  %v262_v7 = vld [vmem:[#allocation6 + $0x2d0] sm:$0xff]  ;;  %v269_v8 = vld [vmem:[#allocation6 + $0x308] sm:$0xff]  ;;  %v271_v10 = vld [vmem:[#allocation6 + $0x318] sm:$0xff]  ;;  %v3186_v12 = vpack.c.bf16 %v260_v4, %v252_v3 }
  0xb3   :  { %3179 = vmatpush1.bf16.msra.mxu0 %v3178_v52  ;;  %v277_v9 = vld [vmem:[#allocation6 + $0x348] sm:$0xff]  ;;  %v279_v11 = vld [vmem:[#allocation6 + $0x358] sm:$0xff]  ;;  %v3442_v13 = vpack.c.bf16 %v262_v7, %v254_v5  ;;  %v268_v15 = vld [vmem:[#allocation6 + $0x300] sm:$0xff] }
  0xb4   :  { %3435 = vmatpush1.bf16.msra.mxu1 %v3434_v53  ;;  %3181 = vmatprep.subr.bf16.mxu0 %v3180_v54  ;;  %v3188_v14 = vpack.c.bf16 %v277_v9, %v269_v8  ;;  %v276_v16 = vld [vmem:[#allocation6 + $0x340] sm:$0xff]  ;;  %v270_v17 = vld [vmem:[#allocation6 + $0x310] sm:$0xff]  ;;  %v3444_v18 = vpack.c.bf16 %v279_v11, %v271_v10  ;;  %v285_v20 = vld [vmem:[#allocation6 + $0x388] sm:$0xff] }
  0xb5   :  { %3437 = vmatprep.subr.bf16.mxu1 %v3436_v58  ;;  %v278_v19 = vld [vmem:[#allocation6 + $0x350] sm:$0xff]  ;;  %v293_v21 = vld [vmem:[#allocation6 + $0x3c8] sm:$0xff]  ;;  %v287_v22 = vld [vmem:[#allocation6 + $0x398] sm:$0xff]  ;;  %v3190_v24 = vpack.c.bf16 %v276_v16, %v268_v15 }
  0xb6   :  { %v295_v23 = vld [vmem:[#allocation6 + $0x3d8] sm:$0xff]  ;;  %v3446_v25 = vpack.c.bf16 %v278_v19, %v270_v17  ;;  %v3192_v26 = vpack.c.bf16 %v293_v21, %v285_v20  ;;  %v284_v27 = vld [vmem:[#allocation6 + $0x380] sm:$0xff]  ;;  %v286_v29 = vld [vmem:[#allocation6 + $0x390] sm:$0xff] }
  0xb7   :  { %3183 = vmatpush1.bf16.msra.mxu0 %v3182_v0  ;;  %v292_v28 = vld [vmem:[#allocation6 + $0x3c0] sm:$0xff]  ;;  %v3448_v30 = vpack.c.bf16 %v295_v23, %v287_v22  ;;  %v294_v31 = vld [vmem:[#allocation6 + $0x3d0] sm:$0xff]  ;;  %v301_v32 = vld [vmem:[#allocation6 + $0x408] sm:$0xff] }
  0xb8   :  { %3439 = vmatpush1.bf16.msra.mxu1 %v3438_v1  ;;  %3185 = vmatprep.subr.bf16.mxu0 %v3184_v2  ;;  %v309_v33 = vld [vmem:[#allocation6 + $0x448] sm:$0xff]  ;;  %v303_v34 = vld [vmem:[#allocation6 + $0x418] sm:$0xff]  ;;  %v3194_v36 = vpack.c.bf16 %v292_v28, %v284_v27  ;;  %v3450_v37 = vpack.c.bf16 %v294_v31, %v286_v29  ;;  %v300_v39 = vld [vmem:[#allocation6 + $0x400] sm:$0xff] }
  0xb9   :  { %3441 = vmatprep.subr.bf16.mxu1 %v3440_v6  ;;  %v311_v35 = vld [vmem:[#allocation6 + $0x458] sm:$0xff]  ;;  %v3196_v38 = vpack.c.bf16 %v309_v33, %v301_v32  ;;  %v308_v40 = vld [vmem:[#allocation6 + $0x440] sm:$0xff]  ;;  %v302_v41 = vld [vmem:[#allocation6 + $0x410] sm:$0xff] }
  0xba   :  { %v3452_v42 = vpack.c.bf16 %v311_v35, %v303_v34  ;;  %v310_v43 = vld [vmem:[#allocation6 + $0x450] sm:$0xff]  ;;  %v317_v44 = vld [vmem:[#allocation6 + $0x488] sm:$0xff]  ;;  %v319_v46 = vld [vmem:[#allocation6 + $0x498] sm:$0xff]  ;;  %v3198_v48 = vpack.c.bf16 %v308_v40, %v300_v39 }
  0xbb   :  { %3187 = vmatpush1.bf16.msra.mxu0 %v3186_v12  ;;  %v325_v45 = vld [vmem:[#allocation6 + $0x4c8] sm:$0xff]  ;;  %v327_v47 = vld [vmem:[#allocation6 + $0x4d8] sm:$0xff]  ;;  %v3454_v49 = vpack.c.bf16 %v310_v43, %v302_v41  ;;  %v316_v51 = vld [vmem:[#allocation6 + $0x480] sm:$0xff] }
  0xbc   :  { %3443 = vmatpush1.bf16.msra.mxu1 %v3442_v13  ;;  %3189 = vmatprep.subr.bf16.mxu0 %v3188_v14  ;;  %v3200_v50 = vpack.c.bf16 %v325_v45, %v317_v44  ;;  %v324_v52 = vld [vmem:[#allocation6 + $0x4c0] sm:$0xff]  ;;  %v318_v53 = vld [vmem:[#allocation6 + $0x490] sm:$0xff]  ;;  %v3456_v54 = vpack.c.bf16 %v327_v47, %v319_v46  ;;  %v333_v56 = vld [vmem:[#allocation6 + $0x508] sm:$0xff] }
  0xbd   :  { %3445 = vmatprep.subr.bf16.mxu1 %v3444_v18  ;;  %v326_v55 = vld [vmem:[#allocation6 + $0x4d0] sm:$0xff]  ;;  %v341_v57 = vld [vmem:[#allocation6 + $0x548] sm:$0xff]  ;;  %v335_v58 = vld [vmem:[#allocation6 + $0x518] sm:$0xff]  ;;  %v3202_v60 = vpack.c.bf16 %v324_v52, %v316_v51 }
  0xbe   :  { %v343_v59 = vld [vmem:[#allocation6 + $0x558] sm:$0xff]  ;;  %v3458_v61 = vpack.c.bf16 %v326_v55, %v318_v53  ;;  %v3204_v62 = vpack.c.bf16 %v341_v57, %v333_v56  ;;  %v332_v63 = vld [vmem:[#allocation6 + $0x500] sm:$0xff]  ;;  %v334_v1 = vld [vmem:[#allocation6 + $0x510] sm:$0xff] }
  0xbf   :  { %3191 = vmatpush1.bf16.msra.mxu0 %v3190_v24  ;;  %v340_v0 = vld [vmem:[#allocation6 + $0x540] sm:$0xff]  ;;  %v3460_v2 = vpack.c.bf16 %v343_v59, %v335_v58  ;;  %v342_v3 = vld [vmem:[#allocation6 + $0x550] sm:$0xff]  ;;  %v349_v4 = vld [vmem:[#allocation6 + $0x588] sm:$0xff] }
  0xc0   :  { %3447 = vmatpush1.bf16.msra.mxu1 %v3446_v25  ;;  %3193 = vmatprep.subr.bf16.mxu0 %v3192_v26  ;;  %v357_v5 = vld [vmem:[#allocation6 + $0x5c8] sm:$0xff]  ;;  %v351_v6 = vld [vmem:[#allocation6 + $0x598] sm:$0xff]  ;;  %v3206_v8 = vpack.c.bf16 %v340_v0, %v332_v63  ;;  %v348_v9 = vld [vmem:[#allocation6 + $0x580] sm:$0xff]  ;;  %v3462_v10 = vpack.c.bf16 %v342_v3, %v334_v1 }
  0xc1   :  { %3449 = vmatprep.subr.bf16.mxu1 %v3448_v30  ;;  %v359_v7 = vld [vmem:[#allocation6 + $0x5d8] sm:$0xff]  ;;  %v3208_v11 = vpack.c.bf16 %v357_v5, %v349_v4  ;;  %v356_v12 = vld [vmem:[#allocation6 + $0x5c0] sm:$0xff]  ;;  %v350_v13 = vld [vmem:[#allocation6 + $0x590] sm:$0xff] }
  0xc2   :  { %v358_v14 = vld [vmem:[#allocation6 + $0x5d0] sm:$0xff]  ;;  %v3464_v15 = vpack.c.bf16 %v359_v7, %v351_v6  ;;  %v365_v16 = vld [vmem:[#allocation6 + $0x608] sm:$0xff]  ;;  %v367_v19 = vld [vmem:[#allocation6 + $0x618] sm:$0xff]  ;;  %v3210_v21 = vpack.c.bf16 %v356_v12, %v348_v9 }
  0xc3   :  { %3195 = vmatpush1.bf16.msra.mxu0 %v3194_v36  ;;  %v373_v17 = vld [vmem:[#allocation6 + $0x648] sm:$0xff]  ;;  %v375_v20 = vld [vmem:[#allocation6 + $0x658] sm:$0xff]  ;;  %v3466_v22 = vpack.c.bf16 %v358_v14, %v350_v13  ;;  %v364_v24 = vld [vmem:[#allocation6 + $0x600] sm:$0xff] }
  0xc4   :  { %3451 = vmatpush1.bf16.msra.mxu1 %v3450_v37  ;;  %3197 = vmatprep.subr.bf16.mxu0 %v3196_v38  ;;  %v157_v18 = vld [vmem:[#allocation4 + $0x8] sm:$0xff]  ;;  %v3212_v23 = vpack.c.bf16 %v373_v17, %v365_v16  ;;  %v372_v25 = vld [vmem:[#allocation6 + $0x640] sm:$0xff]  ;;  %v366_v26 = vld [vmem:[#allocation6 + $0x610] sm:$0xff]  ;;  %v3468_v27 = vpack.c.bf16 %v375_v20, %v367_v19 }
  0xc5   :  { %3453 = vmatprep.subr.bf16.mxu1 %v3452_v42  ;;  %1302 = vmatprep.mubr.f32.mxu0 %v157_v18  ;;  %v374_v28 = vld [vmem:[#allocation6 + $0x650] sm:$0xff]  ;;  %v381_v29 = vld [vmem:[#allocation6 + $0x688] sm:$0xff]  ;;  %v383_v31 = vld [vmem:[#allocation6 + $0x698] sm:$0xff]  ;;  %v3214_v33 = vpack.c.bf16 %v372_v25, %v364_v24 }
  0xc6   :  { %1610 = vmatprep.mubr.f32.mxu1 %v157_v18  ;;  %v389_v30 = vld [vmem:[#allocation6 + $0x6c8] sm:$0xff]  ;;  %v391_v32 = vld [vmem:[#allocation6 + $0x6d8] sm:$0xff]  ;;  %v3470_v34 = vpack.c.bf16 %v374_v28, %v366_v26  ;;  %v380_v36 = vld [vmem:[#allocation6 + $0x680] sm:$0xff] }
  0xc7   :  { %3199 = vmatpush1.bf16.msra.mxu0 %v3198_v48  ;;  %v3216_v35 = vpack.c.bf16 %v389_v30, %v381_v29  ;;  %v388_v37 = vld [vmem:[#allocation6 + $0x6c0] sm:$0xff]  ;;  %v382_v38 = vld [vmem:[#allocation6 + $0x690] sm:$0xff]  ;;  %v3472_v39 = vpack.c.bf16 %v391_v32, %v383_v31  ;;  %v397_v41 = vld [vmem:[#allocation6 + $0x708] sm:$0xff] }
  0xc8   :  { %3455 = vmatpush1.bf16.msra.mxu1 %v3454_v49  ;;  %3201 = vmatprep.subr.bf16.mxu0 %v3200_v50  ;;  %v390_v40 = vld [vmem:[#allocation6 + $0x6d0] sm:$0xff]  ;;  %v405_v42 = vld [vmem:[#allocation6 + $0x748] sm:$0xff]  ;;  %v399_v43 = vld [vmem:[#allocation6 + $0x718] sm:$0xff]  ;;  %v3218_v45 = vpack.c.bf16 %v388_v37, %v380_v36 }
  0xc9   :  { %3457 = vmatprep.subr.bf16.mxu1 %v3456_v54  ;;  %v407_v44 = vld [vmem:[#allocation6 + $0x758] sm:$0xff]  ;;  %v3474_v46 = vpack.c.bf16 %v390_v40, %v382_v38  ;;  %v3220_v47 = vpack.c.bf16 %v405_v42, %v397_v41  ;;  %v396_v48 = vld [vmem:[#allocation6 + $0x700] sm:$0xff]  ;;  %v398_v50 = vld [vmem:[#allocation6 + $0x710] sm:$0xff] }
  0xca   :  { %v404_v49 = vld [vmem:[#allocation6 + $0x740] sm:$0xff]  ;;  %v3476_v51 = vpack.c.bf16 %v407_v44, %v399_v43  ;;  %v406_v52 = vld [vmem:[#allocation6 + $0x750] sm:$0xff]  ;;  %v413_v53 = vld [vmem:[#allocation6 + $0x788] sm:$0xff] }
  0xcb   :  { %3203 = vmatpush1.bf16.msra.mxu0 %v3202_v60  ;;  %v421_v54 = vld [vmem:[#allocation6 + $0x7c8] sm:$0xff]  ;;  %v415_v55 = vld [vmem:[#allocation6 + $0x798] sm:$0xff]  ;;  %v3222_v57 = vpack.c.bf16 %v404_v49, %v396_v48  ;;  %v3478_v58 = vpack.c.bf16 %v406_v52, %v398_v50  ;;  %v412_v60 = vld [vmem:[#allocation6 + $0x780] sm:$0xff] }
  0xcc   :  { %3459 = vmatpush1.bf16.msra.mxu1 %v3458_v61  ;;  %3205 = vmatprep.subr.bf16.mxu0 %v3204_v62  ;;  %v423_v56 = vld [vmem:[#allocation6 + $0x7d8] sm:$0xff]  ;;  %v3224_v59 = vpack.c.bf16 %v421_v54, %v413_v53  ;;  %v420_v61 = vld [vmem:[#allocation6 + $0x7c0] sm:$0xff]  ;;  %v414_v62 = vld [vmem:[#allocation6 + $0x790] sm:$0xff] }
  0xcd   :  { %3461 = vmatprep.subr.bf16.mxu1 %v3460_v2  ;;  %v3480_v63 = vpack.c.bf16 %v423_v56, %v415_v55  ;;  %v422_v0 = vld [vmem:[#allocation6 + $0x7d0] sm:$0xff]  ;;  %v429_v1 = vld [vmem:[#allocation6 + $0x808] sm:$0xff]  ;;  %v431_v3 = vld [vmem:[#allocation6 + $0x818] sm:$0xff]  ;;  %v3226_v5 = vpack.c.bf16 %v420_v61, %v412_v60 }
  0xce   :  { %v437_v2 = vld [vmem:[#allocation6 + $0x848] sm:$0xff]  ;;  %v439_v4 = vld [vmem:[#allocation6 + $0x858] sm:$0xff]  ;;  %v3482_v6 = vpack.c.bf16 %v422_v0, %v414_v62  ;;  %v436_v9 = vld [vmem:[#allocation6 + $0x840] sm:$0xff] }
  0xcf   :  { %3207 = vmatpush1.bf16.msra.mxu0 %v3206_v8  ;;  %v3228_v7 = vpack.c.bf16 %v437_v2, %v429_v1  ;;  %v428_v8 = vld [vmem:[#allocation6 + $0x800] sm:$0xff]  ;;  %v438_v12 = vld [vmem:[#allocation6 + $0x850] sm:$0xff]  ;;  %v445_v13 = vld [vmem:[#allocation6 + $0x888] sm:$0xff] }
  0xd0   :  { %3463 = vmatpush1.bf16.msra.mxu1 %v3462_v10  ;;  %3209 = vmatprep.subr.bf16.mxu0 %v3208_v11  ;;  %v430_v10 = vld [vmem:[#allocation6 + $0x810] sm:$0xff]  ;;  %v3484_v11 = vpack.c.bf16 %v439_v4, %v431_v3  ;;  %v453_v14 = vld [vmem:[#allocation6 + $0x8c8] sm:$0xff]  ;;  %v455_v16 = vld [vmem:[#allocation6 + $0x8d8] sm:$0xff]  ;;  %v3230_v18 = vpack.c.bf16 %v436_v9, %v428_v8 }
  0xd1   :  { %3465 = vmatprep.subr.bf16.mxu1 %v3464_v15  ;;  %v447_v15 = vld [vmem:[#allocation6 + $0x898] sm:$0xff]  ;;  %v156_v17 = vld [vmem:[#allocation4] sm:$0xff]  ;;  %v3486_v19 = vpack.c.bf16 %v438_v12, %v430_v10  ;;  %v3232_v20 = vpack.c.bf16 %v453_v14, %v445_v13  ;;  %v454_v25 = vld [vmem:[#allocation6 + $0x8d0] sm:$0xff] }
  0xd2   :  { %v3488_v24 = vpack.c.bf16 %v455_v16, %v447_v15  ;;  %v461_v26 = vld [vmem:[#allocation6 + $0x908] sm:$0xff]  ;;  %v463_v28 = vld [vmem:[#allocation6 + $0x918] sm:$0xff]  ;;  %v470_v37 = vld [vmem:[#allocation6 + $0x950] sm:$0xff] }
  0xd3   :  { %3211 = vmatpush1.bf16.msra.mxu0 %v3210_v21  ;;  %v444_v21 = vld [vmem:[#allocation6 + $0x880] sm:$0xff]  ;;  %v471_v29 = vld [vmem:[#allocation6 + $0x958] sm:$0xff]  ;;  %v477_v38 = vld [vmem:[#allocation6 + $0x988] sm:$0xff] }
  0xd4   :  { %3467 = vmatpush1.bf16.msra.mxu1 %v3466_v22  ;;  %3213 = vmatprep.subr.bf16.mxu0 %v3212_v23  ;;  %v452_v22 = vld [vmem:[#allocation6 + $0x8c0] sm:$0xff]  ;;  %v446_v23 = vld [vmem:[#allocation6 + $0x890] sm:$0xff]  ;;  %v3492_v36 = vpack.c.bf16 %v471_v29, %v463_v28  ;;  %v479_v40 = vld [vmem:[#allocation6 + $0x998] sm:$0xff] }
  0xd5   :  { %3469 = vmatprep.subr.bf16.mxu1 %v3468_v27  ;;  %v469_v27 = vld [vmem:[#allocation6 + $0x948] sm:$0xff]  ;;  %v3234_v30 = vpack.c.bf16 %v452_v22, %v444_v21  ;;  %v3490_v31 = vpack.c.bf16 %v454_v25, %v446_v23  ;;  %v487_v41 = vld [vmem:[#allocation6 + $0x9d8] sm:$0xff]  ;;  %v486_v49 = vld [vmem:[#allocation6 + $0x9d0] sm:$0xff] }
  0xd6   :  { %v3236_v32 = vpack.c.bf16 %v469_v27, %v461_v26  ;;  %v3496_v48 = vpack.c.bf16 %v487_v41, %v479_v40  ;;  %v493_v50 = vld [vmem:[#allocation6 + $0xa08] sm:$0xff]  ;;  %v495_v52 = vld [vmem:[#allocation6 + $0xa18] sm:$0xff]  ;;  %v502_v61 = vld [vmem:[#allocation6 + $0xa50] sm:$0xff] }
  0xd7   :  { %3215 = vmatpush1.bf16.msra.mxu0 %v3214_v33  ;;  %v460_v33 = vld [vmem:[#allocation6 + $0x900] sm:$0xff]  ;;  %v503_v53 = vld [vmem:[#allocation6 + $0xa58] sm:$0xff]  ;;  %v509_v62 = vld [vmem:[#allocation6 + $0xa88] sm:$0xff] }
  0xd8   :  { %3471 = vmatpush1.bf16.msra.mxu1 %v3470_v34  ;;  %3217 = vmatprep.subr.bf16.mxu0 %v3216_v35  ;;  %v468_v34 = vld [vmem:[#allocation6 + $0x940] sm:$0xff]  ;;  %v462_v35 = vld [vmem:[#allocation6 + $0x910] sm:$0xff]  ;;  %v3500_v60 = vpack.c.bf16 %v503_v53, %v495_v52  ;;  %v511_v0 = vld [vmem:[#allocation6 + $0xa98] sm:$0xff] }
  0xd9   :  { %3473 = vmatprep.subr.bf16.mxu1 %v3472_v39  ;;  %v485_v39 = vld [vmem:[#allocation6 + $0x9c8] sm:$0xff]  ;;  %v3238_v42 = vpack.c.bf16 %v468_v34, %v460_v33  ;;  %v3494_v43 = vpack.c.bf16 %v470_v37, %v462_v35  ;;  %v519_v1 = vld [vmem:[#allocation6 + $0xad8] sm:$0xff]  ;;  %v518_v9 = vld [vmem:[#allocation6 + $0xad0] sm:$0xff] }
  0xda   :  { %v3240_v44 = vpack.c.bf16 %v485_v39, %v477_v38  ;;  %v3504_v8 = vpack.c.bf16 %v519_v1, %v511_v0  ;;  %v525_v10 = vld [vmem:[#allocation6 + $0xb08] sm:$0xff]  ;;  %v527_v12 = vld [vmem:[#allocation6 + $0xb18] sm:$0xff]  ;;  %v524_v16 = vld [vmem:[#allocation6 + $0xb00] sm:$0xff] }
  0xdb   :  { %3219 = vmatpush1.bf16.msra.mxu0 %v3218_v45  ;;  %v476_v45 = vld [vmem:[#allocation6 + $0x980] sm:$0xff]  ;;  %v535_v13 = vld [vmem:[#allocation6 + $0xb58] sm:$0xff]  ;;  %v165_v14 = vld [vmem:[#allocation4 + $0x48] sm:$0xff] }
  0xdc   :  { %3475 = vmatpush1.bf16.msra.mxu1 %v3474_v46  ;;  %3221 = vmatprep.subr.bf16.mxu0 %v3220_v47  ;;  %v484_v46 = vld [vmem:[#allocation6 + $0x9c0] sm:$0xff]  ;;  %v478_v47 = vld [vmem:[#allocation6 + $0x990] sm:$0xff]  ;;  %v3508_v23 = vpack.c.bf16 %v535_v13, %v527_v12  ;;  %v549_v25 = vld [vmem:[#allocation6 + $0xbc8] sm:$0xff] }
  0xdd   :  { %3477 = vmatprep.subr.bf16.mxu1 %v3476_v51  ;;  %v501_v51 = vld [vmem:[#allocation6 + $0xa48] sm:$0xff]  ;;  %v3242_v54 = vpack.c.bf16 %v484_v46, %v476_v45  ;;  %v3498_v55 = vpack.c.bf16 %v486_v49, %v478_v47  ;;  %v534_v21 = vld [vmem:[#allocation6 + $0xb50] sm:$0xff]  ;;  %v164_v22 = vld [vmem:[#allocation4 + $0x40] sm:$0xff] }
  0xde   :  { %v3244_v56 = vpack.c.bf16 %v501_v51, %v493_v50  ;;  %v159_v26 = vld [vmem:[#allocation4 + $0x18] sm:$0xff]  ;;  %v548_v33 = vld [vmem:[#allocation6 + $0xbc0] sm:$0xff]  ;;  %v542_v34 = vld [vmem:[#allocation6 + $0xb90] sm:$0xff] }
  0xdf   :  { %3223 = vmatpush1.bf16.msra.mxu0 %v3222_v57  ;;  %v492_v57 = vld [vmem:[#allocation6 + $0xa00] sm:$0xff]  ;;  %v543_v27 = vld [vmem:[#allocation6 + $0xb98] sm:$0xff]  ;;  %v557_v37 = vld [vmem:[#allocation6 + $0xc08] sm:$0xff] }
  0xe0   :  { %3479 = vmatpush1.bf16.msra.mxu1 %v3478_v58  ;;  %3225 = vmatprep.subr.bf16.mxu0 %v3224_v59  ;;  %v500_v58 = vld [vmem:[#allocation6 + $0xa40] sm:$0xff]  ;;  %v494_v59 = vld [vmem:[#allocation6 + $0xa10] sm:$0xff]  ;;  %v551_v28 = vld [vmem:[#allocation6 + $0xbd8] sm:$0xff] }
  0xe1   :  { %3481 = vmatprep.subr.bf16.mxu1 %v3480_v63  ;;  %v517_v63 = vld [vmem:[#allocation6 + $0xac8] sm:$0xff]  ;;  %v3246_v2 = vpack.c.bf16 %v500_v58, %v492_v57  ;;  %v3502_v3 = vpack.c.bf16 %v502_v61, %v494_v59  ;;  %v3512_v35 = vpack.c.bf16 %v551_v28, %v543_v27  ;;  %v559_v39 = vld [vmem:[#allocation6 + $0xc18] sm:$0xff]  ;;  %v564_v45 = vld [vmem:[#allocation6 + $0xc40] sm:$0xff] }
  0xe2   :  { %v3248_v4 = vpack.c.bf16 %v517_v63, %v509_v62  ;;  %v565_v38 = vld [vmem:[#allocation6 + $0xc48] sm:$0xff]  ;;  %v567_v40 = vld [vmem:[#allocation6 + $0xc58] sm:$0xff]  ;;  %v558_v46 = vld [vmem:[#allocation6 + $0xc10] sm:$0xff] }
  0xe3   :  { %3227 = vmatpush1.bf16.msra.mxu0 %v3226_v5  ;;  %v508_v5 = vld [vmem:[#allocation6 + $0xa80] sm:$0xff]  ;;  %v3516_v47 = vpack.c.bf16 %v567_v40, %v559_v39  ;;  %v573_v49 = vld [vmem:[#allocation6 + $0xc88] sm:$0xff]  ;;  %v575_v51 = vld [vmem:[#allocation6 + $0xc98] sm:$0xff] }
  0xe4   :  { %3483 = vmatpush1.bf16.msra.mxu1 %v3482_v6  ;;  %3229 = vmatprep.subr.bf16.mxu0 %v3228_v7  ;;  %v516_v6 = vld [vmem:[#allocation6 + $0xac0] sm:$0xff]  ;;  %v510_v7 = vld [vmem:[#allocation6 + $0xa90] sm:$0xff]  ;;  %v581_v50 = vld [vmem:[#allocation6 + $0xcc8] sm:$0xff] }
  0xe5   :  { %3485 = vmatprep.subr.bf16.mxu1 %v3484_v11  ;;  %v533_v11 = vld [vmem:[#allocation6 + $0xb48] sm:$0xff]  ;;  %v3250_v15 = vpack.c.bf16 %v516_v6, %v508_v5  ;;  %v583_v52 = vld [vmem:[#allocation6 + $0xcd8] sm:$0xff]  ;;  %v580_v57 = vld [vmem:[#allocation6 + $0xcc0] sm:$0xff] }
  0xe6   :  { %1303 = vmatmul.mubr.f32.vlgmr.msra.gmra.mrb[0].mxu0 %v156_v17  ;;  %v574_v58 = vld [vmem:[#allocation6 + $0xc90] sm:$0xff]  ;;  %v3520_v59 = vpack.c.bf16 %v583_v52, %v575_v51  ;;  %v589_v61 = vld [vmem:[#allocation6 + $0xd08] sm:$0xff]  ;;  %v591_v63 = vld [vmem:[#allocation6 + $0xd18] sm:$0xff] }
  0xe7   :  { %3231 = vmatpush1.bf16.msra.mxu0 %v3230_v18  ;;  %1611 = vmatmul.mubr.f32.vlgmr.msra.gmra.mrb[0].mxu1 %v156_v17  ;;  %v532_v17 = vld [vmem:[#allocation6 + $0xb40] sm:$0xff]  ;;  %v3506_v18 = vpack.c.bf16 %v518_v9, %v510_v7  ;;  %v597_v62 = vld [vmem:[#allocation6 + $0xd48] sm:$0xff]  ;;  %v599_v0 = vld [vmem:[#allocation6 + $0xd58] sm:$0xff] }
  0xe8   :  { %3487 = vmatpush1.bf16.msra.mxu1 %v3486_v19  ;;  %3233 = vmatprep.subr.bf16.mxu0 %v3232_v20  ;;  %v3252_v19 = vpack.c.bf16 %v533_v11, %v525_v10  ;;  %v526_v20 = vld [vmem:[#allocation6 + $0xb10] sm:$0xff]  ;;  %v3254_v29 = vpack.c.bf16 %v532_v17, %v524_v16  ;;  %v596_v5 = vld [vmem:[#allocation6 + $0xd40] sm:$0xff]  ;;  %v3524_v7 = vpack.c.bf16 %v599_v0, %v591_v63  ;;  %v605_v9 = vld [vmem:[#allocation6 + $0xd88] sm:$0xff] }
  0xe9   :  { %3489 = vmatprep.subr.bf16.mxu1 %v3488_v24  ;;  %1308 = vmatprep.mubr.f32.mxu0 %v165_v14  ;;  %v541_v24 = vld [vmem:[#allocation6 + $0xb88] sm:$0xff]  ;;  %v590_v6 = vld [vmem:[#allocation6 + $0xd10] sm:$0xff]  ;;  %v607_v11 = vld [vmem:[#allocation6 + $0xd98] sm:$0xff] }
  0xea   :  { %1616 = vmatprep.mubr.f32.mxu1 %v165_v14  ;;  %1309 = vmatmul.mubr.f32.gmra.mrb[2].mxu0 %v164_v22  ;;  %v613_v10 = vld [vmem:[#allocation6 + $0xdc8] sm:$0xff]  ;;  %v615_v12 = vld [vmem:[#allocation6 + $0xdd8] sm:$0xff]  ;;  %v604_v16 = vld [vmem:[#allocation6 + $0xd80] sm:$0xff] }
  0xeb   :  { %3235 = vmatpush1.bf16.msra.mxu0 %v3234_v30  ;;  %1617 = vmatmul.mubr.f32.gmra.mrb[2].mxu1 %v164_v22  ;;  %v3510_v30 = vpack.c.bf16 %v534_v21, %v526_v20  ;;  %v612_v17 = vld [vmem:[#allocation6 + $0xdc0] sm:$0xff]  ;;  %v614_v20 = vld [vmem:[#allocation6 + $0xdd0] sm:$0xff]  ;;  %v621_v21 = vld [vmem:[#allocation6 + $0xe08] sm:$0xff] }
  0xec   :  { %3491 = vmatpush1.bf16.msra.mxu1 %v3490_v31  ;;  %3237 = vmatprep.subr.bf16.mxu0 %v3236_v32  ;;  %v3256_v31 = vpack.c.bf16 %v549_v25, %v541_v24  ;;  %v540_v32 = vld [vmem:[#allocation6 + $0xb80] sm:$0xff]  ;;  %v629_v22 = vld [vmem:[#allocation6 + $0xe48] sm:$0xff]  ;;  %v631_v24 = vld [vmem:[#allocation6 + $0xe58] sm:$0xff]  ;;  %v3274_v25 = vpack.c.bf16 %v612_v17, %v604_v16 }
  0xed   :  { %3493 = vmatprep.subr.bf16.mxu1 %v3492_v36  ;;  %1379 = vmatprep.mubr.f32.mxu0 %v159_v26  ;;  %v550_v36 = vld [vmem:[#allocation6 + $0xbd0] sm:$0xff]  ;;  %v3258_v41 = vpack.c.bf16 %v548_v33, %v540_v32  ;;  %v3276_v27 = vpack.c.bf16 %v629_v22, %v621_v21  ;;  %v620_v28 = vld [vmem:[#allocation6 + $0xe00] sm:$0xff]  ;;  %v637_v33 = vld [vmem:[#allocation6 + $0xe88] sm:$0xff] }
  0xee   :  { %1687 = vmatprep.mubr.f32.mxu1 %v159_v26  ;;  %v630_v32 = vld [vmem:[#allocation6 + $0xe50] sm:$0xff]  ;;  %v636_v40 = vld [vmem:[#allocation6 + $0xe80] sm:$0xff]  ;;  %v701_v17 = vld [vmem:[#allocation6 + $0x1088] sm:$0xff] }
  0xef   :  { %3239 = vmatpush1.bf16.msra.mxu0 %v3238_v42  ;;  %v3514_v42 = vpack.c.bf16 %v550_v36, %v542_v34  ;;  %v645_v34 = vld [vmem:[#allocation6 + $0xec8] sm:$0xff]  ;;  %v647_v36 = vld [vmem:[#allocation6 + $0xed8] sm:$0xff]  ;;  %v652_v52 = vld [vmem:[#allocation6 + $0xf00] sm:$0xff] }
  0xf0   :  { %3495 = vmatpush1.bf16.msra.mxu1 %v3494_v43  ;;  %3241 = vmatprep.subr.bf16.mxu0 %v3240_v44  ;;  %v3260_v43 = vpack.c.bf16 %v565_v38, %v557_v37  ;;  %v556_v44 = vld [vmem:[#allocation6 + $0xc00] sm:$0xff]  ;;  %v3280_v39 = vpack.c.bf16 %v645_v34, %v637_v33  ;;  %v694_v16 = vld [vmem:[#allocation6 + $0x1050] sm:$0xff]  ;;  %v727_v33 = vld [vmem:[#allocation6 + $0x1158] sm:$0xff] }
  0xf1   :  { %3497 = vmatprep.subr.bf16.mxu1 %v3496_v48  ;;  %v566_v48 = vld [vmem:[#allocation6 + $0xc50] sm:$0xff]  ;;  %v3262_v53 = vpack.c.bf16 %v564_v45, %v556_v44  ;;  %v653_v45 = vld [vmem:[#allocation6 + $0xf08] sm:$0xff]  ;;  %v668_v0 = vld [vmem:[#allocation6 + $0xf80] sm:$0xff] }
  0xf2   :  { %v646_v44 = vld [vmem:[#allocation6 + $0xed0] sm:$0xff]  ;;  %v167_v34 = vld [vmem:[#allocation4 + $0x58] sm:$0xff] }
  0xf3   :  { %3243 = vmatpush1.bf16.msra.mxu0 %v3242_v54  ;;  %v3518_v54 = vpack.c.bf16 %v566_v48, %v558_v46  ;;  %v661_v46 = vld [vmem:[#allocation6 + $0xf48] sm:$0xff]  ;;  %v663_v48 = vld [vmem:[#allocation6 + $0xf58] sm:$0xff]  ;;  %v158_v21 = vld [vmem:[#allocation4 + $0x10] sm:$0xff] }
  0xf4   :  { %3499 = vmatpush1.bf16.msra.mxu1 %v3498_v55  ;;  %3245 = vmatprep.subr.bf16.mxu0 %v3244_v56  ;;  %v3264_v55 = vpack.c.bf16 %v581_v50, %v573_v49  ;;  %v572_v56 = vld [vmem:[#allocation6 + $0xc80] sm:$0xff]  ;;  %v3284_v51 = vpack.c.bf16 %v661_v46, %v653_v45  ;;  %v741_v45 = vld [vmem:[#allocation6 + $0x11c8] sm:$0xff]  ;;  %v735_v46 = vld [vmem:[#allocation6 + $0x1198] sm:$0xff] }
  0xf5   :  { %3501 = vmatprep.subr.bf16.mxu1 %v3500_v60  ;;  %v582_v60 = vld [vmem:[#allocation6 + $0xcd0] sm:$0xff]  ;;  %v3266_v1 = vpack.c.bf16 %v580_v57, %v572_v56  ;;  %v669_v57 = vld [vmem:[#allocation6 + $0xf88] sm:$0xff] }
  0xf6   :  { %v662_v56 = vld [vmem:[#allocation6 + $0xf50] sm:$0xff] }
  0xf7   :  { %3247 = vmatpush1.bf16.msra.mxu0 %v3246_v2  ;;  %v3522_v2 = vpack.c.bf16 %v582_v60, %v574_v58  ;;  %v677_v58 = vld [vmem:[#allocation6 + $0xfc8] sm:$0xff]  ;;  %v679_v60 = vld [vmem:[#allocation6 + $0xfd8] sm:$0xff] }
  0xf8   :  { %3503 = vmatpush1.bf16.msra.mxu1 %v3502_v3  ;;  %3249 = vmatprep.subr.bf16.mxu0 %v3248_v4  ;;  %v3268_v3 = vpack.c.bf16 %v597_v62, %v589_v61  ;;  %v588_v4 = vld [vmem:[#allocation6 + $0xd00] sm:$0xff]  ;;  %v3288_v63 = vpack.c.bf16 %v677_v58, %v669_v57  ;;  %v749_v57 = vld [vmem:[#allocation6 + $0x1208] sm:$0xff] }
  0xf9   :  { %3505 = vmatprep.subr.bf16.mxu1 %v3504_v8  ;;  %v598_v8 = vld [vmem:[#allocation6 + $0xd50] sm:$0xff]  ;;  %v3270_v13 = vpack.c.bf16 %v596_v5, %v588_v4  ;;  %v685_v5 = vld [vmem:[#allocation6 + $0x1008] sm:$0xff] }
  0xfa   :  { %v3526_v14 = vpack.c.bf16 %v598_v8, %v590_v6  ;;  %v678_v4 = vld [vmem:[#allocation6 + $0xfd0] sm:$0xff]  ;;  %v693_v6 = vld [vmem:[#allocation6 + $0x1048] sm:$0xff]  ;;  %v695_v8 = vld [vmem:[#allocation6 + $0x1058] sm:$0xff] }
  0xfb   :  { %3251 = vmatpush1.bf16.msra.mxu0 %v3250_v15  ;;  %v3272_v15 = vpack.c.bf16 %v613_v10, %v605_v9  ;;  %v757_v58 = vld [vmem:[#allocation6 + $0x1248] sm:$0xff] }
  0xfc   :  { %3507 = vmatpush1.bf16.msra.mxu1 %v3506_v18  ;;  %3253 = vmatprep.subr.bf16.mxu0 %v3252_v19  ;;  %v606_v18 = vld [vmem:[#allocation6 + $0xd90] sm:$0xff]  ;;  %v3528_v19 = vpack.c.bf16 %v615_v12, %v607_v11  ;;  %v3292_v11 = vpack.c.bf16 %v693_v6, %v685_v5  ;;  %v684_v12 = vld [vmem:[#allocation6 + $0x1000] sm:$0xff]  ;;  %v765_v5 = vld [vmem:[#allocation6 + $0x1288] sm:$0xff] }
  0xfd   :  { %3509 = vmatprep.subr.bf16.mxu1 %v3508_v23  ;;  %v623_v23 = vld [vmem:[#allocation6 + $0xe18] sm:$0xff]  ;;  %v3530_v26 = vpack.c.bf16 %v614_v20, %v606_v18  ;;  %v709_v18 = vld [vmem:[#allocation6 + $0x10c8] sm:$0xff] }
  0xfe   :  { %v711_v20 = vld [vmem:[#allocation6 + $0x10d8] sm:$0xff]  ;;  %v773_v6 = vld [vmem:[#allocation6 + $0x12c8] sm:$0xff] }
  0xff   :  { %3255 = vmatpush1.bf16.msra.mxu0 %v3254_v29  ;;  %v628_v29 = vld [vmem:[#allocation6 + $0xe40] sm:$0xff] }
 0x100   :  { %3511 = vmatpush1.bf16.msra.mxu1 %v3510_v30  ;;  %3257 = vmatprep.subr.bf16.mxu0 %v3256_v31  ;;  %v622_v30 = vld [vmem:[#allocation6 + $0xe10] sm:$0xff]  ;;  %v3532_v31 = vpack.c.bf16 %v631_v24, %v623_v23  ;;  %v3278_v37 = vpack.c.bf16 %v628_v29, %v620_v28  ;;  %v3296_v24 = vpack.c.bf16 %v709_v18, %v701_v17  ;;  %v781_v17 = vld [vmem:[#allocation6 + $0x1308] sm:$0xff] }
 0x101   :  { %3513 = vmatprep.subr.bf16.mxu1 %v3512_v35  ;;  %v639_v35 = vld [vmem:[#allocation6 + $0xe98] sm:$0xff]  ;;  %v3534_v38 = vpack.c.bf16 %v630_v32, %v622_v30  ;;  %v710_v29 = vld [vmem:[#allocation6 + $0x10d0] sm:$0xff]  ;;  %v717_v30 = vld [vmem:[#allocation6 + $0x1108] sm:$0xff] }
 0x102   :  { %v719_v32 = vld [vmem:[#allocation6 + $0x1118] sm:$0xff]  ;;  %v789_v18 = vld [vmem:[#allocation6 + $0x1348] sm:$0xff] }
 0x103   :  { %3259 = vmatpush1.bf16.msra.mxu0 %v3258_v41  ;;  %v644_v41 = vld [vmem:[#allocation6 + $0xec0] sm:$0xff] }
 0x104   :  { %3515 = vmatpush1.bf16.msra.mxu1 %v3514_v42  ;;  %3261 = vmatprep.subr.bf16.mxu0 %v3260_v43  ;;  %v638_v42 = vld [vmem:[#allocation6 + $0xe90] sm:$0xff]  ;;  %v3536_v43 = vpack.c.bf16 %v647_v36, %v639_v35  ;;  %v3282_v49 = vpack.c.bf16 %v644_v41, %v636_v40  ;;  %v724_v40 = vld [vmem:[#allocation6 + $0x1140] sm:$0xff] }
 0x105   :  { %3517 = vmatprep.subr.bf16.mxu1 %v3516_v47  ;;  %v655_v47 = vld [vmem:[#allocation6 + $0xf18] sm:$0xff]  ;;  %v3538_v50 = vpack.c.bf16 %v646_v44, %v638_v42  ;;  %v166_v36 = vld [vmem:[#allocation4 + $0x50] sm:$0xff]  ;;  %v3556_v42 = vpack.c.bf16 %v727_v33, %v719_v32  ;;  %v733_v44 = vld [vmem:[#allocation6 + $0x1188] sm:$0xff] }
 0x106   :  { %v718_v41 = vld [vmem:[#allocation6 + $0x1110] sm:$0xff]  ;;  %v807_v32 = vld [vmem:[#allocation6 + $0x13d8] sm:$0xff] }
 0x107   :  { %3263 = vmatpush1.bf16.msra.mxu0 %v3262_v53  ;;  %v660_v53 = vld [vmem:[#allocation6 + $0xf40] sm:$0xff] }
 0x108   :  { %3519 = vmatpush1.bf16.msra.mxu1 %v3518_v54  ;;  %3265 = vmatprep.subr.bf16.mxu0 %v3264_v55  ;;  %v654_v54 = vld [vmem:[#allocation6 + $0xf10] sm:$0xff]  ;;  %v3540_v55 = vpack.c.bf16 %v663_v48, %v655_v47  ;;  %v3286_v61 = vpack.c.bf16 %v660_v53, %v652_v52  ;;  %v743_v47 = vld [vmem:[#allocation6 + $0x11d8] sm:$0xff]  ;;  %v161_v48 = vld [vmem:[#allocation4 + $0x28] sm:$0xff] }
 0x109   :  { %3521 = vmatprep.subr.bf16.mxu1 %v3520_v59  ;;  %v671_v59 = vld [vmem:[#allocation6 + $0xf98] sm:$0xff]  ;;  %v3542_v62 = vpack.c.bf16 %v662_v56, %v654_v54  ;;  %v732_v52 = vld [vmem:[#allocation6 + $0x1180] sm:$0xff]  ;;  %v734_v54 = vld [vmem:[#allocation6 + $0x1190] sm:$0xff] }
 0x10a   :  { %v740_v53 = vld [vmem:[#allocation6 + $0x11c0] sm:$0xff]  ;;  %v742_v56 = vld [vmem:[#allocation6 + $0x11d0] sm:$0xff] }
 0x10b   :  { %3267 = vmatpush1.bf16.msra.mxu0 %v3266_v1  ;;  %v676_v1 = vld [vmem:[#allocation6 + $0xfc0] sm:$0xff] }
 0x10c   :  { %3523 = vmatpush1.bf16.msra.mxu1 %v3522_v2  ;;  %3269 = vmatprep.subr.bf16.mxu0 %v3268_v3  ;;  %v670_v2 = vld [vmem:[#allocation6 + $0xf90] sm:$0xff]  ;;  %v3544_v3 = vpack.c.bf16 %v679_v60, %v671_v59  ;;  %v3290_v9 = vpack.c.bf16 %v676_v1, %v668_v0  ;;  %v751_v59 = vld [vmem:[#allocation6 + $0x1218] sm:$0xff]  ;;  %v748_v0 = vld [vmem:[#allocation6 + $0x1200] sm:$0xff] }
 0x10d   :  { %3525 = vmatprep.subr.bf16.mxu1 %v3524_v7  ;;  %v687_v7 = vld [vmem:[#allocation6 + $0x1018] sm:$0xff]  ;;  %v3546_v10 = vpack.c.bf16 %v678_v4, %v670_v2  ;;  %v756_v1 = vld [vmem:[#allocation6 + $0x1240] sm:$0xff]  ;;  %v750_v2 = vld [vmem:[#allocation6 + $0x1210] sm:$0xff] }
 0x10e   :  { %v759_v60 = vld [vmem:[#allocation6 + $0x1258] sm:$0xff]  ;;  %v758_v4 = vld [vmem:[#allocation6 + $0x1250] sm:$0xff] }
 0x10f   :  { %3271 = vmatpush1.bf16.msra.mxu0 %v3270_v13  ;;  %v692_v13 = vld [vmem:[#allocation6 + $0x1040] sm:$0xff] }
 0x110   :  { %3527 = vmatpush1.bf16.msra.mxu1 %v3526_v14  ;;  %3273 = vmatprep.subr.bf16.mxu0 %v3272_v15  ;;  %v686_v14 = vld [vmem:[#allocation6 + $0x1010] sm:$0xff]  ;;  %v3548_v15 = vpack.c.bf16 %v695_v8, %v687_v7  ;;  %v3294_v22 = vpack.c.bf16 %v692_v13, %v684_v12  ;;  %v767_v7 = vld [vmem:[#allocation6 + $0x1298] sm:$0xff]  ;;  %v764_v12 = vld [vmem:[#allocation6 + $0x1280] sm:$0xff] }
 0x111   :  { %3529 = vmatprep.subr.bf16.mxu1 %v3528_v19  ;;  %v703_v19 = vld [vmem:[#allocation6 + $0x1098] sm:$0xff]  ;;  %v3550_v23 = vpack.c.bf16 %v694_v16, %v686_v14  ;;  %v772_v13 = vld [vmem:[#allocation6 + $0x12c0] sm:$0xff]  ;;  %v766_v14 = vld [vmem:[#allocation6 + $0x1290] sm:$0xff] }
 0x112   :  { %v3552_v28 = vpack.c.bf16 %v711_v20, %v703_v19  ;;  %v775_v8 = vld [vmem:[#allocation6 + $0x12d8] sm:$0xff]  ;;  %v774_v16 = vld [vmem:[#allocation6 + $0x12d0] sm:$0xff] }
 0x113   :  { %3275 = vmatpush1.bf16.msra.mxu0 %v3274_v25  ;;  %v700_v25 = vld [vmem:[#allocation6 + $0x1080] sm:$0xff]  ;;  %v783_v19 = vld [vmem:[#allocation6 + $0x1318] sm:$0xff] }
 0x114   :  { %3531 = vmatpush1.bf16.msra.mxu1 %v3530_v26  ;;  %3277 = vmatprep.subr.bf16.mxu0 %v3276_v27  ;;  %v708_v26 = vld [vmem:[#allocation6 + $0x10c0] sm:$0xff]  ;;  %v702_v27 = vld [vmem:[#allocation6 + $0x1090] sm:$0xff]  ;;  %v791_v20 = vld [vmem:[#allocation6 + $0x1358] sm:$0xff] }
 0x115   :  { %3533 = vmatprep.subr.bf16.mxu1 %v3532_v31  ;;  %v725_v31 = vld [vmem:[#allocation6 + $0x1148] sm:$0xff]  ;;  %v3298_v35 = vpack.c.bf16 %v708_v26, %v700_v25  ;;  %v788_v25 = vld [vmem:[#allocation6 + $0x1340] sm:$0xff]  ;;  %v782_v26 = vld [vmem:[#allocation6 + $0x1310] sm:$0xff] }
 0x117   :  { %3279 = vmatpush1.bf16.msra.mxu0 %v3278_v37  ;;  %v3554_v37 = vpack.c.bf16 %v710_v29, %v702_v27  ;;  %v3572_v27 = vpack.c.bf16 %v791_v20, %v783_v19  ;;  %v797_v29 = vld [vmem:[#allocation6 + $0x1388] sm:$0xff]  ;;  %v860_v20 = vld [vmem:[#allocation6 + $0x1580] sm:$0xff] }
 0x118   :  { %3535 = vmatpush1.bf16.msra.mxu1 %v3534_v38  ;;  %3281 = vmatprep.subr.bf16.mxu0 %v3280_v39  ;;  %v3300_v38 = vpack.c.bf16 %v725_v31, %v717_v30  ;;  %v716_v39 = vld [vmem:[#allocation6 + $0x1100] sm:$0xff]  ;;  %v805_v30 = vld [vmem:[#allocation6 + $0x13c8] sm:$0xff]  ;;  %v799_v31 = vld [vmem:[#allocation6 + $0x1398] sm:$0xff] }
 0x119   :  { %3537 = vmatprep.subr.bf16.mxu1 %v3536_v43  ;;  %v726_v43 = vld [vmem:[#allocation6 + $0x1150] sm:$0xff] }
 0x11b   :  { %3283 = vmatpush1.bf16.msra.mxu0 %v3282_v49  ;;  %v3302_v49 = vpack.c.bf16 %v724_v40, %v716_v39  ;;  %v3576_v39 = vpack.c.bf16 %v807_v32, %v799_v31  ;;  %v806_v40 = vld [vmem:[#allocation6 + $0x13d0] sm:$0xff]  ;;  %v876_v32 = vld [vmem:[#allocation6 + $0x1600] sm:$0xff] }
 0x11c   :  { %3539 = vmatpush1.bf16.msra.mxu1 %v3538_v50  ;;  %3285 = vmatprep.subr.bf16.mxu0 %v3284_v51  ;;  %v3558_v50 = vpack.c.bf16 %v726_v43, %v718_v41  ;;  %v3304_v51 = vpack.c.bf16 %v741_v45, %v733_v44  ;;  %v813_v41 = vld [vmem:[#allocation6 + $0x1408] sm:$0xff]  ;;  %v815_v43 = vld [vmem:[#allocation6 + $0x1418] sm:$0xff] }
 0x11d   :  { %3541 = vmatprep.subr.bf16.mxu1 %v3540_v55  ;;  %v3560_v55 = vpack.c.bf16 %v743_v47, %v735_v46  ;;  %v823_v44 = vld [vmem:[#allocation6 + $0x1458] sm:$0xff] }
 0x11f   :  { %3287 = vmatpush1.bf16.msra.mxu0 %v3286_v61  ;;  %v3306_v61 = vpack.c.bf16 %v740_v53, %v732_v52  ;;  %v822_v52 = vld [vmem:[#allocation6 + $0x1450] sm:$0xff]  ;;  %v829_v53 = vld [vmem:[#allocation6 + $0x1488] sm:$0xff] }
 0x120   :  { %3543 = vmatpush1.bf16.msra.mxu1 %v3542_v62  ;;  %3289 = vmatprep.subr.bf16.mxu0 %v3288_v63  ;;  %v3562_v62 = vpack.c.bf16 %v742_v56, %v734_v54  ;;  %v3308_v63 = vpack.c.bf16 %v757_v58, %v749_v57  ;;  %v837_v54 = vld [vmem:[#allocation6 + $0x14c8] sm:$0xff]  ;;  %v839_v56 = vld [vmem:[#allocation6 + $0x14d8] sm:$0xff] }
 0x121   :  { %3545 = vmatprep.subr.bf16.mxu1 %v3544_v3  ;;  %v3564_v3 = vpack.c.bf16 %v759_v60, %v751_v59  ;;  %v3328_v59 = vpack.c.bf16 %v837_v54, %v829_v53  ;;  %v828_v60 = vld [vmem:[#allocation6 + $0x1480] sm:$0xff] }
 0x123   :  { %3291 = vmatpush1.bf16.msra.mxu0 %v3290_v9  ;;  %v3310_v9 = vpack.c.bf16 %v756_v1, %v748_v0  ;;  %v838_v0 = vld [vmem:[#allocation6 + $0x14d0] sm:$0xff]  ;;  %v845_v1 = vld [vmem:[#allocation6 + $0x1508] sm:$0xff] }
 0x124   :  { %3547 = vmatpush1.bf16.msra.mxu1 %v3546_v10  ;;  %3293 = vmatprep.subr.bf16.mxu0 %v3292_v11  ;;  %v3566_v10 = vpack.c.bf16 %v758_v4, %v750_v2  ;;  %v3312_v11 = vpack.c.bf16 %v773_v6, %v765_v5  ;;  %v853_v2 = vld [vmem:[#allocation6 + $0x1548] sm:$0xff]  ;;  %v855_v4 = vld [vmem:[#allocation6 + $0x1558] sm:$0xff] }
 0x125   :  { %3549 = vmatprep.subr.bf16.mxu1 %v3548_v15  ;;  %v3568_v15 = vpack.c.bf16 %v775_v8, %v767_v7  ;;  %v3332_v7 = vpack.c.bf16 %v853_v2, %v845_v1  ;;  %v844_v8 = vld [vmem:[#allocation6 + $0x1500] sm:$0xff] }
 0x126   :  { %1380 = vmatmul.mubr.f32.vlgmr.msra.gmra.mrb[0].mxu0 %v158_v21 }
 0x127   :  { %3295 = vmatpush1.bf16.msra.mxu0 %v3294_v22  ;;  %1688 = vmatmul.mubr.f32.vlgmr.msra.gmra.mrb[0].mxu1 %v158_v21  ;;  %v3314_v21 = vpack.c.bf16 %v772_v13, %v764_v12  ;;  %v3570_v22 = vpack.c.bf16 %v774_v16, %v766_v14  ;;  %v854_v12 = vld [vmem:[#allocation6 + $0x1550] sm:$0xff]  ;;  %v861_v13 = vld [vmem:[#allocation6 + $0x1588] sm:$0xff]  ;;  %v871_v16 = vld [vmem:[#allocation6 + $0x15d8] sm:$0xff] }
 0x128   :  { %3551 = vmatpush1.bf16.msra.mxu1 %v3550_v23  ;;  %3297 = vmatprep.subr.bf16.mxu0 %v3296_v24  ;;  %v3316_v23 = vpack.c.bf16 %v789_v18, %v781_v17  ;;  %v780_v24 = vld [vmem:[#allocation6 + $0x1300] sm:$0xff]  ;;  %v869_v14 = vld [vmem:[#allocation6 + $0x15c8] sm:$0xff] }
 0x129   :  { %3553 = vmatprep.subr.bf16.mxu1 %v3552_v28  ;;  %1385 = vmatprep.mubr.f32.mxu0 %v167_v34  ;;  %v790_v28 = vld [vmem:[#allocation6 + $0x1350] sm:$0xff]  ;;  %v3318_v33 = vpack.c.bf16 %v788_v25, %v780_v24  ;;  %v3336_v19 = vpack.c.bf16 %v869_v14, %v861_v13  ;;  %v877_v25 = vld [vmem:[#allocation6 + $0x1608] sm:$0xff] }
 0x12a   :  { %1693 = vmatprep.mubr.f32.mxu1 %v167_v34  ;;  %1386 = vmatmul.mubr.f32.gmra.mrb[2].mxu0 %v166_v36  ;;  %v3574_v34 = vpack.c.bf16 %v790_v28, %v782_v26  ;;  %v870_v24 = vld [vmem:[#allocation6 + $0x15d0] sm:$0xff]  ;;  %v885_v26 = vld [vmem:[#allocation6 + $0x1648] sm:$0xff]  ;;  %v887_v28 = vld [vmem:[#allocation6 + $0x1658] sm:$0xff] }
 0x12b   :  { %3299 = vmatpush1.bf16.msra.mxu0 %v3298_v35  ;;  %1694 = vmatmul.mubr.f32.gmra.mrb[2].mxu1 %v166_v36  ;;  %v3320_v35 = vpack.c.bf16 %v805_v30, %v797_v29  ;;  %v796_v36 = vld [vmem:[#allocation6 + $0x1380] sm:$0xff]  ;;  %v3340_v31 = vpack.c.bf16 %v885_v26, %v877_v25 }
 0x12c   :  { %3555 = vmatpush1.bf16.msra.mxu1 %v3554_v37  ;;  %3301 = vmatprep.subr.bf16.mxu0 %v3300_v38  ;;  %v804_v37 = vld [vmem:[#allocation6 + $0x13c0] sm:$0xff]  ;;  %v798_v38 = vld [vmem:[#allocation6 + $0x1390] sm:$0xff] }
 0x12d   :  { %3557 = vmatprep.subr.bf16.mxu1 %v3556_v42  ;;  %1456 = vmatprep.mubr.f32.mxu0 %v161_v48  ;;  %v821_v42 = vld [vmem:[#allocation6 + $0x1448] sm:$0xff]  ;;  %v3322_v45 = vpack.c.bf16 %v804_v37, %v796_v36  ;;  %v3578_v46 = vpack.c.bf16 %v806_v40, %v798_v38  ;;  %v886_v36 = vld [vmem:[#allocation6 + $0x1650] sm:$0xff]  ;;  %v903_v40 = vld [vmem:[#allocation6 + $0x16d8] sm:$0xff] }
 0x12e   :  { %1764 = vmatprep.mubr.f32.mxu1 %v161_v48  ;;  %v3324_v47 = vpack.c.bf16 %v821_v42, %v813_v41  ;;  %v812_v48 = vld [vmem:[#allocation6 + $0x1400] sm:$0xff]  ;;  %v893_v37 = vld [vmem:[#allocation6 + $0x1688] sm:$0xff] }
 0x12f   :  { %3303 = vmatpush1.bf16.msra.mxu0 %v3302_v49  ;;  %v820_v49 = vld [vmem:[#allocation6 + $0x1440] sm:$0xff]  ;;  %v901_v38 = vld [vmem:[#allocation6 + $0x16c8] sm:$0xff] }
 0x130   :  { %3559 = vmatpush1.bf16.msra.mxu1 %v3558_v50  ;;  %3305 = vmatprep.subr.bf16.mxu0 %v3304_v51  ;;  %v814_v50 = vld [vmem:[#allocation6 + $0x1410] sm:$0xff]  ;;  %v3580_v51 = vpack.c.bf16 %v823_v44, %v815_v43  ;;  %v3326_v57 = vpack.c.bf16 %v820_v49, %v812_v48  ;;  %v3344_v43 = vpack.c.bf16 %v901_v38, %v893_v37  ;;  %v892_v44 = vld [vmem:[#allocation6 + $0x1680] sm:$0xff]  ;;  %v909_v49 = vld [vmem:[#allocation6 + $0x1708] sm:$0xff] }
 0x131   :  { %3561 = vmatprep.subr.bf16.mxu1 %v3560_v55  ;;  %v831_v55 = vld [vmem:[#allocation6 + $0x1498] sm:$0xff]  ;;  %v3582_v58 = vpack.c.bf16 %v822_v52, %v814_v50  ;;  %v902_v48 = vld [vmem:[#allocation6 + $0x16d0] sm:$0xff]  ;;  %v917_v50 = vld [vmem:[#allocation6 + $0x1748] sm:$0xff] }
 0x132   :  { %v919_v52 = vld [vmem:[#allocation6 + $0x1758] sm:$0xff]  ;;  %v160_v25 = vld [vmem:[#allocation4 + $0x20] sm:$0xff]  ;;  %v169_v38 = vld [vmem:[#allocation4 + $0x68] sm:$0xff] }
 0x133   :  { %3307 = vmatpush1.bf16.msra.mxu0 %v3306_v61  ;;  %v836_v61 = vld [vmem:[#allocation6 + $0x14c0] sm:$0xff]  ;;  %v983_v37 = vld [vmem:[#allocation6 + $0x1958] sm:$0xff] }
 0x134   :  { %3563 = vmatpush1.bf16.msra.mxu1 %v3562_v62  ;;  %3309 = vmatprep.subr.bf16.mxu0 %v3308_v63  ;;  %v830_v62 = vld [vmem:[#allocation6 + $0x1490] sm:$0xff]  ;;  %v3584_v63 = vpack.c.bf16 %v839_v56, %v831_v55  ;;  %v3330_v5 = vpack.c.bf16 %v836_v61, %v828_v60  ;;  %v3348_v55 = vpack.c.bf16 %v917_v50, %v909_v49  ;;  %v908_v56 = vld [vmem:[#allocation6 + $0x1700] sm:$0xff]  ;;  %v925_v61 = vld [vmem:[#allocation6 + $0x1788] sm:$0xff] }
 0x135   :  { %3565 = vmatprep.subr.bf16.mxu1 %v3564_v3  ;;  %v847_v3 = vld [vmem:[#allocation6 + $0x1518] sm:$0xff]  ;;  %v3586_v6 = vpack.c.bf16 %v838_v0, %v830_v62  ;;  %v918_v60 = vld [vmem:[#allocation6 + $0x1750] sm:$0xff]  ;;  %v933_v62 = vld [vmem:[#allocation6 + $0x17c8] sm:$0xff] }
 0x136   :  { %v935_v0 = vld [vmem:[#allocation6 + $0x17d8] sm:$0xff]  ;;  %v997_v49 = vld [vmem:[#allocation6 + $0x19c8] sm:$0xff] }
 0x137   :  { %3311 = vmatpush1.bf16.msra.mxu0 %v3310_v9  ;;  %v852_v9 = vld [vmem:[#allocation6 + $0x1540] sm:$0xff]  ;;  %v991_v50 = vld [vmem:[#allocation6 + $0x1998] sm:$0xff] }
 0x138   :  { %3567 = vmatpush1.bf16.msra.mxu1 %v3566_v10  ;;  %3313 = vmatprep.subr.bf16.mxu0 %v3312_v11  ;;  %v846_v10 = vld [vmem:[#allocation6 + $0x1510] sm:$0xff]  ;;  %v3588_v11 = vpack.c.bf16 %v855_v4, %v847_v3  ;;  %v3334_v17 = vpack.c.bf16 %v852_v9, %v844_v8  ;;  %v3352_v3 = vpack.c.bf16 %v933_v62, %v925_v61  ;;  %v924_v4 = vld [vmem:[#allocation6 + $0x1780] sm:$0xff]  ;;  %v941_v9 = vld [vmem:[#allocation6 + $0x1808] sm:$0xff] }
 0x139   :  { %3569 = vmatprep.subr.bf16.mxu1 %v3568_v15  ;;  %v863_v15 = vld [vmem:[#allocation6 + $0x1598] sm:$0xff]  ;;  %v3590_v18 = vpack.c.bf16 %v854_v12, %v846_v10  ;;  %v934_v8 = vld [vmem:[#allocation6 + $0x17d0] sm:$0xff]  ;;  %v949_v10 = vld [vmem:[#allocation6 + $0x1848] sm:$0xff] }
 0x13a   :  { %v951_v12 = vld [vmem:[#allocation6 + $0x1858] sm:$0xff]  ;;  %v1005_v61 = vld [vmem:[#allocation6 + $0x1a08] sm:$0xff] }
 0x13b   :  { %3315 = vmatpush1.bf16.msra.mxu0 %v3314_v21  ;;  %v868_v21 = vld [vmem:[#allocation6 + $0x15c0] sm:$0xff]  ;;  %v1013_v62 = vld [vmem:[#allocation6 + $0x1a48] sm:$0xff] }
 0x13c   :  { %3571 = vmatpush1.bf16.msra.mxu1 %v3570_v22  ;;  %3317 = vmatprep.subr.bf16.mxu0 %v3316_v23  ;;  %v862_v22 = vld [vmem:[#allocation6 + $0x1590] sm:$0xff]  ;;  %v3592_v23 = vpack.c.bf16 %v871_v16, %v863_v15  ;;  %v3338_v29 = vpack.c.bf16 %v868_v21, %v860_v20  ;;  %v3356_v15 = vpack.c.bf16 %v949_v10, %v941_v9  ;;  %v940_v16 = vld [vmem:[#allocation6 + $0x1800] sm:$0xff]  ;;  %v957_v21 = vld [vmem:[#allocation6 + $0x1888] sm:$0xff] }
 0x13d   :  { %3573 = vmatprep.subr.bf16.mxu1 %v3572_v27  ;;  %v879_v27 = vld [vmem:[#allocation6 + $0x1618] sm:$0xff]  ;;  %v3594_v30 = vpack.c.bf16 %v870_v24, %v862_v22  ;;  %v950_v20 = vld [vmem:[#allocation6 + $0x1850] sm:$0xff]  ;;  %v965_v22 = vld [vmem:[#allocation6 + $0x18c8] sm:$0xff] }
 0x13e   :  { %v967_v24 = vld [vmem:[#allocation6 + $0x18d8] sm:$0xff]  ;;  %v1021_v9 = vld [vmem:[#allocation6 + $0x1a88] sm:$0xff] }
 0x13f   :  { %3319 = vmatpush1.bf16.msra.mxu0 %v3318_v33  ;;  %v884_v33 = vld [vmem:[#allocation6 + $0x1640] sm:$0xff]  ;;  %v1029_v10 = vld [vmem:[#allocation6 + $0x1ac8] sm:$0xff] }
 0x140   :  { %3575 = vmatpush1.bf16.msra.mxu1 %v3574_v34  ;;  %3321 = vmatprep.subr.bf16.mxu0 %v3320_v35  ;;  %v878_v34 = vld [vmem:[#allocation6 + $0x1610] sm:$0xff]  ;;  %v3596_v35 = vpack.c.bf16 %v887_v28, %v879_v27  ;;  %v3342_v41 = vpack.c.bf16 %v884_v33, %v876_v32  ;;  %v3360_v28 = vpack.c.bf16 %v965_v22, %v957_v21  ;;  %v1037_v21 = vld [vmem:[#allocation6 + $0x1b08] sm:$0xff] }
 0x141   :  { %3577 = vmatprep.subr.bf16.mxu1 %v3576_v39  ;;  %v895_v39 = vld [vmem:[#allocation6 + $0x1698] sm:$0xff]  ;;  %v3598_v42 = vpack.c.bf16 %v886_v36, %v878_v34  ;;  %v966_v33 = vld [vmem:[#allocation6 + $0x18d0] sm:$0xff]  ;;  %v973_v34 = vld [vmem:[#allocation6 + $0x1908] sm:$0xff] }
 0x142   :  { %v975_v36 = vld [vmem:[#allocation6 + $0x1918] sm:$0xff]  ;;  %v1045_v22 = vld [vmem:[#allocation6 + $0x1b48] sm:$0xff] }
 0x143   :  { %3323 = vmatpush1.bf16.msra.mxu0 %v3322_v45  ;;  %v900_v45 = vld [vmem:[#allocation6 + $0x16c0] sm:$0xff] }
 0x144   :  { %3579 = vmatpush1.bf16.msra.mxu1 %v3578_v46  ;;  %3325 = vmatprep.subr.bf16.mxu0 %v3324_v47  ;;  %v894_v46 = vld [vmem:[#allocation6 + $0x1690] sm:$0xff]  ;;  %v3600_v47 = vpack.c.bf16 %v903_v40, %v895_v39  ;;  %v3346_v53 = vpack.c.bf16 %v900_v45, %v892_v44  ;;  %v168_v40 = vld [vmem:[#allocation4 + $0x60] sm:$0xff] }
 0x145   :  { %3581 = vmatprep.subr.bf16.mxu1 %v3580_v51  ;;  %v911_v51 = vld [vmem:[#allocation6 + $0x1718] sm:$0xff]  ;;  %v3602_v54 = vpack.c.bf16 %v902_v48, %v894_v46  ;;  %v980_v44 = vld [vmem:[#allocation6 + $0x1940] sm:$0xff]  ;;  %v974_v45 = vld [vmem:[#allocation6 + $0x1910] sm:$0xff]  ;;  %v3620_v46 = vpack.c.bf16 %v983_v37, %v975_v36 }
 0x146   :  { %v989_v48 = vld [vmem:[#allocation6 + $0x1988] sm:$0xff]  ;;  %v1063_v36 = vld [vmem:[#allocation6 + $0x1bd8] sm:$0xff] }
 0x147   :  { %3327 = vmatpush1.bf16.msra.mxu0 %v3326_v57  ;;  %v916_v57 = vld [vmem:[#allocation6 + $0x1740] sm:$0xff] }
 0x148   :  { %3583 = vmatpush1.bf16.msra.mxu1 %v3582_v58  ;;  %3329 = vmatprep.subr.bf16.mxu0 %v3328_v59  ;;  %v910_v58 = vld [vmem:[#allocation6 + $0x1710] sm:$0xff]  ;;  %v3604_v59 = vpack.c.bf16 %v919_v52, %v911_v51  ;;  %v3350_v1 = vpack.c.bf16 %v916_v57, %v908_v56  ;;  %v999_v51 = vld [vmem:[#allocation6 + $0x19d8] sm:$0xff]  ;;  %v988_v56 = vld [vmem:[#allocation6 + $0x1980] sm:$0xff] }
 0x149   :  { %3585 = vmatprep.subr.bf16.mxu1 %v3584_v63  ;;  %v927_v63 = vld [vmem:[#allocation6 + $0x1798] sm:$0xff]  ;;  %v3606_v2 = vpack.c.bf16 %v918_v60, %v910_v58  ;;  %v996_v57 = vld [vmem:[#allocation6 + $0x19c0] sm:$0xff]  ;;  %v990_v58 = vld [vmem:[#allocation6 + $0x1990] sm:$0xff] }
 0x14a   :  { %v163_v52 = vld [vmem:[#allocation4 + $0x38] sm:$0xff]  ;;  %v998_v60 = vld [vmem:[#allocation6 + $0x19d0] sm:$0xff] }
 0x14b   :  { %3331 = vmatpush1.bf16.msra.mxu0 %v3330_v5  ;;  %v932_v5 = vld [vmem:[#allocation6 + $0x17c0] sm:$0xff] }
 0x14c   :  { %3587 = vmatpush1.bf16.msra.mxu1 %v3586_v6  ;;  %3333 = vmatprep.subr.bf16.mxu0 %v3332_v7  ;;  %v926_v6 = vld [vmem:[#allocation6 + $0x1790] sm:$0xff]  ;;  %v3608_v7 = vpack.c.bf16 %v935_v0, %v927_v63  ;;  %v3354_v13 = vpack.c.bf16 %v932_v5, %v924_v4  ;;  %v1007_v63 = vld [vmem:[#allocation6 + $0x1a18] sm:$0xff]  ;;  %v1004_v4 = vld [vmem:[#allocation6 + $0x1a00] sm:$0xff] }
 0x14d   :  { %3589 = vmatprep.subr.bf16.mxu1 %v3588_v11  ;;  %v943_v11 = vld [vmem:[#allocation6 + $0x1818] sm:$0xff]  ;;  %v3610_v14 = vpack.c.bf16 %v934_v8, %v926_v6  ;;  %v1012_v5 = vld [vmem:[#allocation6 + $0x1a40] sm:$0xff]  ;;  %v1006_v6 = vld [vmem:[#allocation6 + $0x1a10] sm:$0xff] }
 0x14e   :  { %v1015_v0 = vld [vmem:[#allocation6 + $0x1a58] sm:$0xff]  ;;  %v1014_v8 = vld [vmem:[#allocation6 + $0x1a50] sm:$0xff] }
 0x14f   :  { %3335 = vmatpush1.bf16.msra.mxu0 %v3334_v17  ;;  %v948_v17 = vld [vmem:[#allocation6 + $0x1840] sm:$0xff] }
 0x150   :  { %3591 = vmatpush1.bf16.msra.mxu1 %v3590_v18  ;;  %3337 = vmatprep.subr.bf16.mxu0 %v3336_v19  ;;  %v942_v18 = vld [vmem:[#allocation6 + $0x1810] sm:$0xff]  ;;  %v3612_v19 = vpack.c.bf16 %v951_v12, %v943_v11  ;;  %v3358_v26 = vpack.c.bf16 %v948_v17, %v940_v16  ;;  %v1023_v11 = vld [vmem:[#allocation6 + $0x1a98] sm:$0xff]  ;;  %v1020_v16 = vld [vmem:[#allocation6 + $0x1a80] sm:$0xff] }
 0x151   :  { %3593 = vmatprep.subr.bf16.mxu1 %v3592_v23  ;;  %v959_v23 = vld [vmem:[#allocation6 + $0x1898] sm:$0xff]  ;;  %v3614_v27 = vpack.c.bf16 %v950_v20, %v942_v18  ;;  %v1028_v17 = vld [vmem:[#allocation6 + $0x1ac0] sm:$0xff]  ;;  %v1022_v18 = vld [vmem:[#allocation6 + $0x1a90] sm:$0xff] }
 0x152   :  { %v3616_v32 = vpack.c.bf16 %v967_v24, %v959_v23  ;;  %v1031_v12 = vld [vmem:[#allocation6 + $0x1ad8] sm:$0xff]  ;;  %v1030_v20 = vld [vmem:[#allocation6 + $0x1ad0] sm:$0xff] }
 0x153   :  { %3339 = vmatpush1.bf16.msra.mxu0 %v3338_v29  ;;  %v956_v29 = vld [vmem:[#allocation6 + $0x1880] sm:$0xff]  ;;  %v1039_v23 = vld [vmem:[#allocation6 + $0x1b18] sm:$0xff] }
 0x154   :  { %3595 = vmatpush1.bf16.msra.mxu1 %v3594_v30  ;;  %3341 = vmatprep.subr.bf16.mxu0 %v3340_v31  ;;  %v964_v30 = vld [vmem:[#allocation6 + $0x18c0] sm:$0xff]  ;;  %v958_v31 = vld [vmem:[#allocation6 + $0x1890] sm:$0xff]  ;;  %v1047_v24 = vld [vmem:[#allocation6 + $0x1b58] sm:$0xff] }
 0x155   :  { %3597 = vmatprep.subr.bf16.mxu1 %v3596_v35  ;;  %v981_v35 = vld [vmem:[#allocation6 + $0x1948] sm:$0xff]  ;;  %v3362_v39 = vpack.c.bf16 %v964_v30, %v956_v29  ;;  %v1044_v29 = vld [vmem:[#allocation6 + $0x1b40] sm:$0xff]  ;;  %v1038_v30 = vld [vmem:[#allocation6 + $0x1b10] sm:$0xff] }
 0x157   :  { %3343 = vmatpush1.bf16.msra.mxu0 %v3342_v41  ;;  %v3618_v41 = vpack.c.bf16 %v966_v33, %v958_v31  ;;  %v3636_v31 = vpack.c.bf16 %v1047_v24, %v1039_v23  ;;  %v1053_v33 = vld [vmem:[#allocation6 + $0x1b88] sm:$0xff]  ;;  %v1116_v24 = vld [vmem:[#allocation6 + $0x1d80] sm:$0xff] }
 0x158   :  { %3599 = vmatpush1.bf16.msra.mxu1 %v3598_v42  ;;  %3345 = vmatprep.subr.bf16.mxu0 %v3344_v43  ;;  %v3364_v42 = vpack.c.bf16 %v981_v35, %v973_v34  ;;  %v972_v43 = vld [vmem:[#allocation6 + $0x1900] sm:$0xff]  ;;  %v1061_v34 = vld [vmem:[#allocation6 + $0x1bc8] sm:$0xff]  ;;  %v1055_v35 = vld [vmem:[#allocation6 + $0x1b98] sm:$0xff] }
 0x159   :  { %3601 = vmatprep.subr.bf16.mxu1 %v3600_v47  ;;  %v982_v47 = vld [vmem:[#allocation6 + $0x1950] sm:$0xff] }
 0x15b   :  { %3347 = vmatpush1.bf16.msra.mxu0 %v3346_v53  ;;  %v3366_v53 = vpack.c.bf16 %v980_v44, %v972_v43  ;;  %v3640_v43 = vpack.c.bf16 %v1063_v36, %v1055_v35  ;;  %v1062_v44 = vld [vmem:[#allocation6 + $0x1bd0] sm:$0xff]  ;;  %v1132_v36 = vld [vmem:[#allocation6 + $0x1e00] sm:$0xff] }
 0x15c   :  { %3603 = vmatpush1.bf16.msra.mxu1 %v3602_v54  ;;  %3349 = vmatprep.subr.bf16.mxu0 %v3348_v55  ;;  %v3622_v54 = vpack.c.bf16 %v982_v47, %v974_v45  ;;  %v3368_v55 = vpack.c.bf16 %v997_v49, %v989_v48  ;;  %v1069_v45 = vld [vmem:[#allocation6 + $0x1c08] sm:$0xff]  ;;  %v1071_v47 = vld [vmem:[#allocation6 + $0x1c18] sm:$0xff] }
 0x15d   :  { %3605 = vmatprep.subr.bf16.mxu1 %v3604_v59  ;;  %v3624_v59 = vpack.c.bf16 %v999_v51, %v991_v50  ;;  %v1079_v48 = vld [vmem:[#allocation6 + $0x1c58] sm:$0xff] }
 0x15f   :  { %3351 = vmatpush1.bf16.msra.mxu0 %v3350_v1  ;;  %v3370_v1 = vpack.c.bf16 %v996_v57, %v988_v56  ;;  %v1078_v56 = vld [vmem:[#allocation6 + $0x1c50] sm:$0xff]  ;;  %v1085_v57 = vld [vmem:[#allocation6 + $0x1c88] sm:$0xff] }
 0x160   :  { %3607 = vmatpush1.bf16.msra.mxu1 %v3606_v2  ;;  %3353 = vmatprep.subr.bf16.mxu0 %v3352_v3  ;;  %v3626_v2 = vpack.c.bf16 %v998_v60, %v990_v58  ;;  %v3372_v3 = vpack.c.bf16 %v1013_v62, %v1005_v61  ;;  %v1093_v58 = vld [vmem:[#allocation6 + $0x1cc8] sm:$0xff]  ;;  %v1095_v60 = vld [vmem:[#allocation6 + $0x1cd8] sm:$0xff] }
 0x161   :  { %3609 = vmatprep.subr.bf16.mxu1 %v3608_v7  ;;  %v3628_v7 = vpack.c.bf16 %v1015_v0, %v1007_v63  ;;  %v3392_v63 = vpack.c.bf16 %v1093_v58, %v1085_v57  ;;  %v1084_v0 = vld [vmem:[#allocation6 + $0x1c80] sm:$0xff] }
 0x163   :  { %3355 = vmatpush1.bf16.msra.mxu0 %v3354_v13  ;;  %v3374_v13 = vpack.c.bf16 %v1012_v5, %v1004_v4  ;;  %v1094_v4 = vld [vmem:[#allocation6 + $0x1cd0] sm:$0xff]  ;;  %v1101_v5 = vld [vmem:[#allocation6 + $0x1d08] sm:$0xff] }
 0x164   :  { %3611 = vmatpush1.bf16.msra.mxu1 %v3610_v14  ;;  %3357 = vmatprep.subr.bf16.mxu0 %v3356_v15  ;;  %v3630_v14 = vpack.c.bf16 %v1014_v8, %v1006_v6  ;;  %v3376_v15 = vpack.c.bf16 %v1029_v10, %v1021_v9  ;;  %v1109_v6 = vld [vmem:[#allocation6 + $0x1d48] sm:$0xff]  ;;  %v1111_v8 = vld [vmem:[#allocation6 + $0x1d58] sm:$0xff] }
 0x165   :  { %3613 = vmatprep.subr.bf16.mxu1 %v3612_v19  ;;  %v3632_v19 = vpack.c.bf16 %v1031_v12, %v1023_v11  ;;  %v3396_v11 = vpack.c.bf16 %v1109_v6, %v1101_v5  ;;  %v1100_v12 = vld [vmem:[#allocation6 + $0x1d00] sm:$0xff] }
 0x166   :  { %1457 = vmatmul.mubr.f32.vlgmr.msra.gmra.mrb[0].mxu0 %v160_v25 }
 0x167   :  { %3359 = vmatpush1.bf16.msra.mxu0 %v3358_v26  ;;  %1765 = vmatmul.mubr.f32.vlgmr.msra.gmra.mrb[0].mxu1 %v160_v25  ;;  %v3378_v25 = vpack.c.bf16 %v1028_v17, %v1020_v16  ;;  %v3634_v26 = vpack.c.bf16 %v1030_v20, %v1022_v18  ;;  %v1110_v16 = vld [vmem:[#allocation6 + $0x1d50] sm:$0xff]  ;;  %v1117_v17 = vld [vmem:[#allocation6 + $0x1d88] sm:$0xff]  ;;  %v1127_v20 = vld [vmem:[#allocation6 + $0x1dd8] sm:$0xff] }
 0x168   :  { %3615 = vmatpush1.bf16.msra.mxu1 %v3614_v27  ;;  %3361 = vmatprep.subr.bf16.mxu0 %v3360_v28  ;;  %v3380_v27 = vpack.c.bf16 %v1045_v22, %v1037_v21  ;;  %v1036_v28 = vld [vmem:[#allocation6 + $0x1b00] sm:$0xff]  ;;  %v1125_v18 = vld [vmem:[#allocation6 + $0x1dc8] sm:$0xff] }
 0x169   :  { %3617 = vmatprep.subr.bf16.mxu1 %v3616_v32  ;;  %1462 = vmatprep.mubr.f32.mxu0 %v169_v38  ;;  %v1046_v32 = vld [vmem:[#allocation6 + $0x1b50] sm:$0xff]  ;;  %v3382_v37 = vpack.c.bf16 %v1044_v29, %v1036_v28  ;;  %v3400_v23 = vpack.c.bf16 %v1125_v18, %v1117_v17  ;;  %v1133_v29 = vld [vmem:[#allocation6 + $0x1e08] sm:$0xff] }
 0x16a   :  { %1770 = vmatprep.mubr.f32.mxu1 %v169_v38  ;;  %1463 = vmatmul.mubr.f32.gmra.mrb[2].mxu0 %v168_v40  ;;  %v3638_v38 = vpack.c.bf16 %v1046_v32, %v1038_v30  ;;  %v1126_v28 = vld [vmem:[#allocation6 + $0x1dd0] sm:$0xff]  ;;  %v1141_v30 = vld [vmem:[#allocation6 + $0x1e48] sm:$0xff]  ;;  %v1143_v32 = vld [vmem:[#allocation6 + $0x1e58] sm:$0xff] }
 0x16b   :  { %3363 = vmatpush1.bf16.msra.mxu0 %v3362_v39  ;;  %1771 = vmatmul.mubr.f32.gmra.mrb[2].mxu1 %v168_v40  ;;  %v3384_v39 = vpack.c.bf16 %v1061_v34, %v1053_v33  ;;  %v1052_v40 = vld [vmem:[#allocation6 + $0x1b80] sm:$0xff]  ;;  %v3404_v35 = vpack.c.bf16 %v1141_v30, %v1133_v29  ;;  %v171_v29 = vld [vmem:[#allocation4 + $0x78] sm:$0xff] }
 0x16c   :  { %3619 = vmatpush1.bf16.msra.mxu1 %v3618_v41  ;;  %3365 = vmatprep.subr.bf16.mxu0 %v3364_v42  ;;  %v1060_v41 = vld [vmem:[#allocation6 + $0x1bc0] sm:$0xff]  ;;  %v1054_v42 = vld [vmem:[#allocation6 + $0x1b90] sm:$0xff]  ;;  %v195_v30 = vld [vmem:[#allocation6 + $0xb8] sm:$0xff] }
 0x16d   :  { %3621 = vmatprep.subr.bf16.mxu1 %v3620_v46  ;;  %1533 = vmatprep.mubr.f32.mxu0 %v163_v52  ;;  %v1077_v46 = vld [vmem:[#allocation6 + $0x1c48] sm:$0xff]  ;;  %v3386_v49 = vpack.c.bf16 %v1060_v41, %v1052_v40  ;;  %v3642_v50 = vpack.c.bf16 %v1062_v44, %v1054_v42  ;;  %v1142_v40 = vld [vmem:[#allocation6 + $0x1e50] sm:$0xff]  ;;  %v1159_v44 = vld [vmem:[#allocation6 + $0x1ed8] sm:$0xff] }
 0x16e   :  { %1841 = vmatprep.mubr.f32.mxu1 %v163_v52  ;;  %v3388_v51 = vpack.c.bf16 %v1077_v46, %v1069_v45  ;;  %v1068_v52 = vld [vmem:[#allocation6 + $0x1c00] sm:$0xff]  ;;  %v1149_v41 = vld [vmem:[#allocation6 + $0x1e88] sm:$0xff] }
 0x16f   :  { %3367 = vmatpush1.bf16.msra.mxu0 %v3366_v53  ;;  %v1076_v53 = vld [vmem:[#allocation6 + $0x1c40] sm:$0xff]  ;;  %v1157_v42 = vld [vmem:[#allocation6 + $0x1ec8] sm:$0xff] }
 0x170   :  { %3623 = vmatpush1.bf16.msra.mxu1 %v3622_v54  ;;  %3369 = vmatprep.subr.bf16.mxu0 %v3368_v55  ;;  %v1070_v54 = vld [vmem:[#allocation6 + $0x1c10] sm:$0xff]  ;;  %v3644_v55 = vpack.c.bf16 %v1079_v48, %v1071_v47  ;;  %v3390_v61 = vpack.c.bf16 %v1076_v53, %v1068_v52  ;;  %v3408_v47 = vpack.c.bf16 %v1157_v42, %v1149_v41  ;;  %v1148_v48 = vld [vmem:[#allocation6 + $0x1e80] sm:$0xff]  ;;  %v1165_v53 = vld [vmem:[#allocation6 + $0x1f08] sm:$0xff] }
 0x171   :  { %3625 = vmatprep.subr.bf16.mxu1 %v3624_v59  ;;  %v1087_v59 = vld [vmem:[#allocation6 + $0x1c98] sm:$0xff]  ;;  %v3646_v62 = vpack.c.bf16 %v1078_v56, %v1070_v54  ;;  %v1158_v52 = vld [vmem:[#allocation6 + $0x1ed0] sm:$0xff]  ;;  %v1173_v54 = vld [vmem:[#allocation6 + $0x1f48] sm:$0xff] }
 0x172   :  { %v1175_v56 = vld [vmem:[#allocation6 + $0x1f58] sm:$0xff] }
 0x173   :  { %3371 = vmatpush1.bf16.msra.mxu0 %v3370_v1  ;;  %v1092_v1 = vld [vmem:[#allocation6 + $0x1cc0] sm:$0xff]  ;;  %v211_v41 = vld [vmem:[#allocation6 + $0x138] sm:$0xff] }
 0x174   :  { %3627 = vmatpush1.bf16.msra.mxu1 %v3626_v2  ;;  %3373 = vmatprep.subr.bf16.mxu0 %v3372_v3  ;;  %v1086_v2 = vld [vmem:[#allocation6 + $0x1c90] sm:$0xff]  ;;  %v3648_v3 = vpack.c.bf16 %v1095_v60, %v1087_v59  ;;  %v3394_v9 = vpack.c.bf16 %v1092_v1, %v1084_v0  ;;  %v3412_v59 = vpack.c.bf16 %v1173_v54, %v1165_v53  ;;  %v1164_v60 = vld [vmem:[#allocation6 + $0x1f00] sm:$0xff]  ;;  %v1181_v1 = vld [vmem:[#allocation6 + $0x1f88] sm:$0xff] }
 0x175   :  { %3629 = vmatprep.subr.bf16.mxu1 %v3628_v7  ;;  %v1103_v7 = vld [vmem:[#allocation6 + $0x1d18] sm:$0xff]  ;;  %v3650_v10 = vpack.c.bf16 %v1094_v4, %v1086_v2  ;;  %v1174_v0 = vld [vmem:[#allocation6 + $0x1f50] sm:$0xff]  ;;  %v1189_v2 = vld [vmem:[#allocation6 + $0x1fc8] sm:$0xff] }
 0x176   :  { %v1191_v4 = vld [vmem:[#allocation6 + $0x1fd8] sm:$0xff]  ;;  %v233_v53 = vld [vmem:[#allocation6 + $0x1e8] sm:$0xff] }
 0x177   :  { %3375 = vmatpush1.bf16.msra.mxu0 %v3374_v13  ;;  %v1108_v13 = vld [vmem:[#allocation6 + $0x1d40] sm:$0xff]  ;;  %v219_v42 = vld [vmem:[#allocation6 + $0x178] sm:$0xff] }
 0x178   :  { %3631 = vmatpush1.bf16.msra.mxu1 %v3630_v14  ;;  %3377 = vmatprep.subr.bf16.mxu0 %v3376_v15  ;;  %v1102_v14 = vld [vmem:[#allocation6 + $0x1d10] sm:$0xff]  ;;  %v3652_v15 = vpack.c.bf16 %v1111_v8, %v1103_v7  ;;  %v3398_v21 = vpack.c.bf16 %v1108_v13, %v1100_v12  ;;  %v3416_v7 = vpack.c.bf16 %v1189_v2, %v1181_v1  ;;  %v1180_v8 = vld [vmem:[#allocation6 + $0x1f80] sm:$0xff]  ;;  %v177_v13 = vld [vmem:[#allocation6 + $0x28] sm:$0xff] }
 0x179   :  { %3633 = vmatprep.subr.bf16.mxu1 %v3632_v19  ;;  %v1119_v19 = vld [vmem:[#allocation6 + $0x1d98] sm:$0xff]  ;;  %v3654_v22 = vpack.c.bf16 %v1110_v16, %v1102_v14  ;;  %v1190_v12 = vld [vmem:[#allocation6 + $0x1fd0] sm:$0xff]  ;;  %v185_v14 = vld [vmem:[#allocation6 + $0x68] sm:$0xff] }
 0x17a   :  { %v187_v16 = vld [vmem:[#allocation6 + $0x78] sm:$0xff]  ;;  %v249_v1 = vld [vmem:[#allocation6 + $0x268] sm:$0xff] }
 0x17b   :  { %3379 = vmatpush1.bf16.msra.mxu0 %v3378_v25  ;;  %v1124_v25 = vld [vmem:[#allocation6 + $0x1dc0] sm:$0xff]  ;;  %v227_v54 = vld [vmem:[#allocation6 + $0x1b8] sm:$0xff]  ;;  %v4537_v2 = vld [vmem:[#allocation4 + $0x8] sm:$0xff] }
 0x17c   :  { %3635 = vmatpush1.bf16.msra.mxu1 %v3634_v26  ;;  %3381 = vmatprep.subr.bf16.mxu0 %v3380_v27  ;;  %v1118_v26 = vld [vmem:[#allocation6 + $0x1d90] sm:$0xff]  ;;  %v3656_v27 = vpack.c.bf16 %v1127_v20, %v1119_v19  ;;  %v3402_v33 = vpack.c.bf16 %v1124_v25, %v1116_v24  ;;  %v3676_v19 = vpack.c.bf16 %v185_v14, %v177_v13  ;;  %v176_v20 = vld [vmem:[#allocation6 + $0x20] sm:$0xff]  ;;  %v257_v13 = vld [vmem:[#allocation6 + $0x2a8] sm:$0xff] }
 0x17d   :  { %3637 = vmatprep.subr.bf16.mxu1 %v3636_v31  ;;  %v1135_v31 = vld [vmem:[#allocation6 + $0x1e18] sm:$0xff]  ;;  %v3658_v34 = vpack.c.bf16 %v1126_v28, %v1118_v26  ;;  %v186_v24 = vld [vmem:[#allocation6 + $0x70] sm:$0xff]  ;;  %v193_v26 = vld [vmem:[#allocation6 + $0xa8] sm:$0xff] }
 0x17e   :  { %v162_v25 = vld [vmem:[#allocation4 + $0x30] sm:$0xff]  ;;  %v265_v14 = vld [vmem:[#allocation6 + $0x2e8] sm:$0xff] }
 0x17f   :  { %3383 = vmatpush1.bf16.msra.mxu0 %v3382_v37  ;;  %v1140_v37 = vld [vmem:[#allocation6 + $0x1e40] sm:$0xff] }
 0x180   :  { %3639 = vmatpush1.bf16.msra.mxu1 %v3638_v38  ;;  %3385 = vmatprep.subr.bf16.mxu0 %v3384_v39  ;;  %v1134_v38 = vld [vmem:[#allocation6 + $0x1e10] sm:$0xff]  ;;  %v3660_v39 = vpack.c.bf16 %v1143_v32, %v1135_v31  ;;  %v3406_v45 = vpack.c.bf16 %v1140_v37, %v1132_v36  ;;  %v203_v31 = vld [vmem:[#allocation6 + $0xf8] sm:$0xff] }
 0x181   :  { %3641 = vmatprep.subr.bf16.mxu1 %v3640_v43  ;;  %v1151_v43 = vld [vmem:[#allocation6 + $0x1e98] sm:$0xff]  ;;  %v3662_v46 = vpack.c.bf16 %v1142_v40, %v1134_v38  ;;  %v202_v37 = vld [vmem:[#allocation6 + $0xf0] sm:$0xff]  ;;  %v209_v38 = vld [vmem:[#allocation6 + $0x128] sm:$0xff]  ;;  %v3936_v40 = vpack.c.bf16 %v203_v31, %v195_v30 }
 0x183   :  { %3387 = vmatpush1.bf16.msra.mxu0 %v3386_v49  ;;  %v1156_v49 = vld [vmem:[#allocation6 + $0x1ec0] sm:$0xff] }
 0x184   :  { %3643 = vmatpush1.bf16.msra.mxu1 %v3642_v50  ;;  %3389 = vmatprep.subr.bf16.mxu0 %v3388_v51  ;;  %v1150_v50 = vld [vmem:[#allocation6 + $0x1e90] sm:$0xff]  ;;  %v3664_v51 = vpack.c.bf16 %v1159_v44, %v1151_v43  ;;  %v3410_v57 = vpack.c.bf16 %v1156_v49, %v1148_v48  ;;  %v216_v48 = vld [vmem:[#allocation6 + $0x160] sm:$0xff] }
 0x185   :  { %3645 = vmatprep.subr.bf16.mxu1 %v3644_v55  ;;  %v1167_v55 = vld [vmem:[#allocation6 + $0x1f18] sm:$0xff]  ;;  %v3666_v58 = vpack.c.bf16 %v1158_v52, %v1150_v50  ;;  %v170_v43 = vld [vmem:[#allocation4 + $0x70] sm:$0xff]  ;;  %v3940_v50 = vpack.c.bf16 %v219_v42, %v211_v41  ;;  %v225_v52 = vld [vmem:[#allocation6 + $0x1a8] sm:$0xff] }
 0x186   :  { %v210_v49 = vld [vmem:[#allocation6 + $0x130] sm:$0xff] }
 0x187   :  { %3391 = vmatpush1.bf16.msra.mxu0 %v3390_v61  ;;  %v1172_v61 = vld [vmem:[#allocation6 + $0x1f40] sm:$0xff] }
 0x188   :  { %3647 = vmatpush1.bf16.msra.mxu1 %v3646_v62  ;;  %3393 = vmatprep.subr.bf16.mxu0 %v3392_v63  ;;  %v1166_v62 = vld [vmem:[#allocation6 + $0x1f10] sm:$0xff]  ;;  %v3668_v63 = vpack.c.bf16 %v1175_v56, %v1167_v55  ;;  %v3414_v5 = vpack.c.bf16 %v1172_v61, %v1164_v60  ;;  %v235_v55 = vld [vmem:[#allocation6 + $0x1f8] sm:$0xff]  ;;  %v232_v60 = vld [vmem:[#allocation6 + $0x1e0] sm:$0xff] }
 0x189   :  { %3649 = vmatprep.subr.bf16.mxu1 %v3648_v3  ;;  %v1183_v3 = vld [vmem:[#allocation6 + $0x1f98] sm:$0xff]  ;;  %v3670_v6 = vpack.c.bf16 %v1174_v0, %v1166_v62  ;;  %v226_v61 = vld [vmem:[#allocation6 + $0x1b0] sm:$0xff]  ;;  %v3944_v62 = vpack.c.bf16 %v235_v55, %v227_v54  ;;  %v241_v0 = vld [vmem:[#allocation6 + $0x228] sm:$0xff] }
 0x18b   :  { %3395 = vmatpush1.bf16.msra.mxu0 %v3394_v9  ;;  %v1188_v9 = vld [vmem:[#allocation6 + $0x1fc0] sm:$0xff] }
 0x18c   :  { %3651 = vmatpush1.bf16.msra.mxu1 %v3650_v10  ;;  %3397 = vmatprep.subr.bf16.mxu0 %v3396_v11  ;;  %v1182_v10 = vld [vmem:[#allocation6 + $0x1f90] sm:$0xff]  ;;  %v3672_v11 = vpack.c.bf16 %v1191_v4, %v1183_v3  ;;  %v3418_v17 = vpack.c.bf16 %v1188_v9, %v1180_v8  ;;  %v243_v3 = vld [vmem:[#allocation6 + $0x238] sm:$0xff]  ;;  %v240_v8 = vld [vmem:[#allocation6 + $0x220] sm:$0xff] }
 0x18d   :  { %3653 = vmatprep.subr.bf16.mxu1 %v3652_v15  ;;  %v179_v15 = vld [vmem:[#allocation6 + $0x38] sm:$0xff]  ;;  %v3674_v18 = vpack.c.bf16 %v1190_v12, %v1182_v10  ;;  %v248_v9 = vld [vmem:[#allocation6 + $0x260] sm:$0xff]  ;;  %v242_v10 = vld [vmem:[#allocation6 + $0x230] sm:$0xff] }
 0x18e   :  { %v251_v4 = vld [vmem:[#allocation6 + $0x278] sm:$0xff]  ;;  %v250_v12 = vld [vmem:[#allocation6 + $0x270] sm:$0xff] }
 0x18f   :  { %3399 = vmatpush1.bf16.msra.mxu0 %v3398_v21  ;;  %v184_v21 = vld [vmem:[#allocation6 + $0x60] sm:$0xff] }
 0x190   :  { %3655 = vmatpush1.bf16.msra.mxu1 %v3654_v22  ;;  %3401 = vmatprep.subr.bf16.mxu0 %v3400_v23  ;;  %v3932_v22 = vpack.c.bf16 %v187_v16, %v179_v15  ;;  %v178_v23 = vld [vmem:[#allocation6 + $0x30] sm:$0xff]  ;;  %v3678_v28 = vpack.c.bf16 %v184_v21, %v176_v20  ;;  %v259_v15 = vld [vmem:[#allocation6 + $0x2b8] sm:$0xff]  ;;  %v256_v20 = vld [vmem:[#allocation6 + $0x2a0] sm:$0xff] }
 0x191   :  { %3657 = vmatprep.subr.bf16.mxu1 %v3656_v27  ;;  %v201_v27 = vld [vmem:[#allocation6 + $0xe8] sm:$0xff]  ;;  %v3934_v32 = vpack.c.bf16 %v186_v24, %v178_v23  ;;  %v267_v16 = vld [vmem:[#allocation6 + $0x2f8] sm:$0xff]  ;;  %v264_v21 = vld [vmem:[#allocation6 + $0x2e0] sm:$0xff] }
 0x192   :  { %v3680_v36 = vpack.c.bf16 %v201_v27, %v193_v26  ;;  %v3952_v23 = vpack.c.bf16 %v267_v16, %v259_v15  ;;  %v266_v24 = vld [vmem:[#allocation6 + $0x2f0] sm:$0xff]  ;;  %v281_v26 = vld [vmem:[#allocation6 + $0x368] sm:$0xff]  ;;  %v275_v27 = vld [vmem:[#allocation6 + $0x338] sm:$0xff] }
 0x193   :  { %3403 = vmatpush1.bf16.msra.mxu0 %v3402_v33  ;;  %v192_v33 = vld [vmem:[#allocation6 + $0xa0] sm:$0xff] }
 0x194   :  { %3659 = vmatpush1.bf16.msra.mxu1 %v3658_v34  ;;  %3405 = vmatprep.subr.bf16.mxu0 %v3404_v35  ;;  %v200_v34 = vld [vmem:[#allocation6 + $0xe0] sm:$0xff]  ;;  %v194_v35 = vld [vmem:[#allocation6 + $0xb0] sm:$0xff] }
 0x195   :  { %3661 = vmatprep.subr.bf16.mxu1 %v3660_v39  ;;  %v217_v39 = vld [vmem:[#allocation6 + $0x168] sm:$0xff]  ;;  %v3682_v44 = vpack.c.bf16 %v200_v34, %v192_v33  ;;  %v280_v33 = vld [vmem:[#allocation6 + $0x360] sm:$0xff]  ;;  %v274_v34 = vld [vmem:[#allocation6 + $0x330] sm:$0xff] }
 0x196   :  { %v336_v16 = vld [vmem:[#allocation6 + $0x520] sm:$0xff] }
 0x197   :  { %3407 = vmatpush1.bf16.msra.mxu0 %v3406_v45  ;;  %v3938_v45 = vpack.c.bf16 %v202_v37, %v194_v35  ;;  %v289_v37 = vld [vmem:[#allocation6 + $0x3a8] sm:$0xff] }
 0x198   :  { %3663 = vmatpush1.bf16.msra.mxu1 %v3662_v46  ;;  %3409 = vmatprep.subr.bf16.mxu0 %v3408_v47  ;;  %v3684_v46 = vpack.c.bf16 %v217_v39, %v209_v38  ;;  %v208_v47 = vld [vmem:[#allocation6 + $0x120] sm:$0xff]  ;;  %v297_v38 = vld [vmem:[#allocation6 + $0x3e8] sm:$0xff]  ;;  %v291_v39 = vld [vmem:[#allocation6 + $0x3b8] sm:$0xff] }
 0x199   :  { %3665 = vmatprep.subr.bf16.mxu1 %v3664_v51  ;;  %v218_v51 = vld [vmem:[#allocation6 + $0x170] sm:$0xff]  ;;  %v3686_v56 = vpack.c.bf16 %v216_v48, %v208_v47 }
 0x19a   :  { %v298_v48 = vld [vmem:[#allocation6 + $0x3f0] sm:$0xff] }
 0x19b   :  { %3411 = vmatpush1.bf16.msra.mxu0 %v3410_v57  ;;  %v3942_v57 = vpack.c.bf16 %v218_v51, %v210_v49  ;;  %v305_v49 = vld [vmem:[#allocation6 + $0x428] sm:$0xff]  ;;  %v307_v51 = vld [vmem:[#allocation6 + $0x438] sm:$0xff] }
 0x19c   :  { %3667 = vmatpush1.bf16.msra.mxu1 %v3666_v58  ;;  %3413 = vmatprep.subr.bf16.mxu0 %v3412_v59  ;;  %v3688_v58 = vpack.c.bf16 %v233_v53, %v225_v52  ;;  %v224_v59 = vld [vmem:[#allocation6 + $0x1a0] sm:$0xff]  ;;  %v315_v52 = vld [vmem:[#allocation6 + $0x478] sm:$0xff] }
 0x19d   :  { %3669 = vmatprep.subr.bf16.mxu1 %v3668_v63  ;;  %v234_v63 = vld [vmem:[#allocation6 + $0x1f0] sm:$0xff] }
 0x19f   :  { %3415 = vmatpush1.bf16.msra.mxu0 %v3414_v5  ;;  %v3690_v5 = vpack.c.bf16 %v232_v60, %v224_v59  ;;  %v3964_v59 = vpack.c.bf16 %v315_v52, %v307_v51  ;;  %v314_v60 = vld [vmem:[#allocation6 + $0x470] sm:$0xff]  ;;  %v384_v52 = vld [vmem:[#allocation6 + $0x6a0] sm:$0xff] }
 0x1a0   :  { %3671 = vmatpush1.bf16.msra.mxu1 %v3670_v6  ;;  %3417 = vmatprep.subr.bf16.mxu0 %v3416_v7  ;;  %v3946_v6 = vpack.c.bf16 %v234_v63, %v226_v61  ;;  %v3692_v7 = vpack.c.bf16 %v249_v1, %v241_v0  ;;  %v321_v61 = vld [vmem:[#allocation6 + $0x4a8] sm:$0xff]  ;;  %v323_v63 = vld [vmem:[#allocation6 + $0x4b8] sm:$0xff] }
 0x1a1   :  { %3673 = vmatprep.subr.bf16.mxu1 %v3672_v11  ;;  %v3948_v11 = vpack.c.bf16 %v251_v4, %v243_v3  ;;  %v331_v0 = vld [vmem:[#allocation6 + $0x4f8] sm:$0xff]  ;;  %v320_v4 = vld [vmem:[#allocation6 + $0x4a0] sm:$0xff] }
 0x1a3   :  { %3419 = vmatpush1.bf16.msra.mxu0 %v3418_v17  ;;  %v3694_v17 = vpack.c.bf16 %v248_v9, %v240_v8  ;;  %v330_v8 = vld [vmem:[#allocation6 + $0x4f0] sm:$0xff]  ;;  %v337_v9 = vld [vmem:[#allocation6 + $0x528] sm:$0xff] }
 0x1a4   :  { %3675 = vmatpush1.bf16.msra.mxu1 %v3674_v18  ;;  %3677 = vmatprep.subr.bf16.mxu0 %v3676_v19  ;;  %v3950_v18 = vpack.c.bf16 %v250_v12, %v242_v10  ;;  %v3696_v19 = vpack.c.bf16 %v265_v14, %v257_v13  ;;  %v345_v10 = vld [vmem:[#allocation6 + $0x568] sm:$0xff]  ;;  %v347_v12 = vld [vmem:[#allocation6 + $0x578] sm:$0xff] }
 0x1a5   :  { %3933 = vmatprep.subr.bf16.mxu1 %v3932_v22  ;;  %v258_v22 = vld [vmem:[#allocation6 + $0x2b0] sm:$0xff]  ;;  %v3716_v15 = vpack.c.bf16 %v345_v10, %v337_v9 }
 0x1a6   :  { %1534 = vmatmul.mubr.f32.vlgmr.msra.gmra.mrb[0].mxu0 %v162_v25  ;;  %v3954_v30 = vpack.c.bf16 %v266_v24, %v258_v22  ;;  %v361_v22 = vld [vmem:[#allocation6 + $0x5e8] sm:$0xff]  ;;  %v363_v24 = vld [vmem:[#allocation6 + $0x5f8] sm:$0xff] }
 0x1a7   :  { %1842 = vmatmul.mubr.f32.vlgmr.msra.gmra.mrb[0].mxu1 %v162_v25  ;;  %3679 = vmatpush1.bf16.msra.mxu0 %v3678_v28  ;;  %v273_v25 = vld [vmem:[#allocation6 + $0x328] sm:$0xff]  ;;  %v283_v28 = vld [vmem:[#allocation6 + $0x378] sm:$0xff] }
 0x1a8   :  { %3935 = vmatpush1.bf16.msra.mxu1 %v3934_v32  ;;  %1539 = vmatprep.mubr.f32.mxu0 %v171_v29  ;;  %v3700_v31 = vpack.c.bf16 %v281_v26, %v273_v25  ;;  %v272_v32 = vld [vmem:[#allocation6 + $0x320] sm:$0xff]  ;;  %v3956_v35 = vpack.c.bf16 %v283_v28, %v275_v27 }
 0x1a9   :  { %1847 = vmatprep.mubr.f32.mxu1 %v171_v29  ;;  %3681 = vmatprep.subr.bf16.mxu0 %v3680_v36  ;;  %v3698_v29 = vpack.c.bf16 %v264_v21, %v256_v20  ;;  %v282_v36 = vld [vmem:[#allocation6 + $0x370] sm:$0xff]  ;;  %v3702_v41 = vpack.c.bf16 %v280_v33, %v272_v32  ;;  %v353_v21 = vld [vmem:[#allocation6 + $0x5a8] sm:$0xff]  ;;  %v352_v28 = vld [vmem:[#allocation6 + $0x5a0] sm:$0xff] }
 0x1aa   :  { %1540 = vmatmul.mubr.f32.gmra.mrb[2].mxu0 %v170_v43  ;;  %3937 = vmatprep.subr.bf16.mxu1 %v3936_v40  ;;  %v299_v40 = vld [vmem:[#allocation6 + $0x3f8] sm:$0xff]  ;;  %v3958_v42 = vpack.c.bf16 %v282_v36, %v274_v34  ;;  %v346_v20 = vld [vmem:[#allocation6 + $0x570] sm:$0xff]  ;;  %v3720_v27 = vpack.c.bf16 %v361_v22, %v353_v21  ;;  %v369_v33 = vld [vmem:[#allocation6 + $0x628] sm:$0xff] }
 0x1ab   :  { %1848 = vmatmul.mubr.f32.gmra.mrb[2].mxu1 %v170_v43  ;;  %3683 = vmatpush1.bf16.msra.mxu0 %v3682_v44  ;;  %v3704_v43 = vpack.c.bf16 %v297_v38, %v289_v37  ;;  %v288_v44 = vld [vmem:[#allocation6 + $0x3a0] sm:$0xff]  ;;  %v3960_v47 = vpack.c.bf16 %v299_v40, %v291_v39  ;;  %v362_v32 = vld [vmem:[#allocation6 + $0x5f0] sm:$0xff]  ;;  %v377_v34 = vld [vmem:[#allocation6 + $0x668] sm:$0xff] }
 0x1ac   :  { %3939 = vmatpush1.bf16.msra.mxu1 %v3938_v45  ;;  %3685 = vmatprep.subr.bf16.mxu0 %v3684_v46  ;;  %v296_v45 = vld [vmem:[#allocation6 + $0x3e0] sm:$0xff]  ;;  %v290_v46 = vld [vmem:[#allocation6 + $0x3b0] sm:$0xff]  ;;  %v379_v36 = vld [vmem:[#allocation6 + $0x678] sm:$0xff]  ;;  %v3724_v39 = vpack.c.bf16 %v377_v34, %v369_v33 }
 0x1ad   :  { %3941 = vmatprep.subr.bf16.mxu1 %v3940_v50  ;;  %1918 = vmatprep.mubr.f32.mxu0 %v4537_v2  ;;  %v313_v50 = vld [vmem:[#allocation6 + $0x468] sm:$0xff]  ;;  %v3706_v53 = vpack.c.bf16 %v296_v45, %v288_v44  ;;  %v3962_v54 = vpack.c.bf16 %v298_v48, %v290_v46  ;;  %v368_v40 = vld [vmem:[#allocation6 + $0x620] sm:$0xff]  ;;  %v378_v44 = vld [vmem:[#allocation6 + $0x670] sm:$0xff] }
 0x1ae   :  { %2226 = vmatprep.mubr.f32.mxu1 %v4537_v2  ;;  %v3708_v55 = vpack.c.bf16 %v313_v50, %v305_v49  ;;  %v385_v45 = vld [vmem:[#allocation6 + $0x6a8] sm:$0xff]  ;;  %v395_v48 = vld [vmem:[#allocation6 + $0x6f8] sm:$0xff] }
 0x1af   :  { %3687 = vmatpush1.bf16.msra.mxu0 %v3686_v56  ;;  %v304_v56 = vld [vmem:[#allocation6 + $0x420] sm:$0xff]  ;;  %v393_v46 = vld [vmem:[#allocation6 + $0x6e8] sm:$0xff] }
 0x1b0   :  { %3943 = vmatpush1.bf16.msra.mxu1 %v3942_v57  ;;  %3689 = vmatprep.subr.bf16.mxu0 %v3688_v58  ;;  %v312_v57 = vld [vmem:[#allocation6 + $0x460] sm:$0xff]  ;;  %v306_v58 = vld [vmem:[#allocation6 + $0x430] sm:$0xff]  ;;  %v3728_v51 = vpack.c.bf16 %v393_v46, %v385_v45  ;;  %v475_v45 = vld [vmem:[#allocation6 + $0x978] sm:$0xff] }
 0x1b1   :  { %3945 = vmatprep.subr.bf16.mxu1 %v3944_v62  ;;  %v329_v62 = vld [vmem:[#allocation6 + $0x4e8] sm:$0xff]  ;;  %v3710_v1 = vpack.c.bf16 %v312_v57, %v304_v56  ;;  %v3966_v2 = vpack.c.bf16 %v314_v60, %v306_v58  ;;  %v394_v56 = vld [vmem:[#allocation6 + $0x6f0] sm:$0xff]  ;;  %v411_v60 = vld [vmem:[#allocation6 + $0x778] sm:$0xff] }
 0x1b2   :  { %v3712_v3 = vpack.c.bf16 %v329_v62, %v321_v61  ;;  %v401_v57 = vld [vmem:[#allocation6 + $0x728] sm:$0xff] }
 0x1b3   :  { %3691 = vmatpush1.bf16.msra.mxu0 %v3690_v5  ;;  %v328_v5 = vld [vmem:[#allocation6 + $0x4e0] sm:$0xff]  ;;  %v409_v58 = vld [vmem:[#allocation6 + $0x768] sm:$0xff] }
 0x1b4   :  { %3947 = vmatpush1.bf16.msra.mxu1 %v3946_v6  ;;  %3693 = vmatprep.subr.bf16.mxu0 %v3692_v7  ;;  %v322_v6 = vld [vmem:[#allocation6 + $0x4b0] sm:$0xff]  ;;  %v3968_v7 = vpack.c.bf16 %v331_v0, %v323_v63  ;;  %v3714_v13 = vpack.c.bf16 %v328_v5, %v320_v4  ;;  %v3732_v63 = vpack.c.bf16 %v409_v58, %v401_v57  ;;  %v400_v0 = vld [vmem:[#allocation6 + $0x720] sm:$0xff]  ;;  %v417_v5 = vld [vmem:[#allocation6 + $0x7a8] sm:$0xff] }
 0x1b5   :  { %3949 = vmatprep.subr.bf16.mxu1 %v3948_v11  ;;  %v339_v11 = vld [vmem:[#allocation6 + $0x538] sm:$0xff]  ;;  %v3970_v14 = vpack.c.bf16 %v330_v8, %v322_v6  ;;  %v410_v4 = vld [vmem:[#allocation6 + $0x770] sm:$0xff]  ;;  %v425_v6 = vld [vmem:[#allocation6 + $0x7e8] sm:$0xff] }
 0x1b6   :  { %v427_v8 = vld [vmem:[#allocation6 + $0x7f8] sm:$0xff] }
 0x1b7   :  { %3695 = vmatpush1.bf16.msra.mxu0 %v3694_v17  ;;  %v344_v17 = vld [vmem:[#allocation6 + $0x560] sm:$0xff]  ;;  %v483_v57 = vld [vmem:[#allocation6 + $0x9b8] sm:$0xff] }
 0x1b8   :  { %3951 = vmatpush1.bf16.msra.mxu1 %v3950_v18  ;;  %3697 = vmatprep.subr.bf16.mxu0 %v3696_v19  ;;  %v338_v18 = vld [vmem:[#allocation6 + $0x530] sm:$0xff]  ;;  %v3972_v19 = vpack.c.bf16 %v347_v12, %v339_v11  ;;  %v3718_v25 = vpack.c.bf16 %v344_v17, %v336_v16  ;;  %v3736_v11 = vpack.c.bf16 %v425_v6, %v417_v5  ;;  %v416_v12 = vld [vmem:[#allocation6 + $0x7a0] sm:$0xff]  ;;  %v433_v17 = vld [vmem:[#allocation6 + $0x828] sm:$0xff] }
 0x1b9   :  { %3953 = vmatprep.subr.bf16.mxu1 %v3952_v23  ;;  %v355_v23 = vld [vmem:[#allocation6 + $0x5b8] sm:$0xff]  ;;  %v3974_v26 = vpack.c.bf16 %v346_v20, %v338_v18  ;;  %v426_v16 = vld [vmem:[#allocation6 + $0x7f0] sm:$0xff]  ;;  %v441_v18 = vld [vmem:[#allocation6 + $0x868] sm:$0xff] }
 0x1ba   :  { %v443_v20 = vld [vmem:[#allocation6 + $0x878] sm:$0xff]  ;;  %v505_v5 = vld [vmem:[#allocation6 + $0xa68] sm:$0xff] }
 0x1bb   :  { %3699 = vmatpush1.bf16.msra.mxu0 %v3698_v29  ;;  %v360_v29 = vld [vmem:[#allocation6 + $0x5e0] sm:$0xff]  ;;  %v491_v58 = vld [vmem:[#allocation6 + $0x9f8] sm:$0xff] }
 0x1bc   :  { %3955 = vmatpush1.bf16.msra.mxu1 %v3954_v30  ;;  %3701 = vmatprep.subr.bf16.mxu0 %v3700_v31  ;;  %v354_v30 = vld [vmem:[#allocation6 + $0x5b0] sm:$0xff]  ;;  %v3976_v31 = vpack.c.bf16 %v363_v24, %v355_v23  ;;  %v3722_v37 = vpack.c.bf16 %v360_v29, %v352_v28  ;;  %v3740_v23 = vpack.c.bf16 %v441_v18, %v433_v17  ;;  %v432_v24 = vld [vmem:[#allocation6 + $0x820] sm:$0xff]  ;;  %v449_v29 = vld [vmem:[#allocation6 + $0x8a8] sm:$0xff] }
 0x1bd   :  { %3957 = vmatprep.subr.bf16.mxu1 %v3956_v35  ;;  %v371_v35 = vld [vmem:[#allocation6 + $0x638] sm:$0xff]  ;;  %v3978_v38 = vpack.c.bf16 %v362_v32, %v354_v30  ;;  %v442_v28 = vld [vmem:[#allocation6 + $0x870] sm:$0xff]  ;;  %v457_v30 = vld [vmem:[#allocation6 + $0x8e8] sm:$0xff] }
 0x1be   :  { %v459_v32 = vld [vmem:[#allocation6 + $0x8f8] sm:$0xff]  ;;  %v513_v17 = vld [vmem:[#allocation6 + $0xaa8] sm:$0xff] }
 0x1bf   :  { %3703 = vmatpush1.bf16.msra.mxu0 %v3702_v41  ;;  %v376_v41 = vld [vmem:[#allocation6 + $0x660] sm:$0xff]  ;;  %v4541_v6 = vld [vmem:[#allocation4 + $0x18] sm:$0xff]  ;;  %v521_v18 = vld [vmem:[#allocation6 + $0xae8] sm:$0xff] }
 0x1c0   :  { %3959 = vmatpush1.bf16.msra.mxu1 %v3958_v42  ;;  %3705 = vmatprep.subr.bf16.mxu0 %v3704_v43  ;;  %v370_v42 = vld [vmem:[#allocation6 + $0x630] sm:$0xff]  ;;  %v3980_v43 = vpack.c.bf16 %v379_v36, %v371_v35  ;;  %v3726_v49 = vpack.c.bf16 %v376_v41, %v368_v40  ;;  %v3744_v35 = vpack.c.bf16 %v457_v30, %v449_v29  ;;  %v448_v36 = vld [vmem:[#allocation6 + $0x8a0] sm:$0xff]  ;;  %v465_v41 = vld [vmem:[#allocation6 + $0x928] sm:$0xff] }
 0x1c1   :  { %3961 = vmatprep.subr.bf16.mxu1 %v3960_v47  ;;  %v387_v47 = vld [vmem:[#allocation6 + $0x6b8] sm:$0xff]  ;;  %v3982_v50 = vpack.c.bf16 %v378_v44, %v370_v42  ;;  %v458_v40 = vld [vmem:[#allocation6 + $0x8f0] sm:$0xff]  ;;  %v473_v42 = vld [vmem:[#allocation6 + $0x968] sm:$0xff] }
 0x1c2   :  { %v467_v44 = vld [vmem:[#allocation6 + $0x938] sm:$0xff]  ;;  %v529_v29 = vld [vmem:[#allocation6 + $0xb28] sm:$0xff] }
 0x1c3   :  { %3707 = vmatpush1.bf16.msra.mxu0 %v3706_v53  ;;  %v392_v53 = vld [vmem:[#allocation6 + $0x6e0] sm:$0xff]  ;;  %v537_v30 = vld [vmem:[#allocation6 + $0xb68] sm:$0xff] }
 0x1c4   :  { %3963 = vmatpush1.bf16.msra.mxu1 %v3962_v54  ;;  %3709 = vmatprep.subr.bf16.mxu0 %v3708_v55  ;;  %v386_v54 = vld [vmem:[#allocation6 + $0x6b0] sm:$0xff]  ;;  %v3984_v55 = vpack.c.bf16 %v395_v48, %v387_v47  ;;  %v3730_v61 = vpack.c.bf16 %v392_v53, %v384_v52  ;;  %v3748_v48 = vpack.c.bf16 %v473_v42, %v465_v41  ;;  %v545_v41 = vld [vmem:[#allocation6 + $0xba8] sm:$0xff] }
 0x1c5   :  { %3965 = vmatprep.subr.bf16.mxu1 %v3964_v59  ;;  %v403_v59 = vld [vmem:[#allocation6 + $0x738] sm:$0xff]  ;;  %v3986_v62 = vpack.c.bf16 %v394_v56, %v386_v54  ;;  %v4004_v52 = vpack.c.bf16 %v475_v45, %v467_v44  ;;  %v474_v53 = vld [vmem:[#allocation6 + $0x970] sm:$0xff]  ;;  %v481_v54 = vld [vmem:[#allocation6 + $0x9a8] sm:$0xff] }
 0x1c6   :  { %v4539_v56 = vld [vmem:[#allocation4 + $0x48] sm:$0xff]  ;;  %v555_v44 = vld [vmem:[#allocation6 + $0xbf8] sm:$0xff] }
 0x1c7   :  { %3711 = vmatpush1.bf16.msra.mxu0 %v3710_v1  ;;  %v408_v1 = vld [vmem:[#allocation6 + $0x760] sm:$0xff]  ;;  %v553_v42 = vld [vmem:[#allocation6 + $0xbe8] sm:$0xff] }
 0x1c8   :  { %3967 = vmatpush1.bf16.msra.mxu1 %v3966_v2  ;;  %3713 = vmatprep.subr.bf16.mxu0 %v3712_v3  ;;  %v402_v2 = vld [vmem:[#allocation6 + $0x730] sm:$0xff]  ;;  %v3988_v3 = vpack.c.bf16 %v411_v60, %v403_v59  ;;  %v3734_v9 = vpack.c.bf16 %v408_v1, %v400_v0  ;;  %v4540_v59 = vld [vmem:[#allocation4 + $0x40] sm:$0xff] }
 0x1c9   :  { %3969 = vmatprep.subr.bf16.mxu1 %v3968_v7  ;;  %v419_v7 = vld [vmem:[#allocation6 + $0x7b8] sm:$0xff]  ;;  %v3990_v10 = vpack.c.bf16 %v410_v4, %v402_v2  ;;  %v488_v0 = vld [vmem:[#allocation6 + $0x9e0] sm:$0xff]  ;;  %v482_v1 = vld [vmem:[#allocation6 + $0x9b0] sm:$0xff]  ;;  %v4008_v2 = vpack.c.bf16 %v491_v58, %v483_v57 }
 0x1ca   :  { %v497_v4 = vld [vmem:[#allocation6 + $0xa28] sm:$0xff] }
 0x1cb   :  { %3715 = vmatpush1.bf16.msra.mxu0 %v3714_v13  ;;  %v424_v13 = vld [vmem:[#allocation6 + $0x7e0] sm:$0xff] }
 0x1cc   :  { %3971 = vmatpush1.bf16.msra.mxu1 %v3970_v14  ;;  %3717 = vmatprep.subr.bf16.mxu0 %v3716_v15  ;;  %v418_v14 = vld [vmem:[#allocation6 + $0x7b0] sm:$0xff]  ;;  %v3992_v15 = vpack.c.bf16 %v427_v8, %v419_v7  ;;  %v3738_v21 = vpack.c.bf16 %v424_v13, %v416_v12  ;;  %v499_v7 = vld [vmem:[#allocation6 + $0xa38] sm:$0xff]  ;;  %v496_v12 = vld [vmem:[#allocation6 + $0xa20] sm:$0xff] }
 0x1cd   :  { %3973 = vmatprep.subr.bf16.mxu1 %v3972_v19  ;;  %v435_v19 = vld [vmem:[#allocation6 + $0x838] sm:$0xff]  ;;  %v3994_v22 = vpack.c.bf16 %v426_v16, %v418_v14  ;;  %v504_v13 = vld [vmem:[#allocation6 + $0xa60] sm:$0xff]  ;;  %v498_v14 = vld [vmem:[#allocation6 + $0xa30] sm:$0xff] }
 0x1ce   :  { %v507_v8 = vld [vmem:[#allocation6 + $0xa78] sm:$0xff]  ;;  %v506_v16 = vld [vmem:[#allocation6 + $0xa70] sm:$0xff] }
 0x1cf   :  { %3719 = vmatpush1.bf16.msra.mxu0 %v3718_v25  ;;  %v440_v25 = vld [vmem:[#allocation6 + $0x860] sm:$0xff] }
 0x1d0   :  { %3975 = vmatpush1.bf16.msra.mxu1 %v3974_v26  ;;  %3721 = vmatprep.subr.bf16.mxu0 %v3720_v27  ;;  %v434_v26 = vld [vmem:[#allocation6 + $0x830] sm:$0xff]  ;;  %v3996_v27 = vpack.c.bf16 %v443_v20, %v435_v19  ;;  %v3742_v33 = vpack.c.bf16 %v440_v25, %v432_v24  ;;  %v515_v19 = vld [vmem:[#allocation6 + $0xab8] sm:$0xff]  ;;  %v512_v24 = vld [vmem:[#allocation6 + $0xaa0] sm:$0xff] }
 0x1d1   :  { %3977 = vmatprep.subr.bf16.mxu1 %v3976_v31  ;;  %v451_v31 = vld [vmem:[#allocation6 + $0x8b8] sm:$0xff]  ;;  %v3998_v34 = vpack.c.bf16 %v442_v28, %v434_v26  ;;  %v520_v25 = vld [vmem:[#allocation6 + $0xae0] sm:$0xff]  ;;  %v514_v26 = vld [vmem:[#allocation6 + $0xab0] sm:$0xff] }
 0x1d2   :  { %v523_v20 = vld [vmem:[#allocation6 + $0xaf8] sm:$0xff]  ;;  %v522_v28 = vld [vmem:[#allocation6 + $0xaf0] sm:$0xff] }
 0x1d3   :  { %3723 = vmatpush1.bf16.msra.mxu0 %v3722_v37  ;;  %v456_v37 = vld [vmem:[#allocation6 + $0x8e0] sm:$0xff] }
 0x1d4   :  { %3979 = vmatpush1.bf16.msra.mxu1 %v3978_v38  ;;  %3725 = vmatprep.subr.bf16.mxu0 %v3724_v39  ;;  %v450_v38 = vld [vmem:[#allocation6 + $0x8b0] sm:$0xff]  ;;  %v4000_v39 = vpack.c.bf16 %v459_v32, %v451_v31  ;;  %v3746_v46 = vpack.c.bf16 %v456_v37, %v448_v36  ;;  %v531_v31 = vld [vmem:[#allocation6 + $0xb38] sm:$0xff]  ;;  %v528_v36 = vld [vmem:[#allocation6 + $0xb20] sm:$0xff] }
 0x1d5   :  { %3981 = vmatprep.subr.bf16.mxu1 %v3980_v43  ;;  %v4538_v43 = vld [vmem:[#allocation4] sm:$0xff]  ;;  %v4002_v47 = vpack.c.bf16 %v458_v40, %v450_v38  ;;  %v539_v32 = vld [vmem:[#allocation6 + $0xb78] sm:$0xff]  ;;  %v530_v38 = vld [vmem:[#allocation6 + $0xb30] sm:$0xff] }
 0x1d6   :  { %v536_v37 = vld [vmem:[#allocation6 + $0xb60] sm:$0xff]  ;;  %v538_v40 = vld [vmem:[#allocation6 + $0xb70] sm:$0xff] }
 0x1d7   :  { %3727 = vmatpush1.bf16.msra.mxu0 %v3726_v49  ;;  %v464_v49 = vld [vmem:[#allocation6 + $0x920] sm:$0xff]  ;;  %v3766_v45 = vpack.c.bf16 %v536_v37, %v528_v36  ;;  %v618_v36 = vld [vmem:[#allocation6 + $0xdf0] sm:$0xff]  ;;  %v625_v37 = vld [vmem:[#allocation6 + $0xe28] sm:$0xff] }
 0x1d8   :  { %3983 = vmatpush1.bf16.msra.mxu1 %v3982_v50  ;;  %3729 = vmatprep.subr.bf16.mxu0 %v3728_v51  ;;  %v472_v50 = vld [vmem:[#allocation6 + $0x960] sm:$0xff]  ;;  %v466_v51 = vld [vmem:[#allocation6 + $0x930] sm:$0xff] }
 0x1d9   :  { %3985 = vmatprep.subr.bf16.mxu1 %v3984_v55  ;;  %v489_v55 = vld [vmem:[#allocation6 + $0x9e8] sm:$0xff]  ;;  %v3750_v60 = vpack.c.bf16 %v472_v50, %v464_v49  ;;  %v552_v49 = vld [vmem:[#allocation6 + $0xbe0] sm:$0xff]  ;;  %v546_v50 = vld [vmem:[#allocation6 + $0xbb0] sm:$0xff] }
 0x1db   :  { %3731 = vmatpush1.bf16.msra.mxu0 %v3730_v61  ;;  %v4006_v61 = vpack.c.bf16 %v474_v53, %v466_v51  ;;  %v561_v53 = vld [vmem:[#allocation6 + $0xc28] sm:$0xff] }
 0x1dc   :  { %3987 = vmatpush1.bf16.msra.mxu1 %v3986_v62  ;;  %3733 = vmatprep.subr.bf16.mxu0 %v3732_v63  ;;  %v3752_v62 = vpack.c.bf16 %v489_v55, %v481_v54  ;;  %v480_v63 = vld [vmem:[#allocation6 + $0x9a0] sm:$0xff]  ;;  %v569_v54 = vld [vmem:[#allocation6 + $0xc68] sm:$0xff]  ;;  %v563_v55 = vld [vmem:[#allocation6 + $0xc38] sm:$0xff] }
 0x1dd   :  { %3989 = vmatprep.subr.bf16.mxu1 %v3988_v3  ;;  %v490_v3 = vld [vmem:[#allocation6 + $0x9f0] sm:$0xff] }
 0x1df   :  { %3735 = vmatpush1.bf16.msra.mxu0 %v3734_v9  ;;  %v3754_v9 = vpack.c.bf16 %v488_v0, %v480_v63  ;;  %v570_v0 = vld [vmem:[#allocation6 + $0xc70] sm:$0xff] }
 0x1e0   :  { %3991 = vmatpush1.bf16.msra.mxu1 %v3990_v10  ;;  %3737 = vmatprep.subr.bf16.mxu0 %v3736_v11  ;;  %v4010_v10 = vpack.c.bf16 %v490_v3, %v482_v1  ;;  %v3756_v11 = vpack.c.bf16 %v505_v5, %v497_v4  ;;  %v577_v1 = vld [vmem:[#allocation6 + $0xca8] sm:$0xff]  ;;  %v579_v3 = vld [vmem:[#allocation6 + $0xcb8] sm:$0xff] }
 0x1e1   :  { %3993 = vmatprep.subr.bf16.mxu1 %v3992_v15  ;;  %v4012_v15 = vpack.c.bf16 %v507_v8, %v499_v7  ;;  %v587_v4 = vld [vmem:[#allocation6 + $0xcf8] sm:$0xff]  ;;  %v576_v8 = vld [vmem:[#allocation6 + $0xca0] sm:$0xff] }
 0x1e3   :  { %3739 = vmatpush1.bf16.msra.mxu0 %v3738_v21  ;;  %v3758_v21 = vpack.c.bf16 %v504_v13, %v496_v12  ;;  %v586_v12 = vld [vmem:[#allocation6 + $0xcf0] sm:$0xff]  ;;  %v593_v13 = vld [vmem:[#allocation6 + $0xd28] sm:$0xff] }
 0x1e4   :  { %3995 = vmatpush1.bf16.msra.mxu1 %v3994_v22  ;;  %3741 = vmatprep.subr.bf16.mxu0 %v3740_v23  ;;  %v4014_v22 = vpack.c.bf16 %v506_v16, %v498_v14  ;;  %v3760_v23 = vpack.c.bf16 %v521_v18, %v513_v17  ;;  %v601_v14 = vld [vmem:[#allocation6 + $0xd68] sm:$0xff]  ;;  %v603_v16 = vld [vmem:[#allocation6 + $0xd78] sm:$0xff] }
 0x1e5   :  { %3997 = vmatprep.subr.bf16.mxu1 %v3996_v27  ;;  %v4016_v27 = vpack.c.bf16 %v523_v20, %v515_v19  ;;  %v3780_v19 = vpack.c.bf16 %v601_v14, %v593_v13  ;;  %v592_v20 = vld [vmem:[#allocation6 + $0xd20] sm:$0xff] }
 0x1e6   :  { %1919 = vmatmul.mubr.f32.vlgmr.msra.gmra.mrb[4].mxu0 %v4538_v43 }
 0x1e7   :  { %3743 = vmatpush1.bf16.msra.mxu0 %v3742_v33  ;;  %2227 = vmatmul.mubr.f32.vlgmr.msra.gmra.mrb[4].mxu1 %v4538_v43  ;;  %v3762_v33 = vpack.c.bf16 %v520_v25, %v512_v24  ;;  %v547_v43 = vld [vmem:[#allocation6 + $0xbb8] sm:$0xff]  ;;  %v602_v24 = vld [vmem:[#allocation6 + $0xd70] sm:$0xff]  ;;  %v609_v25 = vld [vmem:[#allocation6 + $0xda8] sm:$0xff] }
 0x1e8   :  { %3999 = vmatpush1.bf16.msra.mxu1 %v3998_v34  ;;  %3745 = vmatprep.subr.bf16.mxu0 %v3744_v35  ;;  %v4018_v34 = vpack.c.bf16 %v522_v28, %v514_v26  ;;  %v3764_v35 = vpack.c.bf16 %v537_v30, %v529_v29  ;;  %v4024_v51 = vpack.c.bf16 %v555_v44, %v547_v43  ;;  %v617_v26 = vld [vmem:[#allocation6 + $0xde8] sm:$0xff]  ;;  %v619_v28 = vld [vmem:[#allocation6 + $0xdf8] sm:$0xff]  ;;  %v624_v44 = vld [vmem:[#allocation6 + $0xe20] sm:$0xff] }
 0x1e9   :  { %4001 = vmatprep.subr.bf16.mxu1 %v4000_v39  ;;  %1924 = vmatprep.mubr.f32.mxu0 %v4539_v56  ;;  %v4020_v39 = vpack.c.bf16 %v539_v32, %v531_v31  ;;  %v3784_v31 = vpack.c.bf16 %v617_v26, %v609_v25  ;;  %v608_v32 = vld [vmem:[#allocation6 + $0xda0] sm:$0xff] }
 0x1ea   :  { %2232 = vmatprep.mubr.f32.mxu1 %v4539_v56  ;;  %1925 = vmatmul.mubr.f32.gmra.mrb[6].mxu0 %v4540_v59  ;;  %v571_v56 = vld [vmem:[#allocation6 + $0xc78] sm:$0xff] }
 0x1eb   :  { %3747 = vmatpush1.bf16.msra.mxu0 %v3746_v46  ;;  %2233 = vmatmul.mubr.f32.gmra.mrb[6].mxu1 %v4540_v59  ;;  %v4022_v46 = vpack.c.bf16 %v538_v40, %v530_v38  ;;  %v3772_v59 = vpack.c.bf16 %v569_v54, %v561_v53  ;;  %v4028_v63 = vpack.c.bf16 %v571_v56, %v563_v55  ;;  %v633_v38 = vld [vmem:[#allocation6 + $0xe68] sm:$0xff]  ;;  %v635_v40 = vld [vmem:[#allocation6 + $0xe78] sm:$0xff]  ;;  %v640_v56 = vld [vmem:[#allocation6 + $0xea0] sm:$0xff] }
 0x1ec   :  { %4003 = vmatpush1.bf16.msra.mxu1 %v4002_v47  ;;  %3749 = vmatprep.subr.bf16.mxu0 %v3748_v48  ;;  %v3768_v47 = vpack.c.bf16 %v553_v42, %v545_v41  ;;  %v544_v48 = vld [vmem:[#allocation6 + $0xba0] sm:$0xff]  ;;  %v3788_v43 = vpack.c.bf16 %v633_v38, %v625_v37 }
 0x1ed   :  { %4005 = vmatprep.subr.bf16.mxu1 %v4004_v52  ;;  %1995 = vmatprep.mubr.f32.mxu0 %v4541_v6  ;;  %v554_v52 = vld [vmem:[#allocation6 + $0xbf0] sm:$0xff]  ;;  %v3770_v57 = vpack.c.bf16 %v552_v49, %v544_v48  ;;  %v641_v49 = vld [vmem:[#allocation6 + $0xea8] sm:$0xff] }
 0x1ee   :  { %2303 = vmatprep.mubr.f32.mxu1 %v4541_v6  ;;  %v4026_v58 = vpack.c.bf16 %v554_v52, %v546_v50  ;;  %v634_v48 = vld [vmem:[#allocation6 + $0xe70] sm:$0xff]  ;;  %v649_v50 = vld [vmem:[#allocation6 + $0xee8] sm:$0xff]  ;;  %v651_v52 = vld [vmem:[#allocation6 + $0xef8] sm:$0xff] }
 0x1ef   :  { %3751 = vmatpush1.bf16.msra.mxu0 %v3750_v60  ;;  %v560_v60 = vld [vmem:[#allocation6 + $0xc20] sm:$0xff]  ;;  %v3792_v55 = vpack.c.bf16 %v649_v50, %v641_v49  ;;  %v731_v49 = vld [vmem:[#allocation6 + $0x1178] sm:$0xff] }
 0x1f0   :  { %4007 = vmatpush1.bf16.msra.mxu1 %v4006_v61  ;;  %3753 = vmatprep.subr.bf16.mxu0 %v3752_v62  ;;  %v568_v61 = vld [vmem:[#allocation6 + $0xc60] sm:$0xff]  ;;  %v562_v62 = vld [vmem:[#allocation6 + $0xc30] sm:$0xff] }
 0x1f1   :  { %4009 = vmatprep.subr.bf16.mxu1 %v4008_v2  ;;  %v585_v2 = vld [vmem:[#allocation6 + $0xce8] sm:$0xff]  ;;  %v3774_v5 = vpack.c.bf16 %v568_v61, %v560_v60  ;;  %v4030_v6 = vpack.c.bf16 %v570_v0, %v562_v62  ;;  %v650_v60 = vld [vmem:[#allocation6 + $0xef0] sm:$0xff]  ;;  %v667_v0 = vld [vmem:[#allocation6 + $0xf78] sm:$0xff] }
 0x1f2   :  { %v3776_v7 = vpack.c.bf16 %v585_v2, %v577_v1  ;;  %v657_v61 = vld [vmem:[#allocation6 + $0xf28] sm:$0xff] }
 0x1f3   :  { %3755 = vmatpush1.bf16.msra.mxu0 %v3754_v9  ;;  %v584_v9 = vld [vmem:[#allocation6 + $0xce0] sm:$0xff]  ;;  %v665_v62 = vld [vmem:[#allocation6 + $0xf68] sm:$0xff] }
 0x1f4   :  { %4011 = vmatpush1.bf16.msra.mxu1 %v4010_v10  ;;  %3757 = vmatprep.subr.bf16.mxu0 %v3756_v11  ;;  %v578_v10 = vld [vmem:[#allocation6 + $0xcb0] sm:$0xff]  ;;  %v4032_v11 = vpack.c.bf16 %v587_v4, %v579_v3  ;;  %v3778_v17 = vpack.c.bf16 %v584_v9, %v576_v8  ;;  %v3796_v3 = vpack.c.bf16 %v665_v62, %v657_v61  ;;  %v656_v4 = vld [vmem:[#allocation6 + $0xf20] sm:$0xff]  ;;  %v673_v9 = vld [vmem:[#allocation6 + $0xfa8] sm:$0xff] }
 0x1f5   :  { %4013 = vmatprep.subr.bf16.mxu1 %v4012_v15  ;;  %v595_v15 = vld [vmem:[#allocation6 + $0xd38] sm:$0xff]  ;;  %v4034_v18 = vpack.c.bf16 %v586_v12, %v578_v10  ;;  %v666_v8 = vld [vmem:[#allocation6 + $0xf70] sm:$0xff]  ;;  %v681_v10 = vld [vmem:[#allocation6 + $0xfe8] sm:$0xff] }
 0x1f6   :  { %v683_v12 = vld [vmem:[#allocation6 + $0xff8] sm:$0xff] }
 0x1f7   :  { %3759 = vmatpush1.bf16.msra.mxu0 %v3758_v21  ;;  %v600_v21 = vld [vmem:[#allocation6 + $0xd60] sm:$0xff]  ;;  %v739_v61 = vld [vmem:[#allocation6 + $0x11b8] sm:$0xff] }
 0x1f8   :  { %4015 = vmatpush1.bf16.msra.mxu1 %v4014_v22  ;;  %3761 = vmatprep.subr.bf16.mxu0 %v3760_v23  ;;  %v594_v22 = vld [vmem:[#allocation6 + $0xd30] sm:$0xff]  ;;  %v4036_v23 = vpack.c.bf16 %v603_v16, %v595_v15  ;;  %v3782_v29 = vpack.c.bf16 %v600_v21, %v592_v20  ;;  %v3800_v15 = vpack.c.bf16 %v681_v10, %v673_v9  ;;  %v672_v16 = vld [vmem:[#allocation6 + $0xfa0] sm:$0xff]  ;;  %v689_v21 = vld [vmem:[#allocation6 + $0x1028] sm:$0xff] }
 0x1f9   :  { %4017 = vmatprep.subr.bf16.mxu1 %v4016_v27  ;;  %v611_v27 = vld [vmem:[#allocation6 + $0xdb8] sm:$0xff]  ;;  %v4038_v30 = vpack.c.bf16 %v602_v24, %v594_v22  ;;  %v682_v20 = vld [vmem:[#allocation6 + $0xff0] sm:$0xff]  ;;  %v697_v22 = vld [vmem:[#allocation6 + $0x1068] sm:$0xff] }
 0x1fa   :  { %v699_v24 = vld [vmem:[#allocation6 + $0x1078] sm:$0xff]  ;;  %v761_v9 = vld [vmem:[#allocation6 + $0x1268] sm:$0xff] }
 0x1fb   :  { %3763 = vmatpush1.bf16.msra.mxu0 %v3762_v33  ;;  %v616_v33 = vld [vmem:[#allocation6 + $0xde0] sm:$0xff]  ;;  %v747_v62 = vld [vmem:[#allocation6 + $0x11f8] sm:$0xff]  ;;  %v4545_v10 = vld [vmem:[#allocation4 + $0x28] sm:$0xff] }
 0x1fc   :  { %4019 = vmatpush1.bf16.msra.mxu1 %v4018_v34  ;;  %3765 = vmatprep.subr.bf16.mxu0 %v3764_v35  ;;  %v610_v34 = vld [vmem:[#allocation6 + $0xdb0] sm:$0xff]  ;;  %v4040_v35 = vpack.c.bf16 %v619_v28, %v611_v27  ;;  %v3786_v41 = vpack.c.bf16 %v616_v33, %v608_v32  ;;  %v3804_v27 = vpack.c.bf16 %v697_v22, %v689_v21  ;;  %v688_v28 = vld [vmem:[#allocation6 + $0x1020] sm:$0xff]  ;;  %v705_v33 = vld [vmem:[#allocation6 + $0x10a8] sm:$0xff] }
 0x1fd   :  { %4021 = vmatprep.subr.bf16.mxu1 %v4020_v39  ;;  %v627_v39 = vld [vmem:[#allocation6 + $0xe38] sm:$0xff]  ;;  %v4042_v42 = vpack.c.bf16 %v618_v36, %v610_v34  ;;  %v698_v32 = vld [vmem:[#allocation6 + $0x1070] sm:$0xff]  ;;  %v713_v34 = vld [vmem:[#allocation6 + $0x10e8] sm:$0xff] }
 0x1fe   :  { %v715_v36 = vld [vmem:[#allocation6 + $0x10f8] sm:$0xff]  ;;  %v769_v21 = vld [vmem:[#allocation6 + $0x12a8] sm:$0xff] }
 0x1ff   :  { %3767 = vmatpush1.bf16.msra.mxu0 %v3766_v45  ;;  %v632_v45 = vld [vmem:[#allocation6 + $0xe60] sm:$0xff]  ;;  %v777_v22 = vld [vmem:[#allocation6 + $0x12e8] sm:$0xff] }
 0x200   :  { %4023 = vmatpush1.bf16.msra.mxu1 %v4022_v46  ;;  %3769 = vmatprep.subr.bf16.mxu0 %v3768_v47  ;;  %v626_v46 = vld [vmem:[#allocation6 + $0xe30] sm:$0xff]  ;;  %v4044_v47 = vpack.c.bf16 %v635_v40, %v627_v39  ;;  %v3790_v53 = vpack.c.bf16 %v632_v45, %v624_v44  ;;  %v3808_v39 = vpack.c.bf16 %v713_v34, %v705_v33  ;;  %v704_v40 = vld [vmem:[#allocation6 + $0x10a0] sm:$0xff]  ;;  %v721_v45 = vld [vmem:[#allocation6 + $0x1128] sm:$0xff] }
 0x201   :  { %4025 = vmatprep.subr.bf16.mxu1 %v4024_v51  ;;  %v643_v51 = vld [vmem:[#allocation6 + $0xeb8] sm:$0xff]  ;;  %v4046_v54 = vpack.c.bf16 %v634_v48, %v626_v46  ;;  %v714_v44 = vld [vmem:[#allocation6 + $0x10f0] sm:$0xff]  ;;  %v729_v46 = vld [vmem:[#allocation6 + $0x1168] sm:$0xff] }
 0x202   :  { %v723_v48 = vld [vmem:[#allocation6 + $0x1138] sm:$0xff]  ;;  %v785_v33 = vld [vmem:[#allocation6 + $0x1328] sm:$0xff] }
 0x203   :  { %3771 = vmatpush1.bf16.msra.mxu0 %v3770_v57  ;;  %v648_v57 = vld [vmem:[#allocation6 + $0xee0] sm:$0xff]  ;;  %v793_v34 = vld [vmem:[#allocation6 + $0x1368] sm:$0xff] }
 0x204   :  { %4027 = vmatpush1.bf16.msra.mxu1 %v4026_v58  ;;  %3773 = vmatprep.subr.bf16.mxu0 %v3772_v59  ;;  %v642_v58 = vld [vmem:[#allocation6 + $0xeb0] sm:$0xff]  ;;  %v4048_v59 = vpack.c.bf16 %v651_v52, %v643_v51  ;;  %v3794_v1 = vpack.c.bf16 %v648_v57, %v640_v56  ;;  %v3812_v52 = vpack.c.bf16 %v729_v46, %v721_v45  ;;  %v801_v45 = vld [vmem:[#allocation6 + $0x13a8] sm:$0xff] }
 0x205   :  { %4029 = vmatprep.subr.bf16.mxu1 %v4028_v63  ;;  %v659_v63 = vld [vmem:[#allocation6 + $0xf38] sm:$0xff]  ;;  %v4050_v2 = vpack.c.bf16 %v650_v60, %v642_v58  ;;  %v4068_v56 = vpack.c.bf16 %v731_v49, %v723_v48  ;;  %v730_v57 = vld [vmem:[#allocation6 + $0x1170] sm:$0xff]  ;;  %v737_v58 = vld [vmem:[#allocation6 + $0x11a8] sm:$0xff] }
 0x206   :  { %v4543_v60 = vld [vmem:[#allocation4 + $0x58] sm:$0xff]  ;;  %v809_v46 = vld [vmem:[#allocation6 + $0x13e8] sm:$0xff] }
 0x207   :  { %3775 = vmatpush1.bf16.msra.mxu0 %v3774_v5  ;;  %v664_v5 = vld [vmem:[#allocation6 + $0xf60] sm:$0xff]  ;;  %v811_v48 = vld [vmem:[#allocation6 + $0x13f8] sm:$0xff] }
 0x208   :  { %4031 = vmatpush1.bf16.msra.mxu1 %v4030_v6  ;;  %3777 = vmatprep.subr.bf16.mxu0 %v3776_v7  ;;  %v658_v6 = vld [vmem:[#allocation6 + $0xf30] sm:$0xff]  ;;  %v4052_v7 = vpack.c.bf16 %v667_v0, %v659_v63  ;;  %v3798_v13 = vpack.c.bf16 %v664_v5, %v656_v4  ;;  %v744_v4 = vld [vmem:[#allocation6 + $0x11e0] sm:$0xff] }
 0x209   :  { %4033 = vmatprep.subr.bf16.mxu1 %v4032_v11  ;;  %v675_v11 = vld [vmem:[#allocation6 + $0xfb8] sm:$0xff]  ;;  %v4054_v14 = vpack.c.bf16 %v666_v8, %v658_v6  ;;  %v4544_v63 = vld [vmem:[#allocation4 + $0x50] sm:$0xff]  ;;  %v4072_v6 = vpack.c.bf16 %v747_v62, %v739_v61  ;;  %v753_v8 = vld [vmem:[#allocation6 + $0x1228] sm:$0xff] }
 0x20a   :  { %v738_v5 = vld [vmem:[#allocation6 + $0x11b0] sm:$0xff] }
 0x20b   :  { %3779 = vmatpush1.bf16.msra.mxu0 %v3778_v17  ;;  %v680_v17 = vld [vmem:[#allocation6 + $0xfe0] sm:$0xff] }
 0x20c   :  { %4035 = vmatpush1.bf16.msra.mxu1 %v4034_v18  ;;  %3781 = vmatprep.subr.bf16.mxu0 %v3780_v19  ;;  %v674_v18 = vld [vmem:[#allocation6 + $0xfb0] sm:$0xff]  ;;  %v4056_v19 = vpack.c.bf16 %v683_v12, %v675_v11  ;;  %v3802_v25 = vpack.c.bf16 %v680_v17, %v672_v16  ;;  %v755_v11 = vld [vmem:[#allocation6 + $0x1238] sm:$0xff]  ;;  %v752_v16 = vld [vmem:[#allocation6 + $0x1220] sm:$0xff] }
 0x20d   :  { %4037 = vmatprep.subr.bf16.mxu1 %v4036_v23  ;;  %v691_v23 = vld [vmem:[#allocation6 + $0x1038] sm:$0xff]  ;;  %v4058_v26 = vpack.c.bf16 %v682_v20, %v674_v18  ;;  %v760_v17 = vld [vmem:[#allocation6 + $0x1260] sm:$0xff]  ;;  %v754_v18 = vld [vmem:[#allocation6 + $0x1230] sm:$0xff] }
 0x20e   :  { %v763_v12 = vld [vmem:[#allocation6 + $0x1278] sm:$0xff]  ;;  %v762_v20 = vld [vmem:[#allocation6 + $0x1270] sm:$0xff] }
 0x20f   :  { %3783 = vmatpush1.bf16.msra.mxu0 %v3782_v29  ;;  %v696_v29 = vld [vmem:[#allocation6 + $0x1060] sm:$0xff] }
 0x210   :  { %4039 = vmatpush1.bf16.msra.mxu1 %v4038_v30  ;;  %3785 = vmatprep.subr.bf16.mxu0 %v3784_v31  ;;  %v690_v30 = vld [vmem:[#allocation6 + $0x1030] sm:$0xff]  ;;  %v4060_v31 = vpack.c.bf16 %v699_v24, %v691_v23  ;;  %v3806_v37 = vpack.c.bf16 %v696_v29, %v688_v28  ;;  %v771_v23 = vld [vmem:[#allocation6 + $0x12b8] sm:$0xff]  ;;  %v768_v28 = vld [vmem:[#allocation6 + $0x12a0] sm:$0xff] }
 0x211   :  { %4041 = vmatprep.subr.bf16.mxu1 %v4040_v35  ;;  %v707_v35 = vld [vmem:[#allocation6 + $0x10b8] sm:$0xff]  ;;  %v4062_v38 = vpack.c.bf16 %v698_v32, %v690_v30  ;;  %v776_v29 = vld [vmem:[#allocation6 + $0x12e0] sm:$0xff]  ;;  %v770_v30 = vld [vmem:[#allocation6 + $0x12b0] sm:$0xff] }
 0x212   :  { %v779_v24 = vld [vmem:[#allocation6 + $0x12f8] sm:$0xff]  ;;  %v778_v32 = vld [vmem:[#allocation6 + $0x12f0] sm:$0xff] }
 0x213   :  { %3787 = vmatpush1.bf16.msra.mxu0 %v3786_v41  ;;  %v712_v41 = vld [vmem:[#allocation6 + $0x10e0] sm:$0xff] }
 0x214   :  { %4043 = vmatpush1.bf16.msra.mxu1 %v4042_v42  ;;  %3789 = vmatprep.subr.bf16.mxu0 %v3788_v43  ;;  %v706_v42 = vld [vmem:[#allocation6 + $0x10b0] sm:$0xff]  ;;  %v4064_v43 = vpack.c.bf16 %v715_v36, %v707_v35  ;;  %v3810_v50 = vpack.c.bf16 %v712_v41, %v704_v40  ;;  %v787_v35 = vld [vmem:[#allocation6 + $0x1338] sm:$0xff]  ;;  %v784_v40 = vld [vmem:[#allocation6 + $0x1320] sm:$0xff] }
 0x215   :  { %4045 = vmatprep.subr.bf16.mxu1 %v4044_v47  ;;  %v4542_v47 = vld [vmem:[#allocation4 + $0x10] sm:$0xff]  ;;  %v4066_v51 = vpack.c.bf16 %v714_v44, %v706_v42  ;;  %v795_v36 = vld [vmem:[#allocation6 + $0x1378] sm:$0xff]  ;;  %v792_v41 = vld [vmem:[#allocation6 + $0x1360] sm:$0xff] }
 0x216   :  { %v786_v42 = vld [vmem:[#allocation6 + $0x1330] sm:$0xff]  ;;  %v3830_v49 = vpack.c.bf16 %v792_v41, %v784_v40  ;;  %v881_v41 = vld [vmem:[#allocation6 + $0x1628] sm:$0xff] }
 0x217   :  { %3791 = vmatpush1.bf16.msra.mxu0 %v3790_v53  ;;  %v720_v53 = vld [vmem:[#allocation6 + $0x1120] sm:$0xff]  ;;  %v794_v44 = vld [vmem:[#allocation6 + $0x1370] sm:$0xff] }
 0x218   :  { %4047 = vmatpush1.bf16.msra.mxu1 %v4046_v54  ;;  %3793 = vmatprep.subr.bf16.mxu0 %v3792_v55  ;;  %v728_v54 = vld [vmem:[#allocation6 + $0x1160] sm:$0xff]  ;;  %v722_v55 = vld [vmem:[#allocation6 + $0x1130] sm:$0xff] }
 0x219   :  { %4049 = vmatprep.subr.bf16.mxu1 %v4048_v59  ;;  %v745_v59 = vld [vmem:[#allocation6 + $0x11e8] sm:$0xff]  ;;  %v3814_v0 = vpack.c.bf16 %v728_v54, %v720_v53  ;;  %v808_v53 = vld [vmem:[#allocation6 + $0x13e0] sm:$0xff]  ;;  %v802_v54 = vld [vmem:[#allocation6 + $0x13b0] sm:$0xff] }
 0x21a   :  { %v874_v40 = vld [vmem:[#allocation6 + $0x15f0] sm:$0xff] }
 0x21b   :  { %3795 = vmatpush1.bf16.msra.mxu0 %v3794_v1  ;;  %v4070_v1 = vpack.c.bf16 %v730_v57, %v722_v55  ;;  %v817_v57 = vld [vmem:[#allocation6 + $0x1428] sm:$0xff] }
 0x21c   :  { %4051 = vmatpush1.bf16.msra.mxu1 %v4050_v2  ;;  %3797 = vmatprep.subr.bf16.mxu0 %v3796_v3  ;;  %v3816_v2 = vpack.c.bf16 %v745_v59, %v737_v58  ;;  %v736_v3 = vld [vmem:[#allocation6 + $0x11a0] sm:$0xff]  ;;  %v825_v58 = vld [vmem:[#allocation6 + $0x1468] sm:$0xff]  ;;  %v819_v59 = vld [vmem:[#allocation6 + $0x1438] sm:$0xff] }
 0x21d   :  { %4053 = vmatprep.subr.bf16.mxu1 %v4052_v7  ;;  %v746_v7 = vld [vmem:[#allocation6 + $0x11f0] sm:$0xff] }
 0x21f   :  { %3799 = vmatpush1.bf16.msra.mxu0 %v3798_v13  ;;  %v3818_v13 = vpack.c.bf16 %v744_v4, %v736_v3  ;;  %v826_v4 = vld [vmem:[#allocation6 + $0x1470] sm:$0xff] }
 0x220   :  { %4055 = vmatpush1.bf16.msra.mxu1 %v4054_v14  ;;  %3801 = vmatprep.subr.bf16.mxu0 %v3800_v15  ;;  %v4074_v14 = vpack.c.bf16 %v746_v7, %v738_v5  ;;  %v3820_v15 = vpack.c.bf16 %v761_v9, %v753_v8  ;;  %v833_v5 = vld [vmem:[#allocation6 + $0x14a8] sm:$0xff]  ;;  %v835_v7 = vld [vmem:[#allocation6 + $0x14b8] sm:$0xff] }
 0x221   :  { %4057 = vmatprep.subr.bf16.mxu1 %v4056_v19  ;;  %v4076_v19 = vpack.c.bf16 %v763_v12, %v755_v11  ;;  %v843_v8 = vld [vmem:[#allocation6 + $0x14f8] sm:$0xff]  ;;  %v832_v12 = vld [vmem:[#allocation6 + $0x14a0] sm:$0xff] }
 0x223   :  { %3803 = vmatpush1.bf16.msra.mxu0 %v3802_v25  ;;  %v3822_v25 = vpack.c.bf16 %v760_v17, %v752_v16  ;;  %v842_v16 = vld [vmem:[#allocation6 + $0x14f0] sm:$0xff]  ;;  %v849_v17 = vld [vmem:[#allocation6 + $0x1528] sm:$0xff] }
 0x224   :  { %4059 = vmatpush1.bf16.msra.mxu1 %v4058_v26  ;;  %3805 = vmatprep.subr.bf16.mxu0 %v3804_v27  ;;  %v4078_v26 = vpack.c.bf16 %v762_v20, %v754_v18  ;;  %v3824_v27 = vpack.c.bf16 %v777_v22, %v769_v21  ;;  %v857_v18 = vld [vmem:[#allocation6 + $0x1568] sm:$0xff]  ;;  %v859_v20 = vld [vmem:[#allocation6 + $0x1578] sm:$0xff] }
 0x225   :  { %4061 = vmatprep.subr.bf16.mxu1 %v4060_v31  ;;  %v4080_v31 = vpack.c.bf16 %v779_v24, %v771_v23  ;;  %v3844_v23 = vpack.c.bf16 %v857_v18, %v849_v17  ;;  %v848_v24 = vld [vmem:[#allocation6 + $0x1520] sm:$0xff] }
 0x226   :  { %1996 = vmatmul.mubr.f32.vlgmr.msra.gmra.mrb[4].mxu0 %v4542_v47 }
 0x227   :  { %3807 = vmatpush1.bf16.msra.mxu0 %v3806_v37  ;;  %2304 = vmatmul.mubr.f32.vlgmr.msra.gmra.mrb[4].mxu1 %v4542_v47  ;;  %v3826_v37 = vpack.c.bf16 %v776_v29, %v768_v28  ;;  %v803_v47 = vld [vmem:[#allocation6 + $0x13b8] sm:$0xff]  ;;  %v858_v28 = vld [vmem:[#allocation6 + $0x1570] sm:$0xff]  ;;  %v865_v29 = vld [vmem:[#allocation6 + $0x15a8] sm:$0xff] }
 0x228   :  { %4063 = vmatpush1.bf16.msra.mxu1 %v4062_v38  ;;  %3809 = vmatprep.subr.bf16.mxu0 %v3808_v39  ;;  %v4082_v38 = vpack.c.bf16 %v778_v32, %v770_v30  ;;  %v3828_v39 = vpack.c.bf16 %v793_v34, %v785_v33  ;;  %v4088_v55 = vpack.c.bf16 %v811_v48, %v803_v47  ;;  %v873_v30 = vld [vmem:[#allocation6 + $0x15e8] sm:$0xff]  ;;  %v875_v32 = vld [vmem:[#allocation6 + $0x15f8] sm:$0xff]  ;;  %v880_v48 = vld [vmem:[#allocation6 + $0x1620] sm:$0xff] }
 0x229   :  { %4065 = vmatprep.subr.bf16.mxu1 %v4064_v43  ;;  %2001 = vmatprep.mubr.f32.mxu0 %v4543_v60  ;;  %v4084_v43 = vpack.c.bf16 %v795_v36, %v787_v35  ;;  %v3848_v35 = vpack.c.bf16 %v873_v30, %v865_v29  ;;  %v864_v36 = vld [vmem:[#allocation6 + $0x15a0] sm:$0xff] }
 0x22a   :  { %2309 = vmatprep.mubr.f32.mxu1 %v4543_v60  ;;  %2002 = vmatmul.mubr.f32.gmra.mrb[6].mxu0 %v4544_v63  ;;  %v827_v60 = vld [vmem:[#allocation6 + $0x1478] sm:$0xff] }
 0x22b   :  { %3811 = vmatpush1.bf16.msra.mxu0 %v3810_v50  ;;  %2310 = vmatmul.mubr.f32.gmra.mrb[6].mxu1 %v4544_v63  ;;  %v4086_v50 = vpack.c.bf16 %v794_v44, %v786_v42  ;;  %v3836_v63 = vpack.c.bf16 %v825_v58, %v817_v57  ;;  %v4092_v3 = vpack.c.bf16 %v827_v60, %v819_v59  ;;  %v889_v42 = vld [vmem:[#allocation6 + $0x1668] sm:$0xff]  ;;  %v891_v44 = vld [vmem:[#allocation6 + $0x1678] sm:$0xff]  ;;  %v896_v60 = vld [vmem:[#allocation6 + $0x16a0] sm:$0xff] }
 0x22c   :  { %4067 = vmatpush1.bf16.msra.mxu1 %v4066_v51  ;;  %3813 = vmatprep.subr.bf16.mxu0 %v3812_v52  ;;  %v3832_v51 = vpack.c.bf16 %v809_v46, %v801_v45  ;;  %v800_v52 = vld [vmem:[#allocation6 + $0x13a0] sm:$0xff]  ;;  %v3852_v47 = vpack.c.bf16 %v889_v42, %v881_v41 }
 0x22d   :  { %4069 = vmatprep.subr.bf16.mxu1 %v4068_v56  ;;  %2072 = vmatprep.mubr.f32.mxu0 %v4545_v10  ;;  %v810_v56 = vld [vmem:[#allocation6 + $0x13f0] sm:$0xff]  ;;  %v3834_v61 = vpack.c.bf16 %v808_v53, %v800_v52  ;;  %v897_v53 = vld [vmem:[#allocation6 + $0x16a8] sm:$0xff] }
 0x22e   :  { %2380 = vmatprep.mubr.f32.mxu1 %v4545_v10  ;;  %v4090_v62 = vpack.c.bf16 %v810_v56, %v802_v54  ;;  %v890_v52 = vld [vmem:[#allocation6 + $0x1670] sm:$0xff]  ;;  %v905_v54 = vld [vmem:[#allocation6 + $0x16e8] sm:$0xff]  ;;  %v907_v56 = vld [vmem:[#allocation6 + $0x16f8] sm:$0xff] }
 0x22f   :  { %3815 = vmatpush1.bf16.msra.mxu0 %v3814_v0  ;;  %v816_v0 = vld [vmem:[#allocation6 + $0x1420] sm:$0xff]  ;;  %v3856_v59 = vpack.c.bf16 %v905_v54, %v897_v53  ;;  %v987_v53 = vld [vmem:[#allocation6 + $0x1978] sm:$0xff] }
 0x230   :  { %4071 = vmatpush1.bf16.msra.mxu1 %v4070_v1  ;;  %3817 = vmatprep.subr.bf16.mxu0 %v3816_v2  ;;  %v824_v1 = vld [vmem:[#allocation6 + $0x1460] sm:$0xff]  ;;  %v818_v2 = vld [vmem:[#allocation6 + $0x1430] sm:$0xff] }
 0x231   :  { %4073 = vmatprep.subr.bf16.mxu1 %v4072_v6  ;;  %v841_v6 = vld [vmem:[#allocation6 + $0x14e8] sm:$0xff]  ;;  %v3838_v9 = vpack.c.bf16 %v824_v1, %v816_v0  ;;  %v4094_v10 = vpack.c.bf16 %v826_v4, %v818_v2  ;;  %v906_v0 = vld [vmem:[#allocation6 + $0x16f0] sm:$0xff]  ;;  %v923_v4 = vld [vmem:[#allocation6 + $0x1778] sm:$0xff] }
 0x232   :  { %v3840_v11 = vpack.c.bf16 %v841_v6, %v833_v5  ;;  %v913_v1 = vld [vmem:[#allocation6 + $0x1728] sm:$0xff] }
 0x233   :  { %3819 = vmatpush1.bf16.msra.mxu0 %v3818_v13  ;;  %v840_v13 = vld [vmem:[#allocation6 + $0x14e0] sm:$0xff]  ;;  %v921_v2 = vld [vmem:[#allocation6 + $0x1768] sm:$0xff] }
 0x234   :  { %4075 = vmatpush1.bf16.msra.mxu1 %v4074_v14  ;;  %3821 = vmatprep.subr.bf16.mxu0 %v3820_v15  ;;  %v834_v14 = vld [vmem:[#allocation6 + $0x14b0] sm:$0xff]  ;;  %v4096_v15 = vpack.c.bf16 %v843_v8, %v835_v7  ;;  %v3842_v21 = vpack.c.bf16 %v840_v13, %v832_v12  ;;  %v3860_v7 = vpack.c.bf16 %v921_v2, %v913_v1  ;;  %v912_v8 = vld [vmem:[#allocation6 + $0x1720] sm:$0xff]  ;;  %v929_v13 = vld [vmem:[#allocation6 + $0x17a8] sm:$0xff] }
 0x235   :  { %4077 = vmatprep.subr.bf16.mxu1 %v4076_v19  ;;  %v851_v19 = vld [vmem:[#allocation6 + $0x1538] sm:$0xff]  ;;  %v4098_v22 = vpack.c.bf16 %v842_v16, %v834_v14  ;;  %v922_v12 = vld [vmem:[#allocation6 + $0x1770] sm:$0xff]  ;;  %v937_v14 = vld [vmem:[#allocation6 + $0x17e8] sm:$0xff] }
 0x236   :  { %v939_v16 = vld [vmem:[#allocation6 + $0x17f8] sm:$0xff] }
 0x237   :  { %3823 = vmatpush1.bf16.msra.mxu0 %v3822_v25  ;;  %v856_v25 = vld [vmem:[#allocation6 + $0x1560] sm:$0xff]  ;;  %v995_v1 = vld [vmem:[#allocation6 + $0x19b8] sm:$0xff] }
 0x238   :  { %4079 = vmatpush1.bf16.msra.mxu1 %v4078_v26  ;;  %3825 = vmatprep.subr.bf16.mxu0 %v3824_v27  ;;  %v850_v26 = vld [vmem:[#allocation6 + $0x1530] sm:$0xff]  ;;  %v4100_v27 = vpack.c.bf16 %v859_v20, %v851_v19  ;;  %v3846_v33 = vpack.c.bf16 %v856_v25, %v848_v24  ;;  %v3864_v19 = vpack.c.bf16 %v937_v14, %v929_v13  ;;  %v928_v20 = vld [vmem:[#allocation6 + $0x17a0] sm:$0xff]  ;;  %v945_v25 = vld [vmem:[#allocation6 + $0x1828] sm:$0xff] }
 0x239   :  { %4081 = vmatprep.subr.bf16.mxu1 %v4080_v31  ;;  %v867_v31 = vld [vmem:[#allocation6 + $0x15b8] sm:$0xff]  ;;  %v4102_v34 = vpack.c.bf16 %v858_v28, %v850_v26  ;;  %v938_v24 = vld [vmem:[#allocation6 + $0x17f0] sm:$0xff]  ;;  %v953_v26 = vld [vmem:[#allocation6 + $0x1868] sm:$0xff] }
 0x23a   :  { %v955_v28 = vld [vmem:[#allocation6 + $0x1878] sm:$0xff]  ;;  %v1017_v13 = vld [vmem:[#allocation6 + $0x1a68] sm:$0xff] }
 0x23b   :  { %3827 = vmatpush1.bf16.msra.mxu0 %v3826_v37  ;;  %v872_v37 = vld [vmem:[#allocation6 + $0x15e0] sm:$0xff]  ;;  %v1003_v2 = vld [vmem:[#allocation6 + $0x19f8] sm:$0xff] }
 0x23c   :  { %4083 = vmatpush1.bf16.msra.mxu1 %v4082_v38  ;;  %3829 = vmatprep.subr.bf16.mxu0 %v3828_v39  ;;  %v866_v38 = vld [vmem:[#allocation6 + $0x15b0] sm:$0xff]  ;;  %v4104_v39 = vpack.c.bf16 %v875_v32, %v867_v31  ;;  %v3850_v45 = vpack.c.bf16 %v872_v37, %v864_v36  ;;  %v3868_v31 = vpack.c.bf16 %v953_v26, %v945_v25  ;;  %v944_v32 = vld [vmem:[#allocation6 + $0x1820] sm:$0xff]  ;;  %v961_v37 = vld [vmem:[#allocation6 + $0x18a8] sm:$0xff] }
 0x23d   :  { %4085 = vmatprep.subr.bf16.mxu1 %v4084_v43  ;;  %v883_v43 = vld [vmem:[#allocation6 + $0x1638] sm:$0xff]  ;;  %v4106_v46 = vpack.c.bf16 %v874_v40, %v866_v38  ;;  %v954_v36 = vld [vmem:[#allocation6 + $0x1870] sm:$0xff]  ;;  %v969_v38 = vld [vmem:[#allocation6 + $0x18e8] sm:$0xff] }
 0x23e   :  { %v971_v40 = vld [vmem:[#allocation6 + $0x18f8] sm:$0xff]  ;;  %v1025_v25 = vld [vmem:[#allocation6 + $0x1aa8] sm:$0xff] }
 0x23f   :  { %3831 = vmatpush1.bf16.msra.mxu0 %v3830_v49  ;;  %v888_v49 = vld [vmem:[#allocation6 + $0x1660] sm:$0xff]  ;;  %v4549_v14 = vld [vmem:[#allocation4 + $0x38] sm:$0xff]  ;;  %v1033_v26 = vld [vmem:[#allocation6 + $0x1ae8] sm:$0xff] }
 0x240   :  { %4087 = vmatpush1.bf16.msra.mxu1 %v4086_v50  ;;  %3833 = vmatprep.subr.bf16.mxu0 %v3832_v51  ;;  %v882_v50 = vld [vmem:[#allocation6 + $0x1630] sm:$0xff]  ;;  %v4108_v51 = vpack.c.bf16 %v891_v44, %v883_v43  ;;  %v3854_v57 = vpack.c.bf16 %v888_v49, %v880_v48  ;;  %v3872_v43 = vpack.c.bf16 %v969_v38, %v961_v37  ;;  %v960_v44 = vld [vmem:[#allocation6 + $0x18a0] sm:$0xff]  ;;  %v977_v49 = vld [vmem:[#allocation6 + $0x1928] sm:$0xff] }
 0x241   :  { %4089 = vmatprep.subr.bf16.mxu1 %v4088_v55  ;;  %v899_v55 = vld [vmem:[#allocation6 + $0x16b8] sm:$0xff]  ;;  %v4110_v58 = vpack.c.bf16 %v890_v52, %v882_v50  ;;  %v970_v48 = vld [vmem:[#allocation6 + $0x18f0] sm:$0xff]  ;;  %v985_v50 = vld [vmem:[#allocation6 + $0x1968] sm:$0xff] }
 0x242   :  { %v979_v52 = vld [vmem:[#allocation6 + $0x1938] sm:$0xff]  ;;  %v1041_v37 = vld [vmem:[#allocation6 + $0x1b28] sm:$0xff] }
 0x243   :  { %3835 = vmatpush1.bf16.msra.mxu0 %v3834_v61  ;;  %v904_v61 = vld [vmem:[#allocation6 + $0x16e0] sm:$0xff]  ;;  %v1049_v38 = vld [vmem:[#allocation6 + $0x1b68] sm:$0xff] }
 0x244   :  { %4091 = vmatpush1.bf16.msra.mxu1 %v4090_v62  ;;  %3837 = vmatprep.subr.bf16.mxu0 %v3836_v63  ;;  %v898_v62 = vld [vmem:[#allocation6 + $0x16b0] sm:$0xff]  ;;  %v4112_v63 = vpack.c.bf16 %v907_v56, %v899_v55  ;;  %v3858_v5 = vpack.c.bf16 %v904_v61, %v896_v60  ;;  %v3876_v56 = vpack.c.bf16 %v985_v50, %v977_v49  ;;  %v1057_v50 = vld [vmem:[#allocation6 + $0x1ba8] sm:$0xff] }
 0x245   :  { %4093 = vmatprep.subr.bf16.mxu1 %v4092_v3  ;;  %v915_v3 = vld [vmem:[#allocation6 + $0x1738] sm:$0xff]  ;;  %v4114_v6 = vpack.c.bf16 %v906_v0, %v898_v62  ;;  %v4132_v60 = vpack.c.bf16 %v987_v53, %v979_v52  ;;  %v986_v61 = vld [vmem:[#allocation6 + $0x1970] sm:$0xff]  ;;  %v993_v62 = vld [vmem:[#allocation6 + $0x19a8] sm:$0xff] }
 0x246   :  { %v4547_v0 = vld [vmem:[#allocation4 + $0x68] sm:$0xff]  ;;  %v1050_v49 = vld [vmem:[#allocation6 + $0x1b70] sm:$0xff] }
 0x247   :  { %3839 = vmatpush1.bf16.msra.mxu0 %v3838_v9  ;;  %v920_v9 = vld [vmem:[#allocation6 + $0x1760] sm:$0xff] }
 0x248   :  { %4095 = vmatpush1.bf16.msra.mxu1 %v4094_v10  ;;  %3841 = vmatprep.subr.bf16.mxu0 %v3840_v11  ;;  %v914_v10 = vld [vmem:[#allocation6 + $0x1730] sm:$0xff]  ;;  %v4116_v11 = vpack.c.bf16 %v923_v4, %v915_v3  ;;  %v3862_v17 = vpack.c.bf16 %v920_v9, %v912_v8  ;;  %v4548_v3 = vld [vmem:[#allocation4 + $0x60] sm:$0xff] }
 0x249   :  { %4097 = vmatprep.subr.bf16.mxu1 %v4096_v15  ;;  %v931_v15 = vld [vmem:[#allocation6 + $0x17b8] sm:$0xff]  ;;  %v4118_v18 = vpack.c.bf16 %v922_v12, %v914_v10  ;;  %v1000_v8 = vld [vmem:[#allocation6 + $0x19e0] sm:$0xff]  ;;  %v994_v9 = vld [vmem:[#allocation6 + $0x19b0] sm:$0xff]  ;;  %v4136_v10 = vpack.c.bf16 %v1003_v2, %v995_v1 }
 0x24a   :  { %v1009_v12 = vld [vmem:[#allocation6 + $0x1a28] sm:$0xff]  ;;  %v1066_v1 = vld [vmem:[#allocation6 + $0x1bf0] sm:$0xff] }
 0x24b   :  { %3843 = vmatpush1.bf16.msra.mxu0 %v3842_v21  ;;  %v936_v21 = vld [vmem:[#allocation6 + $0x17e0] sm:$0xff]  ;;  %v1073_v2 = vld [vmem:[#allocation6 + $0x1c28] sm:$0xff] }
 0x24c   :  { %4099 = vmatpush1.bf16.msra.mxu1 %v4098_v22  ;;  %3845 = vmatprep.subr.bf16.mxu0 %v3844_v23  ;;  %v930_v22 = vld [vmem:[#allocation6 + $0x17b0] sm:$0xff]  ;;  %v4120_v23 = vpack.c.bf16 %v939_v16, %v931_v15  ;;  %v3866_v29 = vpack.c.bf16 %v936_v21, %v928_v20  ;;  %v1011_v15 = vld [vmem:[#allocation6 + $0x1a38] sm:$0xff]  ;;  %v1008_v20 = vld [vmem:[#allocation6 + $0x1a20] sm:$0xff] }
 0x24d   :  { %4101 = vmatprep.subr.bf16.mxu1 %v4100_v27  ;;  %v947_v27 = vld [vmem:[#allocation6 + $0x1838] sm:$0xff]  ;;  %v4122_v30 = vpack.c.bf16 %v938_v24, %v930_v22  ;;  %v1016_v21 = vld [vmem:[#allocation6 + $0x1a60] sm:$0xff]  ;;  %v1010_v22 = vld [vmem:[#allocation6 + $0x1a30] sm:$0xff] }
 0x24e   :  { %v1019_v16 = vld [vmem:[#allocation6 + $0x1a78] sm:$0xff]  ;;  %v1018_v24 = vld [vmem:[#allocation6 + $0x1a70] sm:$0xff] }
 0x24f   :  { %3847 = vmatpush1.bf16.msra.mxu0 %v3846_v33  ;;  %v952_v33 = vld [vmem:[#allocation6 + $0x1860] sm:$0xff] }
 0x250   :  { %4103 = vmatpush1.bf16.msra.mxu1 %v4102_v34  ;;  %3849 = vmatprep.subr.bf16.mxu0 %v3848_v35  ;;  %v946_v34 = vld [vmem:[#allocation6 + $0x1830] sm:$0xff]  ;;  %v4124_v35 = vpack.c.bf16 %v955_v28, %v947_v27  ;;  %v3870_v41 = vpack.c.bf16 %v952_v33, %v944_v32  ;;  %v1027_v27 = vld [vmem:[#allocation6 + $0x1ab8] sm:$0xff]  ;;  %v1024_v32 = vld [vmem:[#allocation6 + $0x1aa0] sm:$0xff] }
 0x251   :  { %4105 = vmatprep.subr.bf16.mxu1 %v4104_v39  ;;  %v963_v39 = vld [vmem:[#allocation6 + $0x18b8] sm:$0xff]  ;;  %v4126_v42 = vpack.c.bf16 %v954_v36, %v946_v34  ;;  %v1032_v33 = vld [vmem:[#allocation6 + $0x1ae0] sm:$0xff]  ;;  %v1026_v34 = vld [vmem:[#allocation6 + $0x1ab0] sm:$0xff] }
 0x252   :  { %v1035_v28 = vld [vmem:[#allocation6 + $0x1af8] sm:$0xff]  ;;  %v1034_v36 = vld [vmem:[#allocation6 + $0x1af0] sm:$0xff] }
 0x253   :  { %3851 = vmatpush1.bf16.msra.mxu0 %v3850_v45  ;;  %v968_v45 = vld [vmem:[#allocation6 + $0x18e0] sm:$0xff] }
 0x254   :  { %4107 = vmatpush1.bf16.msra.mxu1 %v4106_v46  ;;  %3853 = vmatprep.subr.bf16.mxu0 %v3852_v47  ;;  %v962_v46 = vld [vmem:[#allocation6 + $0x18b0] sm:$0xff]  ;;  %v4128_v47 = vpack.c.bf16 %v971_v40, %v963_v39  ;;  %v3874_v54 = vpack.c.bf16 %v968_v45, %v960_v44  ;;  %v1043_v39 = vld [vmem:[#allocation6 + $0x1b38] sm:$0xff]  ;;  %v1040_v44 = vld [vmem:[#allocation6 + $0x1b20] sm:$0xff] }
 0x255   :  { %4109 = vmatprep.subr.bf16.mxu1 %v4108_v51  ;;  %v4546_v51 = vld [vmem:[#allocation4 + $0x20] sm:$0xff]  ;;  %v4130_v55 = vpack.c.bf16 %v970_v48, %v962_v46  ;;  %v1051_v40 = vld [vmem:[#allocation6 + $0x1b78] sm:$0xff]  ;;  %v1042_v46 = vld [vmem:[#allocation6 + $0x1b30] sm:$0xff] }
 0x256   :  { %v1048_v45 = vld [vmem:[#allocation6 + $0x1b60] sm:$0xff]  ;;  %v4148_v48 = vpack.c.bf16 %v1051_v40, %v1043_v39  ;;  %v1114_v40 = vld [vmem:[#allocation6 + $0x1d70] sm:$0xff] }
 0x257   :  { %3855 = vmatpush1.bf16.msra.mxu0 %v3854_v57  ;;  %v976_v57 = vld [vmem:[#allocation6 + $0x1920] sm:$0xff] }
 0x258   :  { %4111 = vmatpush1.bf16.msra.mxu1 %v4110_v58  ;;  %3857 = vmatprep.subr.bf16.mxu0 %v3856_v59  ;;  %v984_v58 = vld [vmem:[#allocation6 + $0x1960] sm:$0xff]  ;;  %v978_v59 = vld [vmem:[#allocation6 + $0x1930] sm:$0xff] }
 0x259   :  { %4113 = vmatprep.subr.bf16.mxu1 %v4112_v63  ;;  %v1001_v63 = vld [vmem:[#allocation6 + $0x19e8] sm:$0xff]  ;;  %v3878_v4 = vpack.c.bf16 %v984_v58, %v976_v57  ;;  %v3894_v57 = vpack.c.bf16 %v1048_v45, %v1040_v44  ;;  %v4150_v58 = vpack.c.bf16 %v1050_v49, %v1042_v46  ;;  %v1131_v44 = vld [vmem:[#allocation6 + $0x1df8] sm:$0xff]  ;;  %v1120_v49 = vld [vmem:[#allocation6 + $0x1da0] sm:$0xff] }
 0x25b   :  { %3859 = vmatpush1.bf16.msra.mxu0 %v3858_v5  ;;  %v4134_v5 = vpack.c.bf16 %v986_v61, %v978_v59  ;;  %v1064_v61 = vld [vmem:[#allocation6 + $0x1be0] sm:$0xff] }
 0x25c   :  { %4115 = vmatpush1.bf16.msra.mxu1 %v4114_v6  ;;  %3861 = vmatprep.subr.bf16.mxu0 %v3860_v7  ;;  %v3880_v6 = vpack.c.bf16 %v1001_v63, %v993_v62  ;;  %v992_v7 = vld [vmem:[#allocation6 + $0x19a0] sm:$0xff]  ;;  %v1058_v62 = vld [vmem:[#allocation6 + $0x1bb0] sm:$0xff] }
 0x25d   :  { %4117 = vmatprep.subr.bf16.mxu1 %v4116_v11  ;;  %v1002_v11 = vld [vmem:[#allocation6 + $0x19f0] sm:$0xff] }
 0x25f   :  { %3863 = vmatpush1.bf16.msra.mxu0 %v3862_v17  ;;  %v3882_v17 = vpack.c.bf16 %v1000_v8, %v992_v7  ;;  %v1083_v7 = vld [vmem:[#allocation6 + $0x1c78] sm:$0xff] }
 0x260   :  { %4119 = vmatpush1.bf16.msra.mxu1 %v4118_v18  ;;  %3865 = vmatprep.subr.bf16.mxu0 %v3864_v19  ;;  %v4138_v18 = vpack.c.bf16 %v1002_v11, %v994_v9  ;;  %v3884_v19 = vpack.c.bf16 %v1017_v13, %v1009_v12  ;;  %v1072_v12 = vld [vmem:[#allocation6 + $0x1c20] sm:$0xff] }
 0x261   :  { %4121 = vmatprep.subr.bf16.mxu1 %v4120_v23  ;;  %v4140_v23 = vpack.c.bf16 %v1019_v16, %v1011_v15  ;;  %v1080_v13 = vld [vmem:[#allocation6 + $0x1c60] sm:$0xff]  ;;  %v1082_v16 = vld [vmem:[#allocation6 + $0x1c70] sm:$0xff] }
 0x263   :  { %3867 = vmatpush1.bf16.msra.mxu0 %v3866_v29  ;;  %v3886_v29 = vpack.c.bf16 %v1016_v21, %v1008_v20  ;;  %v1099_v20 = vld [vmem:[#allocation6 + $0x1cf8] sm:$0xff]  ;;  %v3902_v21 = vpack.c.bf16 %v1080_v13, %v1072_v12 }
 0x264   :  { %4123 = vmatpush1.bf16.msra.mxu1 %v4122_v30  ;;  %3869 = vmatprep.subr.bf16.mxu0 %v3868_v31  ;;  %v4142_v30 = vpack.c.bf16 %v1018_v24, %v1010_v22  ;;  %v3888_v31 = vpack.c.bf16 %v1033_v26, %v1025_v25  ;;  %v1088_v24 = vld [vmem:[#allocation6 + $0x1ca0] sm:$0xff]  ;;  %v1090_v26 = vld [vmem:[#allocation6 + $0x1cb0] sm:$0xff]  ;;  %v1163_v12 = vld [vmem:[#allocation6 + $0x1ef8] sm:$0xff] }
 0x265   :  { %4125 = vmatprep.subr.bf16.mxu1 %v4124_v35  ;;  %v4144_v35 = vpack.c.bf16 %v1035_v28, %v1027_v27  ;;  %v1096_v25 = vld [vmem:[#allocation6 + $0x1ce0] sm:$0xff]  ;;  %v1098_v28 = vld [vmem:[#allocation6 + $0x1cf0] sm:$0xff] }
 0x266   :  { %2073 = vmatmul.mubr.f32.vlgmr.msra.gmra.mrb[4].mxu0 %v4546_v51 }
 0x267   :  { %3871 = vmatpush1.bf16.msra.mxu0 %v3870_v41  ;;  %2381 = vmatmul.mubr.f32.vlgmr.msra.gmra.mrb[4].mxu1 %v4546_v51  ;;  %v3890_v41 = vpack.c.bf16 %v1032_v33, %v1024_v32  ;;  %v1065_v51 = vld [vmem:[#allocation6 + $0x1be8] sm:$0xff]  ;;  %v1115_v32 = vld [vmem:[#allocation6 + $0x1d78] sm:$0xff]  ;;  %v3906_v33 = vpack.c.bf16 %v1096_v25, %v1088_v24 }
 0x268   :  { %4127 = vmatpush1.bf16.msra.mxu1 %v4126_v42  ;;  %3873 = vmatprep.subr.bf16.mxu0 %v3872_v43  ;;  %v4146_v42 = vpack.c.bf16 %v1034_v36, %v1026_v34  ;;  %v3892_v43 = vpack.c.bf16 %v1049_v38, %v1041_v37  ;;  %v3896_v59 = vpack.c.bf16 %v1065_v51, %v1057_v50  ;;  %v1104_v36 = vld [vmem:[#allocation6 + $0x1d20] sm:$0xff]  ;;  %v1106_v38 = vld [vmem:[#allocation6 + $0x1d30] sm:$0xff]  ;;  %v1171_v24 = vld [vmem:[#allocation6 + $0x1f38] sm:$0xff] }
 0x269   :  { %4129 = vmatprep.subr.bf16.mxu1 %v4128_v47  ;;  %2078 = vmatprep.mubr.f32.mxu0 %v4547_v0  ;;  %v4162_v34 = vpack.c.bf16 %v1098_v28, %v1090_v26  ;;  %v1112_v37 = vld [vmem:[#allocation6 + $0x1d60] sm:$0xff]  ;;  %v4166_v46 = vpack.c.bf16 %v1114_v40, %v1106_v38  ;;  %v1122_v51 = vld [vmem:[#allocation6 + $0x1db0] sm:$0xff]  ;;  %v1179_v25 = vld [vmem:[#allocation6 + $0x1f78] sm:$0xff] }
 0x26a   :  { %2386 = vmatprep.mubr.f32.mxu1 %v4547_v0  ;;  %2079 = vmatmul.mubr.f32.gmra.mrb[6].mxu0 %v4548_v3  ;;  %v3910_v45 = vpack.c.bf16 %v1112_v37, %v1104_v36  ;;  %v1128_v50 = vld [vmem:[#allocation6 + $0x1de0] sm:$0xff]  ;;  %v1187_v37 = vld [vmem:[#allocation6 + $0x1fb8] sm:$0xff] }
 0x26b   :  { %3875 = vmatpush1.bf16.msra.mxu0 %v3874_v54  ;;  %2387 = vmatmul.mubr.f32.gmra.mrb[6].mxu1 %v4548_v3  ;;  %v1059_v54 = vld [vmem:[#allocation6 + $0x1bb8] sm:$0xff]  ;;  %v1081_v3 = vld [vmem:[#allocation6 + $0x1c68] sm:$0xff] }
 0x26c   :  { %4131 = vmatpush1.bf16.msra.mxu1 %v4130_v55  ;;  %3877 = vmatprep.subr.bf16.mxu0 %v3876_v56  ;;  %v1067_v55 = vld [vmem:[#allocation6 + $0x1bf8] sm:$0xff]  ;;  %v3900_v11 = vpack.c.bf16 %v1081_v3, %v1073_v2  ;;  %v1144_v2 = vld [vmem:[#allocation6 + $0x1e60] sm:$0xff]  ;;  %v1138_v3 = vld [vmem:[#allocation6 + $0x1e30] sm:$0xff] }
 0x26d   :  { %4133 = vmatprep.subr.bf16.mxu1 %v4132_v60  ;;  %2149 = vmatprep.mubr.f32.mxu0 %v4549_v14  ;;  %v1056_v60 = vld [vmem:[#allocation6 + $0x1ba0] sm:$0xff]  ;;  %v4152_v0 = vpack.c.bf16 %v1067_v55, %v1059_v54  ;;  %v1130_v55 = vld [vmem:[#allocation6 + $0x1df0] sm:$0xff]  ;;  %v1195_v38 = vld [vmem:[#allocation6 + $0x1ff8] sm:$0xff] }
 0x26e   :  { %2457 = vmatprep.mubr.f32.mxu1 %v4549_v14  ;;  %v3898_v9 = vpack.c.bf16 %v1064_v61, %v1056_v60  ;;  %v1074_v14 = vld [vmem:[#allocation6 + $0x1c30] sm:$0xff]  ;;  %v1147_v60 = vld [vmem:[#allocation6 + $0x1e78] sm:$0xff]  ;;  %v3914_v61 = vpack.c.bf16 %v1128_v50, %v1120_v49  ;;  %v2489_v49 = vld [vmem:[#allocation9 + $0x18] sm:$0xff] }
 0x26f   :  { %3879 = vmatpush1.bf16.msra.mxu0 %v3878_v4  ;;  %v4158_v22 = vpack.c.bf16 %v1082_v16, %v1074_v14  ;;  %v1152_v16 = vld [vmem:[#allocation6 + $0x1ea0] sm:$0xff] }
 0x270   :  { %4135 = vmatpush1.bf16.msra.mxu1 %v4134_v5  ;;  %3881 = vmatprep.subr.bf16.mxu0 %v3880_v6  ;;  %v1075_v6 = vld [vmem:[#allocation6 + $0x1c38] sm:$0xff] }
 0x271   :  { %4137 = vmatprep.subr.bf16.mxu1 %v4136_v10  ;;  %v4154_v10 = vpack.c.bf16 %v1066_v1, %v1058_v62  ;;  %v4156_v15 = vpack.c.bf16 %v1083_v7, %v1075_v6  ;;  %v4170_v62 = vpack.c.bf16 %v1130_v55, %v1122_v51  ;;  %v1136_v1 = vld [vmem:[#allocation6 + $0x1e20] sm:$0xff]  ;;  %v1146_v7 = vld [vmem:[#allocation6 + $0x1e70] sm:$0xff] }
 0x272   :  { %v3918_v13 = vpack.c.bf16 %v1144_v2, %v1136_v1  ;;  %v4174_v14 = vpack.c.bf16 %v1146_v7, %v1138_v3  ;;  %v4988_v51 = vld [vmem:[#allocation8] sm:$0xff]  ;;  %v2490_v1 = vld [vmem:[#allocation9 + $0x20] sm:$0xff]  ;;  %v2492_v2 = vld [vmem:[#allocation9 + $0x30] sm:$0xff] }
 0x273   :  { %3883 = vmatpush1.bf16.msra.mxu0 %v3882_v17  ;;  %v1089_v17 = vld [vmem:[#allocation6 + $0x1ca8] sm:$0xff]  ;;  %v2497_v7 = vld [vmem:[#allocation9 + $0x58] sm:$0xff] }
 0x274   :  { %4139 = vmatpush1.bf16.msra.mxu1 %v4138_v18  ;;  %3885 = vmatprep.subr.bf16.mxu0 %v3884_v19  ;;  %v1097_v18 = vld [vmem:[#allocation6 + $0x1ce8] sm:$0xff]  ;;  %v1091_v19 = vld [vmem:[#allocation6 + $0x1cb8] sm:$0xff] }
 0x275   :  { %4141 = vmatprep.subr.bf16.mxu1 %v4140_v23  ;;  %v3904_v23 = vpack.c.bf16 %v1097_v18, %v1089_v17  ;;  %v4160_v27 = vpack.c.bf16 %v1099_v20, %v1091_v19  ;;  %v1160_v17 = vld [vmem:[#allocation6 + $0x1ee0] sm:$0xff]  ;;  %v1154_v18 = vld [vmem:[#allocation6 + $0x1eb0] sm:$0xff] }
 0x276   :  { %v1162_v20 = vld [vmem:[#allocation6 + $0x1ef0] sm:$0xff]  ;;  %v3922_v26 = vpack.c.bf16 %v1160_v17, %v1152_v16  ;;  %v2501_v17 = vld [vmem:[#allocation9 + $0x78] sm:$0xff] }
 0x277   :  { %3887 = vmatpush1.bf16.msra.mxu0 %v3886_v29  ;;  %v1105_v29 = vld [vmem:[#allocation6 + $0x1d28] sm:$0xff]  ;;  %v2499_v16 = vld [vmem:[#allocation9 + $0x68] sm:$0xff] }
 0x278   :  { %4143 = vmatpush1.bf16.msra.mxu1 %v4142_v30  ;;  %3889 = vmatprep.subr.bf16.mxu0 %v3888_v31  ;;  %v1113_v30 = vld [vmem:[#allocation6 + $0x1d68] sm:$0xff]  ;;  %v1107_v31 = vld [vmem:[#allocation6 + $0x1d38] sm:$0xff] }
 0x279   :  { %v4967_v47 = vpop.f32.mrb[0].mxu0  ;;  %4145 = vmatprep.subr.bf16.mxu1 %v4144_v35  ;;  %v3908_v35 = vpack.c.bf16 %v1113_v30, %v1105_v29  ;;  %v4164_v39 = vpack.c.bf16 %v1115_v32, %v1107_v31  ;;  %v1168_v29 = vld [vmem:[#allocation6 + $0x1f20] sm:$0xff]  ;;  %v1170_v31 = vld [vmem:[#allocation6 + $0x1f30] sm:$0xff]  ;;  %v4180_v32 = vpack.c.bf16 %v1179_v25, %v1171_v24 }
 0x27a   :  { %v4969_v52 = vpop.f32.mrb[0].mxu1  ;;  %v4971_v53 = vpop.f32.mrb[1].mxu0  ;;  %v1176_v30 = vld [vmem:[#allocation6 + $0x1f60] sm:$0xff] }
 0x27b   :  { %v4973_v56 = vpop.f32.mrb[1].mxu1  ;;  %3891 = vmatpush1.bf16.msra.mxu0 %v3890_v41  ;;  %v1121_v41 = vld [vmem:[#allocation6 + $0x1da8] sm:$0xff] }
 0x27c   :  { %4147 = vmatpush1.bf16.msra.mxu1 %v4146_v42  ;;  %3893 = vmatprep.subr.bf16.mxu0 %v3892_v43  ;;  %v1129_v42 = vld [vmem:[#allocation6 + $0x1de8] sm:$0xff]  ;;  %v1123_v43 = vld [vmem:[#allocation6 + $0x1db8] sm:$0xff] }
 0x27d   :  { %v4975_v63 = vpop.f32.mrb[2].mxu0  ;;  %4149 = vmatprep.subr.bf16.mxu1 %v4148_v48  ;;  %v3912_v48 = vpack.c.bf16 %v1129_v42, %v1121_v41  ;;  %v4168_v54 = vpack.c.bf16 %v1131_v44, %v1123_v43  ;;  %v1184_v42 = vld [vmem:[#allocation6 + $0x1fa0] sm:$0xff]  ;;  %v1186_v44 = vld [vmem:[#allocation6 + $0x1fb0] sm:$0xff] }
 0x27e   :  { %v4977_v4 = vpop.f32.mrb[2].mxu1  ;;  %v4979_v5 = vpop.f32.mrb[3].mxu0  ;;  %v1192_v43 = vld [vmem:[#allocation6 + $0x1fe0] sm:$0xff] }
 0x27f   :  { %v4981_v8 = vpop.f32.mrb[3].mxu1  ;;  %3895 = vmatpush1.bf16.msra.mxu0 %v3894_v57  ;;  %v1137_v57 = vld [vmem:[#allocation6 + $0x1e28] sm:$0xff] }
 0x280   :  { %4151 = vmatpush1.bf16.msra.mxu1 %v4150_v58  ;;  %3897 = vmatprep.subr.bf16.mxu0 %v3896_v59  ;;  %v1145_v58 = vld [vmem:[#allocation6 + $0x1e68] sm:$0xff]  ;;  %v1139_v59 = vld [vmem:[#allocation6 + $0x1e38] sm:$0xff] }
 0x281   :  { %4153 = vmatprep.subr.bf16.mxu1 %v4152_v0  ;;  %v3916_v0 = vpack.c.bf16 %v1145_v58, %v1137_v57  ;;  %v4172_v6 = vpack.c.bf16 %v1147_v60, %v1139_v59  ;;  %v2486_v58 = vld [vmem:[#allocation9] sm:$0xff]  ;;  %v2488_v59 = vld [vmem:[#allocation9 + $0x10] sm:$0xff] }
 0x283   :  { %3899 = vmatpush1.bf16.msra.mxu0 %v3898_v9  ;;  %v1153_v9 = vld [vmem:[#allocation6 + $0x1ea8] sm:$0xff] }
 0x284   :  { %4155 = vmatpush1.bf16.msra.mxu1 %v4154_v10  ;;  %3901 = vmatprep.subr.bf16.mxu0 %v3900_v11  ;;  %v1161_v10 = vld [vmem:[#allocation6 + $0x1ee8] sm:$0xff]  ;;  %v1155_v11 = vld [vmem:[#allocation6 + $0x1eb8] sm:$0xff] }
 0x285   :  { %4157 = vmatprep.subr.bf16.mxu1 %v4156_v15  ;;  %v3920_v15 = vpack.c.bf16 %v1161_v10, %v1153_v9  ;;  %v4176_v19 = vpack.c.bf16 %v1163_v12, %v1155_v11  ;;  %v4550_v10 = vld [vmem:[#allocation4 + $0x30] sm:$0xff]  ;;  %v4194_v11 = vpack.c.bf16 %v2492_v2, %v2490_v1  ;;  %v4551_v12 = vld [vmem:[#allocation4 + $0x78] sm:$0xff] }
 0x286   :  { %v2508_v2 = vld [vmem:[#allocation9 + $0xb0] sm:$0xff] }
 0x287   :  { %3903 = vmatpush1.bf16.msra.mxu0 %v3902_v21  ;;  %v1169_v21 = vld [vmem:[#allocation6 + $0x1f28] sm:$0xff] }
 0x288   :  { %4159 = vmatpush1.bf16.msra.mxu1 %v4158_v22  ;;  %3905 = vmatprep.subr.bf16.mxu0 %v3904_v23  ;;  %v1177_v22 = vld [vmem:[#allocation6 + $0x1f68] sm:$0xff]  ;;  %v1198_v23 = vlaneseq }
 0x289   :  { %4161 = vmatprep.subr.bf16.mxu1 %v4160_v27  ;;  %v4178_v27 = vpack.c.bf16 %v1162_v20, %v1154_v18  ;;  %v3924_v28 = vpack.c.bf16 %v1177_v22, %v1169_v21  ;;  %v2498_v20 = vld [vmem:[#allocation9 + $0x60] sm:$0xff]  ;;  %v2500_v21 = vld [vmem:[#allocation9 + $0x70] sm:$0xff] }
 0x28a   :  { %v4983_v36 = vshrl.u32 %v1198_v23, 7  ;;  %v2787_v22 = vld [vmem:[#allocation12 + $0x18] sm:$0xff]  ;;  %v2784_v23 = vld [vmem:[#allocation12] sm:$0xff] }
 0x28b   :  { %3907 = vmatpush1.bf16.msra.mxu0 %v3906_v33  ;;  %v1178_v33 = vld [vmem:[#allocation6 + $0x1f70] sm:$0xff] }
 0x28c   :  { %4163 = vmatpush1.bf16.msra.mxu1 %v4162_v34  ;;  %3909 = vmatprep.subr.bf16.mxu0 %v3908_v35  ;;  %v1185_v34 = vld [vmem:[#allocation6 + $0x1fa8] sm:$0xff]  ;;  %v4182_v40 = vpack.c.bf16 %v1178_v33, %v1170_v31  ;;  %v4986_v50 = vsub.s32 1, %v4983_v36  ;;  %v2790_v33 = vld [vmem:[#allocation12 + $0x30] sm:$0xff] }
 0x28d   :  { %4165 = vmatprep.subr.bf16.mxu1 %v4164_v39  ;;  %v1193_v35 = vld [vmem:[#allocation6 + $0x1fe8] sm:$0xff]  ;;  %v3926_v39 = vpack.c.bf16 %v1176_v30, %v1168_v29  ;;  %v4200_v29 = vpack.c.bf16 %v2501_v17, %v2499_v16  ;;  %v2512_v17 = vld [vmem:[#allocation9 + $0xd0] sm:$0xff] }
 0x28e   :  { %v3928_v41 = vpack.c.bf16 %v1193_v35, %v1185_v34  ;;  %v4992_v60 = vrot.slane %v4988_v51, %v4986_v50  ;;  %v2793_v34 = vld [vmem:[#allocation12 + $0x48] sm:$0xff] }
 0x28f   :  { %3911 = vmatpush1.bf16.msra.mxu0 %v3910_v45  ;;  %v4184_v45 = vpack.c.bf16 %v1195_v38, %v1187_v37  ;;  %v2503_v35 = vld [vmem:[#allocation9 + $0x88] sm:$0xff]  ;;  %v2505_v37 = vld [vmem:[#allocation9 + $0x98] sm:$0xff] }
 0x290   :  { %4167 = vmatpush1.bf16.msra.mxu1 %v4166_v46  ;;  %3913 = vmatprep.subr.bf16.mxu0 %v3912_v48  ;;  %v1194_v46 = vld [vmem:[#allocation6 + $0x1ff0] sm:$0xff]  ;;  %v4445_v9 = vadd.f32 %v4971_v53, %v4992_v60  ;;  %v2795_v38 = vld [vmem:[#allocation12 + $0x58] sm:$0xff] }
 0x291   :  { %4169 = vmatprep.subr.bf16.mxu1 %v4168_v54  ;;  %v2487_v48 = vld [vmem:[#allocation9 + $0x8] sm:$0xff]  ;;  %v3930_v54 = vpack.c.bf16 %v1192_v43, %v1184_v42  ;;  %v4186_v55 = vpack.c.bf16 %v1194_v46, %v1186_v44  ;;  %v4324_v42 = vpack.c.bf16 %v2795_v38, %v2793_v34  ;;  %v2794_v44 = vld [vmem:[#allocation12 + $0x50] sm:$0xff] }
 0x292   :  { %v4188_v57 = vpack.c.bf16 %v2489_v49, %v2487_v48  ;;  %v2471_v18 = vmax.f32 %v4445_v9, 0.0  ;;  %v2785_v53 = vld [vmem:[#allocation12 + $0x8] sm:$0xff]  ;;  %v2792_v43 = vld [vmem:[#allocation12 + $0x40] sm:$0xff]  ;;  %v2799_v49 = vld [vmem:[#allocation12 + $0x78] sm:$0xff] }
 0x293   :  { %3915 = vmatpush1.bf16.msra.mxu0 %v3914_v61  ;;  %v2491_v61 = vld [vmem:[#allocation9 + $0x28] sm:$0xff]  ;;  %v4316_v25 = vpack.c.bf16 %v2787_v22, %v2785_v53  ;;  %v2504_v46 = vld [vmem:[#allocation9 + $0x90] sm:$0xff]  ;;  %v2513_v9 = vld [vmem:[#allocation9 + $0xd8] sm:$0xff] }
 0x294   :  { %4171 = vmatpush1.bf16.msra.mxu1 %v4170_v62  ;;  %3917 = vmatprep.subr.bf16.mxu0 %v3916_v0  ;;  %v2493_v62 = vld [vmem:[#allocation9 + $0x38] sm:$0xff]  ;;  %v4190_v0 = vpack.c.bf16 %v2488_v59, %v2486_v58  ;;  %v2797_v48 = vld [vmem:[#allocation12 + $0x68] sm:$0xff]  ;;  %v2506_v59 = vld [vmem:[#allocation9 + $0xa0] sm:$0xff] }
 0x295   :  { %4173 = vmatprep.subr.bf16.mxu1 %v4172_v6  ;;  %v4192_v3 = vpack.c.bf16 %v2493_v62, %v2491_v61  ;;  %v2495_v6 = vld [vmem:[#allocation9 + $0x48] sm:$0xff]  ;;  %v4328_v61 = vpack.c.bf16 %v2799_v49, %v2797_v48  ;;  %v2522_v49 = vld [vmem:[#allocation9 + $0x120] sm:$0xff] }
 0x296   :  { %v2796_v62 = vld [vmem:[#allocation12 + $0x60] sm:$0xff] }
 0x297   :  { %3919 = vmatpush1.bf16.msra.mxu0 %v3918_v13  ;;  %v4196_v13 = vpack.c.bf16 %v2497_v7, %v2495_v6  ;;  %v2803_v6 = vld [vmem:[#allocation12 + $0x98] sm:$0xff]  ;;  %v2511_v7 = vld [vmem:[#allocation9 + $0xc8] sm:$0xff] }
 0x298   :  { %4175 = vmatpush1.bf16.msra.mxu1 %v4174_v14  ;;  %3921 = vmatprep.subr.bf16.mxu0 %v3920_v15  ;;  %v2494_v14 = vld [vmem:[#allocation9 + $0x40] sm:$0xff]  ;;  %v2496_v15 = vld [vmem:[#allocation9 + $0x50] sm:$0xff]  ;;  %v4212_v16 = vpack.c.bf16 %v2513_v9, %v2511_v7 }
 0x299   :  { %4177 = vmatprep.subr.bf16.mxu1 %v4176_v19  ;;  %v4552_v19 = vld [vmem:[#allocation4 + $0x70] sm:$0xff]  ;;  %v4198_v24 = vpack.c.bf16 %v2496_v15, %v2494_v14  ;;  %v2802_v15 = vld [vmem:[#allocation12 + $0x90] sm:$0xff] }
 0x29a   :  { %v2800_v14 = vld [vmem:[#allocation12 + $0x80] sm:$0xff] }
 0x29b   :  { %3923 = vmatpush1.bf16.msra.mxu0 %v3922_v26  ;;  %v2786_v26 = vld [vmem:[#allocation12 + $0x10] sm:$0xff]  ;;  %v4334_v53 = vpack.c.bf16 %v2802_v15, %v2800_v14  ;;  %v2808_v38 = vld [vmem:[#allocation12 + $0xc0] sm:$0xff]  ;;  %v2823_v14 = vld [vmem:[#allocation12 + $0x138] sm:$0xff] }
 0x29c   :  { %4179 = vmatpush1.bf16.msra.mxu1 %v4178_v27  ;;  %3925 = vmatprep.subr.bf16.mxu0 %v3924_v28  ;;  %v2789_v27 = vld [vmem:[#allocation12 + $0x28] sm:$0xff]  ;;  %v2791_v28 = vld [vmem:[#allocation12 + $0x38] sm:$0xff]  ;;  %v4318_v30 = vpack.c.bf16 %v2786_v26, %v2784_v23  ;;  %v2806_v26 = vld [vmem:[#allocation12 + $0xb0] sm:$0xff] }
 0x29d   :  { %4181 = vmatprep.subr.bf16.mxu1 %v4180_v32  ;;  %v4320_v31 = vpack.c.bf16 %v2791_v28, %v2789_v27  ;;  %v2788_v32 = vld [vmem:[#allocation12 + $0x20] sm:$0xff]  ;;  %v2516_v28 = vld [vmem:[#allocation9 + $0xf0] sm:$0xff] }
 0x29e   :  { %v2514_v23 = vld [vmem:[#allocation9 + $0xe0] sm:$0xff]  ;;  %v2531_v15 = vld [vmem:[#allocation9 + $0x168] sm:$0xff] }
 0x29f   :  { %3927 = vmatpush1.bf16.msra.mxu0 %v3926_v39  ;;  %v4322_v39 = vpack.c.bf16 %v2790_v33, %v2788_v32  ;;  %v2521_v32 = vld [vmem:[#allocation9 + $0x118] sm:$0xff]  ;;  %v4218_v34 = vpack.c.bf16 %v2516_v28, %v2514_v23  ;;  %v2816_v9 = vld [vmem:[#allocation12 + $0x100] sm:$0xff]  ;;  %v2532_v23 = vld [vmem:[#allocation9 + $0x170] sm:$0xff] }
 0x2a0   :  { %4183 = vmatpush1.bf16.msra.mxu1 %v4182_v40  ;;  %3929 = vmatprep.subr.bf16.mxu0 %v3928_v41  ;;  %v4202_v40 = vpack.c.bf16 %v2500_v21, %v2498_v20  ;;  %v2502_v41 = vld [vmem:[#allocation9 + $0x80] sm:$0xff]  ;;  %v2515_v20 = vld [vmem:[#allocation9 + $0xe8] sm:$0xff]  ;;  %v2517_v21 = vld [vmem:[#allocation9 + $0xf8] sm:$0xff] }
 0x2a1   :  { %4185 = vmatprep.subr.bf16.mxu1 %v4184_v45  ;;  %v4204_v45 = vpack.c.bf16 %v2505_v37, %v2503_v35  ;;  %v4206_v58 = vpack.c.bf16 %v2504_v46, %v2502_v41  ;;  %v4216_v27 = vpack.c.bf16 %v2517_v21, %v2515_v20  ;;  %v2518_v35 = vld [vmem:[#allocation9 + $0x100] sm:$0xff]  ;;  %v2520_v41 = vld [vmem:[#allocation9 + $0x110] sm:$0xff] }
 0x2a2   :  { %v4222_v48 = vpack.c.bf16 %v2520_v41, %v2518_v35  ;;  %v2820_v21 = vld [vmem:[#allocation12 + $0x120] sm:$0xff]  ;;  %v2536_v35 = vld [vmem:[#allocation9 + $0x190] sm:$0xff] }
 0x2a3   :  { %3931 = vmatpush1.bf16.msra.mxu0 %v3930_v54  ;;  %v2507_v54 = vld [vmem:[#allocation9 + $0xa8] sm:$0xff] }
 0x2a4   :  { %4187 = vmatpush1.bf16.msra.mxu1 %v4186_v55  ;;  %4189 = vmatprep.subr.bf16.mxu0 %v4188_v57  ;;  %v2509_v55 = vld [vmem:[#allocation9 + $0xb8] sm:$0xff]  ;;  %v4326_v57 = vpack.c.bf16 %v2794_v44, %v2792_v43  ;;  %v2523_v44 = vld [vmem:[#allocation9 + $0x128] sm:$0xff] }
 0x2a5   :  { %4317 = vmatprep.subr.bf16.mxu1 %v4316_v25  ;;  %v4208_v1 = vpack.c.bf16 %v2509_v55, %v2507_v54  ;;  %v2804_v25 = vld [vmem:[#allocation12 + $0xa0] sm:$0xff]  ;;  %v2815_v43 = vld [vmem:[#allocation12 + $0xf8] sm:$0xff] }
 0x2a6   :  { %2150 = vmatmul.mubr.f32.vlgmr.msra.gmra.mrb[4].mxu0 %v4550_v10  ;;  %v4338_v33 = vpack.c.bf16 %v2806_v26, %v2804_v25  ;;  %v2812_v55 = vld [vmem:[#allocation12 + $0xe0] sm:$0xff]  ;;  %v2827_v25 = vld [vmem:[#allocation12 + $0x158] sm:$0xff] }
 0x2a7   :  { %2458 = vmatmul.mubr.f32.vlgmr.msra.gmra.mrb[4].mxu1 %v4550_v10  ;;  %4191 = vmatpush1.bf16.msra.mxu0 %v4190_v0  ;;  %v2798_v0 = vld [vmem:[#allocation12 + $0x70] sm:$0xff]  ;;  %v2535_v26 = vld [vmem:[#allocation9 + $0x188] sm:$0xff] }
 0x2a8   :  { %2155 = vmatprep.mubr.f32.mxu0 %v4551_v12  ;;  %2463 = vmatprep.mubr.f32.mxu1 %v4551_v12  ;;  %v4330_v10 = vpack.c.bf16 %v2798_v0, %v2796_v62  ;;  %v2510_v12 = vld [vmem:[#allocation9 + $0xc0] sm:$0xff]  ;;  %v2527_v0 = vld [vmem:[#allocation9 + $0x148] sm:$0xff] }
 0x2a9   :  { %4193 = vmatprep.subr.bf16.mxu0 %v4192_v3  ;;  %4319 = vmatpush1.bf16.msra.mxu1 %v4318_v30  ;;  %v2801_v3 = vld [vmem:[#allocation12 + $0x88] sm:$0xff]  ;;  %v4214_v22 = vpack.c.bf16 %v2512_v17, %v2510_v12  ;;  %v2811_v30 = vld [vmem:[#allocation12 + $0xd8] sm:$0xff] }
 0x2aa   :  { %2156 = vmatmul.mubr.f32.gmra.mrb[6].mxu0 %v4552_v19  ;;  %4321 = vmatprep.subr.bf16.mxu1 %v4320_v31  ;;  %v2519_v31 = vld [vmem:[#allocation9 + $0x108] sm:$0xff]  ;;  %v2819_v62 = vld [vmem:[#allocation12 + $0x118] sm:$0xff]  ;;  %v2528_v12 = vld [vmem:[#allocation9 + $0x150] sm:$0xff] }
 0x2ab   :  { %2464 = vmatmul.mubr.f32.gmra.mrb[6].mxu1 %v4552_v19  ;;  %4195 = vmatpush1.bf16.msra.mxu0 %v4194_v11  ;;  %v4210_v11 = vpack.c.bf16 %v2508_v2, %v2506_v59  ;;  %v2807_v19 = vld [vmem:[#allocation12 + $0xb8] sm:$0xff]  ;;  %v2524_v59 = vld [vmem:[#allocation9 + $0x130] sm:$0xff] }
 0x2ac   :  { %2690 = vmatprep.mubr.f32.mxu0 %v2471_v18  ;;  %4197 = vmatprep.subr.bf16.mxu0 %v4196_v13  ;;  %v4332_v13 = vpack.c.bf16 %v2803_v6, %v2801_v3  ;;  %v2805_v18 = vld [vmem:[#allocation12 + $0xa8] sm:$0xff]  ;;  %v4226_v3 = vpack.c.bf16 %v2524_v59, %v2522_v49  ;;  %v2526_v6 = vld [vmem:[#allocation9 + $0x140] sm:$0xff] }
 0x2ad   :  { %4323 = vmatpush1.bf16.msra.mxu1 %v4322_v39  ;;  %v2810_v39 = vld [vmem:[#allocation12 + $0xd0] sm:$0xff] }
 0x2ae   :  { %4325 = vmatprep.subr.bf16.mxu1 %v4324_v42  ;;  %v2813_v42 = vld [vmem:[#allocation12 + $0xe8] sm:$0xff]  ;;  %v4342_v46 = vpack.c.bf16 %v2810_v39, %v2808_v38  ;;  %v2831_v38 = vld [vmem:[#allocation12 + $0x178] sm:$0xff] }
 0x2af   :  { %4199 = vmatpush1.bf16.msra.mxu0 %v4198_v24  ;;  %v4336_v24 = vpack.c.bf16 %v2807_v19, %v2805_v18  ;;  %v4344_v54 = vpack.c.bf16 %v2815_v43, %v2813_v42  ;;  %v4230_v18 = vpack.c.bf16 %v2528_v12, %v2526_v6  ;;  %v2530_v19 = vld [vmem:[#allocation9 + $0x160] sm:$0xff]  ;;  %v2539_v39 = vld [vmem:[#allocation9 + $0x1a8] sm:$0xff]  ;;  %v2540_v49 = vld [vmem:[#allocation9 + $0x1b0] sm:$0xff] }
 0x2b0   :  { %4201 = vmatprep.subr.bf16.mxu0 %v4200_v29  ;;  %v2809_v29 = vld [vmem:[#allocation12 + $0xc8] sm:$0xff]  ;;  %v2538_v43 = vld [vmem:[#allocation9 + $0x1a0] sm:$0xff]  ;;  %v2549_v12 = vld [vmem:[#allocation9 + $0x1f8] sm:$0xff] }
 0x2b1   :  { %4327 = vmatpush1.bf16.msra.mxu1 %v4326_v57  ;;  %v4340_v37 = vpack.c.bf16 %v2811_v30, %v2809_v29  ;;  %v2814_v57 = vld [vmem:[#allocation12 + $0xf0] sm:$0xff]  ;;  %v4234_v29 = vpack.c.bf16 %v2532_v23, %v2530_v19  ;;  %v2534_v30 = vld [vmem:[#allocation9 + $0x180] sm:$0xff]  ;;  %v1212_v23 = vsub.s32 3, %v4983_v36 }
 0x2b2   :  { %4329 = vmatprep.subr.bf16.mxu1 %v4328_v61  ;;  %v2817_v61 = vld [vmem:[#allocation12 + $0x108] sm:$0xff]  ;;  %v4346_v2 = vpack.c.bf16 %v2814_v57, %v2812_v55  ;;  %v4238_v42 = vpack.c.bf16 %v2536_v35, %v2534_v30  ;;  %v2835_v55 = vld [vmem:[#allocation12 + $0x198] sm:$0xff]  ;;  %v2842_v30 = vld [vmem:[#allocation12 + $0x1d0] sm:$0xff] }
 0x2b3   :  { %4203 = vmatpush1.bf16.msra.mxu0 %v4202_v40  ;;  %v4220_v40 = vpack.c.bf16 %v2521_v32, %v2519_v31  ;;  %v4348_v7 = vpack.c.bf16 %v2819_v62, %v2817_v61  ;;  %v2824_v32 = vld [vmem:[#allocation12 + $0x140] sm:$0xff]  ;;  %v4242_v61 = vpack.c.bf16 %v2540_v49, %v2538_v43  ;;  %v5004_v35 = vrot.slane %v4988_v51, %v1212_v23 }
 0x2b4   :  { %4205 = vmatprep.subr.bf16.mxu0 %v4204_v45  ;;  %v2525_v45 = vld [vmem:[#allocation9 + $0x138] sm:$0xff]  ;;  %v2543_v57 = vld [vmem:[#allocation9 + $0x1c8] sm:$0xff]  ;;  %v2542_v62 = vld [vmem:[#allocation9 + $0x1c0] sm:$0xff] }
 0x2b5   :  { %4331 = vmatpush1.bf16.msra.mxu1 %v4330_v10  ;;  %v2818_v10 = vld [vmem:[#allocation12 + $0x110] sm:$0xff]  ;;  %v2559_v49 = vld [vmem:[#allocation9 + $0x248] sm:$0xff] }
 0x2b6   :  { %4333 = vmatprep.subr.bf16.mxu1 %v4332_v13  ;;  %v2821_v13 = vld [vmem:[#allocation12 + $0x128] sm:$0xff]  ;;  %v4350_v17 = vpack.c.bf16 %v2818_v10, %v2816_v9  ;;  %v2839_v10 = vld [vmem:[#allocation12 + $0x1b8] sm:$0xff] }
 0x2b7   :  { %4207 = vmatpush1.bf16.msra.mxu0 %v4206_v58  ;;  %v4224_v58 = vpack.c.bf16 %v2525_v45, %v2523_v44  ;;  %v4352_v20 = vpack.c.bf16 %v2823_v14, %v2821_v13  ;;  %v2828_v45 = vld [vmem:[#allocation12 + $0x160] sm:$0xff]  ;;  %v2837_v9 = vld [vmem:[#allocation12 + $0x1a8] sm:$0xff] }
 0x2b8   :  { %4209 = vmatprep.subr.bf16.mxu0 %v4208_v1  ;;  %v2529_v1 = vld [vmem:[#allocation9 + $0x158] sm:$0xff]  ;;  %v2579_v23 = vld [vmem:[#allocation9 + $0x2e8] sm:$0xff] }
 0x2b9   :  { %4335 = vmatpush1.bf16.msra.mxu1 %v4334_v53  ;;  %v2822_v53 = vld [vmem:[#allocation12 + $0x130] sm:$0xff] }
 0x2ba   :  { %4337 = vmatprep.subr.bf16.mxu1 %v4336_v24  ;;  %v2825_v24 = vld [vmem:[#allocation12 + $0x148] sm:$0xff]  ;;  %v4354_v28 = vpack.c.bf16 %v2822_v53, %v2820_v21 }
 0x2bb   :  { %4211 = vmatpush1.bf16.msra.mxu0 %v4210_v11  ;;  %v4228_v11 = vpack.c.bf16 %v2529_v1, %v2527_v0  ;;  %v4356_v31 = vpack.c.bf16 %v2827_v25, %v2825_v24  ;;  %v2832_v1 = vld [vmem:[#allocation12 + $0x180] sm:$0xff]  ;;  %v2548_v21 = vld [vmem:[#allocation9 + $0x1f0] sm:$0xff]  ;;  %v2553_v25 = vld [vmem:[#allocation9 + $0x218] sm:$0xff] }
 0x2bc   :  { %4213 = vmatprep.subr.bf16.mxu0 %v4212_v16  ;;  %v2533_v16 = vld [vmem:[#allocation9 + $0x178] sm:$0xff]  ;;  %v2841_v53 = vld [vmem:[#allocation12 + $0x1c8] sm:$0xff] }
 0x2bd   :  { %4339 = vmatpush1.bf16.msra.mxu1 %v4338_v33  ;;  %v2826_v33 = vld [vmem:[#allocation12 + $0x150] sm:$0xff]  ;;  %v2551_v24 = vld [vmem:[#allocation9 + $0x208] sm:$0xff] }
 0x2be   :  { %4341 = vmatprep.subr.bf16.mxu1 %v4340_v37  ;;  %v2829_v37 = vld [vmem:[#allocation12 + $0x168] sm:$0xff]  ;;  %v4358_v41 = vpack.c.bf16 %v2826_v33, %v2824_v32  ;;  %v4252_v32 = vpack.c.bf16 %v2553_v25, %v2551_v24  ;;  %v2550_v33 = vld [vmem:[#allocation9 + $0x200] sm:$0xff]  ;;  %v2581_v24 = vld [vmem:[#allocation9 + $0x2f8] sm:$0xff] }
 0x2bf   :  { %4215 = vmatpush1.bf16.msra.mxu0 %v4214_v22  ;;  %v4232_v22 = vpack.c.bf16 %v2533_v16, %v2531_v15  ;;  %v4360_v44 = vpack.c.bf16 %v2831_v38, %v2829_v37  ;;  %v2546_v15 = vld [vmem:[#allocation9 + $0x1e0] sm:$0xff]  ;;  %v4368_v16 = vpack.c.bf16 %v2839_v10, %v2837_v9  ;;  %v4447_v37 = vadd.f32 %v4979_v5, %v4992_v60  ;;  %v2555_v38 = vld [vmem:[#allocation9 + $0x228] sm:$0xff]  ;;  %v2561_v5 = vld [vmem:[#allocation9 + $0x258] sm:$0xff] }
 0x2c0   :  { %4217 = vmatprep.subr.bf16.mxu0 %v4216_v27  ;;  %v2537_v27 = vld [vmem:[#allocation9 + $0x198] sm:$0xff]  ;;  %v2566_v10 = vld [vmem:[#allocation9 + $0x280] sm:$0xff]  ;;  %v2845_v25 = vld [vmem:[#allocation12 + $0x1e8] sm:$0xff] }
 0x2c1   :  { %4343 = vmatpush1.bf16.msra.mxu1 %v4342_v46  ;;  %v2830_v46 = vld [vmem:[#allocation12 + $0x170] sm:$0xff] }
 0x2c2   :  { %4345 = vmatprep.subr.bf16.mxu1 %v4344_v54  ;;  %v2833_v54 = vld [vmem:[#allocation12 + $0x188] sm:$0xff]  ;;  %v4362_v59 = vpack.c.bf16 %v2830_v46, %v2828_v45  ;;  %v4449_v46 = vadd.f32 %v4973_v56, %v5004_v35 }
 0x2c3   :  { %4219 = vmatpush1.bf16.msra.mxu0 %v4218_v34  ;;  %v4236_v34 = vpack.c.bf16 %v2537_v27, %v2535_v26  ;;  %v4364_v0 = vpack.c.bf16 %v2835_v55, %v2833_v54  ;;  %v4250_v27 = vpack.c.bf16 %v2548_v21, %v2546_v15  ;;  %v2556_v45 = vld [vmem:[#allocation9 + $0x230] sm:$0xff]  ;;  %v4260_v55 = vpack.c.bf16 %v2561_v5, %v2559_v49  ;;  %v2586_v5 = vld [vmem:[#allocation9 + $0x320] sm:$0xff] }
 0x2c4   :  { %4221 = vmatprep.subr.bf16.mxu0 %v4220_v40  ;;  %v2541_v40 = vld [vmem:[#allocation9 + $0x1b8] sm:$0xff] }
 0x2c5   :  { %4347 = vmatpush1.bf16.msra.mxu1 %v4346_v2  ;;  %v2834_v2 = vld [vmem:[#allocation12 + $0x190] sm:$0xff] }
 0x2c6   :  { %4349 = vmatprep.subr.bf16.mxu1 %v4348_v7  ;;  %v2544_v7 = vld [vmem:[#allocation9 + $0x1d0] sm:$0xff]  ;;  %v4366_v13 = vpack.c.bf16 %v2834_v2, %v2832_v1  ;;  %v2567_v2 = vld [vmem:[#allocation9 + $0x288] sm:$0xff] }
 0x2c7   :  { %4223 = vmatpush1.bf16.msra.mxu0 %v4222_v48  ;;  %v4240_v48 = vpack.c.bf16 %v2541_v40, %v2539_v39  ;;  %v4246_v14 = vpack.c.bf16 %v2544_v7, %v2542_v62  ;;  %v2557_v39 = vld [vmem:[#allocation9 + $0x238] sm:$0xff]  ;;  %v2564_v1 = vld [vmem:[#allocation9 + $0x270] sm:$0xff] }
 0x2c8   :  { %4225 = vmatprep.subr.bf16.mxu0 %v4224_v58  ;;  %v2545_v58 = vld [vmem:[#allocation9 + $0x1d8] sm:$0xff]  ;;  %v4256_v43 = vpack.c.bf16 %v2557_v39, %v2555_v38  ;;  %v2849_v39 = vld [vmem:[#allocation12 + $0x208] sm:$0xff] }
 0x2c9   :  { %4351 = vmatpush1.bf16.msra.mxu1 %v4350_v17  ;;  %v4244_v6 = vpack.c.bf16 %v2545_v58, %v2543_v57  ;;  %v2836_v17 = vld [vmem:[#allocation12 + $0x1a0] sm:$0xff]  ;;  %v2473_v58 = vmax.f32 %v4449_v46, 0.0  ;;  %v2585_v38 = vld [vmem:[#allocation9 + $0x318] sm:$0xff] }
 0x2ca   :  { %4353 = vmatprep.subr.bf16.mxu1 %v4352_v20  ;;  %v2558_v57 = vld [vmem:[#allocation9 + $0x240] sm:$0xff]  ;;  %v2589_v46 = vld [vmem:[#allocation9 + $0x338] sm:$0xff] }
 0x2cb   :  { %4227 = vmatpush1.bf16.msra.mxu0 %v4226_v3  ;;  %v4997_v3 = vsub.s32 0, %v4983_v36 }
 0x2cc   :  { %4229 = vmatprep.subr.bf16.mxu0 %v4228_v11  ;;  %v2547_v11 = vld [vmem:[#allocation9 + $0x1e8] sm:$0xff] }
 0x2cd   :  { %4355 = vmatpush1.bf16.msra.mxu1 %v4354_v28  ;;  %v1201_v19 = vrot.slane %v4988_v51, %v4997_v3  ;;  %v4248_v20 = vpack.c.bf16 %v2549_v12, %v2547_v11  ;;  %v2568_v11 = vld [vmem:[#allocation9 + $0x290] sm:$0xff]  ;;  %v2571_v12 = vld [vmem:[#allocation9 + $0x2a8] sm:$0xff] }
 0x2ce   :  { %4357 = vmatprep.subr.bf16.mxu1 %v4356_v31 }
 0x2cf   :  { %4231 = vmatpush1.bf16.msra.mxu0 %v4230_v18  ;;  %v2838_v18 = vld [vmem:[#allocation12 + $0x1b0] sm:$0xff]  ;;  %v4444_v31 = vadd.f32 %v4967_v47, %v1201_v19  ;;  %v4446_v47 = vadd.f32 %v4975_v63, %v1201_v19 }
 0x2d0   :  { %4233 = vmatprep.subr.bf16.mxu0 %v4232_v22  ;;  %v2843_v22 = vld [vmem:[#allocation12 + $0x1d8] sm:$0xff]  ;;  %v4370_v26 = vpack.c.bf16 %v2838_v18, %v2836_v17  ;;  %v2560_v63 = vld [vmem:[#allocation9 + $0x250] sm:$0xff]  ;;  %v2575_v18 = vld [vmem:[#allocation9 + $0x2c8] sm:$0xff] }
 0x2d1   :  { %4359 = vmatpush1.bf16.msra.mxu1 %v4358_v41  ;;  %v4372_v28 = vpack.c.bf16 %v2843_v22, %v2841_v53  ;;  %v2478_v54 = vmax.f32 %v4446_v47, 0.0  ;;  %v4262_v56 = vpack.c.bf16 %v2560_v63, %v2558_v57  ;;  %v2572_v17 = vld [vmem:[#allocation9 + $0x2b0] sm:$0xff]  ;;  %v2577_v19 = vld [vmem:[#allocation9 + $0x2d8] sm:$0xff]  ;;  %v2574_v53 = vld [vmem:[#allocation9 + $0x2c0] sm:$0xff] }
 0x2d2   :  { %4361 = vmatprep.subr.bf16.mxu1 %v4360_v44  ;;  %v2554_v44 = vld [vmem:[#allocation9 + $0x220] sm:$0xff]  ;;  %v4276_v21 = vpack.c.bf16 %v2577_v19, %v2575_v18  ;;  %v2576_v22 = vld [vmem:[#allocation9 + $0x2d0] sm:$0xff]  ;;  %v2607_v19 = vld [vmem:[#allocation9 + $0x3c8] sm:$0xff] }
 0x2d3   :  { %4235 = vmatpush1.bf16.msra.mxu0 %v4234_v29  ;;  %v2840_v29 = vld [vmem:[#allocation12 + $0x1c0] sm:$0xff]  ;;  %v4258_v60 = vpack.c.bf16 %v2556_v45, %v2554_v44  ;;  %v2584_v44 = vld [vmem:[#allocation9 + $0x310] sm:$0xff] }
 0x2d4   :  { %4237 = vmatprep.subr.bf16.mxu0 %v4236_v34  ;;  %v2552_v34 = vld [vmem:[#allocation9 + $0x210] sm:$0xff]  ;;  %v4374_v40 = vpack.c.bf16 %v2842_v30, %v2840_v29  ;;  %v4278_v30 = vpack.c.bf16 %v2576_v22, %v2574_v53  ;;  %v2587_v45 = vld [vmem:[#allocation9 + $0x328] sm:$0xff]  ;;  %v1208_v53 = vsub.s32 2, %v4983_v36 }
 0x2d5   :  { %4363 = vmatpush1.bf16.msra.mxu1 %v4362_v59  ;;  %v4254_v41 = vpack.c.bf16 %v2552_v34, %v2550_v33  ;;  %v2563_v59 = vld [vmem:[#allocation9 + $0x268] sm:$0xff]  ;;  %v2846_v29 = vld [vmem:[#allocation12 + $0x1f0] sm:$0xff]  ;;  %v2578_v33 = vld [vmem:[#allocation9 + $0x2e0] sm:$0xff]  ;;  %v4288_v49 = vpack.c.bf16 %v2589_v46, %v2587_v45 }
 0x2d6   :  { %4365 = vmatprep.subr.bf16.mxu1 %v4364_v0  ;;  %v2562_v0 = vld [vmem:[#allocation9 + $0x260] sm:$0xff]  ;;  %v2580_v34 = vld [vmem:[#allocation9 + $0x2f0] sm:$0xff] }
 0x2d7   :  { %4239 = vmatpush1.bf16.msra.mxu0 %v4238_v42  ;;  %v2470_v42 = vmax.f32 %v4444_v31, 0.0  ;;  %v4266_v7 = vpack.c.bf16 %v2564_v1, %v2562_v0  ;;  %v2594_v1 = vld [vmem:[#allocation9 + $0x360] sm:$0xff]  ;;  %v2604_v18 = vld [vmem:[#allocation9 + $0x3b0] sm:$0xff] }
 0x2d8   :  { %4241 = vmatprep.subr.bf16.mxu0 %v4240_v48  ;;  %v2479_v48 = vmax.f32 %v4447_v37, 0.0  ;;  %v2583_v37 = vld [vmem:[#allocation9 + $0x308] sm:$0xff]  ;;  %v2850_v46 = vld [vmem:[#allocation12 + $0x210] sm:$0xff] }
 0x2d9   :  { %4367 = vmatpush1.bf16.msra.mxu1 %v4366_v13  ;;  %v2573_v13 = vld [vmem:[#allocation9 + $0x2b8] sm:$0xff]  ;;  %v4284_v47 = vpack.c.bf16 %v2585_v38, %v2583_v37  ;;  %v2848_v45 = vld [vmem:[#allocation12 + $0x200] sm:$0xff] }
 0x2da   :  { %4369 = vmatprep.subr.bf16.mxu1 %v4368_v16  ;;  %v4272_v15 = vpack.c.bf16 %v2573_v13, %v2571_v12  ;;  %v2570_v16 = vld [vmem:[#allocation9 + $0x2a0] sm:$0xff]  ;;  %v2600_v12 = vld [vmem:[#allocation9 + $0x390] sm:$0xff]  ;;  %v2603_v13 = vld [vmem:[#allocation9 + $0x3a8] sm:$0xff] }
 0x2db   :  { %4243 = vmatpush1.bf16.msra.mxu0 %v4242_v61  ;;  %v2565_v61 = vld [vmem:[#allocation9 + $0x278] sm:$0xff] }
 0x2dc   :  { %4245 = vmatprep.subr.bf16.mxu0 %v4244_v6  ;;  %v4264_v62 = vpack.c.bf16 %v2565_v61, %v2563_v59  ;;  %v2569_v6 = vld [vmem:[#allocation9 + $0x298] sm:$0xff]  ;;  %v2592_v59 = vld [vmem:[#allocation9 + $0x350] sm:$0xff]  ;;  %v2595_v61 = vld [vmem:[#allocation9 + $0x368] sm:$0xff] }
 0x2dd   :  { %4371 = vmatpush1.bf16.msra.mxu1 %v4370_v26  ;;  %v4268_v9 = vpack.c.bf16 %v2569_v6, %v2567_v2  ;;  %v2847_v26 = vld [vmem:[#allocation12 + $0x1f8] sm:$0xff]  ;;  %v2596_v2 = vld [vmem:[#allocation9 + $0x370] sm:$0xff]  ;;  %v2599_v6 = vld [vmem:[#allocation9 + $0x388] sm:$0xff] }
 0x2de   :  { %4373 = vmatprep.subr.bf16.mxu1 %v4372_v28  ;;  %v2844_v28 = vld [vmem:[#allocation12 + $0x1e0] sm:$0xff] }
 0x2df   :  { %4247 = vmatpush1.bf16.msra.mxu0 %v4246_v14  ;;  %v4270_v14 = vpack.c.bf16 %v2568_v11, %v2566_v10  ;;  %v4378_v31 = vpack.c.bf16 %v2846_v29, %v2844_v28  ;;  %v2598_v11 = vld [vmem:[#allocation9 + $0x380] sm:$0xff]  ;;  %v1209_v28 = vrot.slane %v4988_v51, %v1208_v53  ;;  %v2862_v53 = vld [vmem:[#allocation12 + $0x270] sm:$0xff] }
 0x2e0   :  { %4249 = vmatprep.subr.bf16.mxu0 %v4248_v20  ;;  %v4274_v20 = vpack.c.bf16 %v2572_v17, %v2570_v16  ;;  %v2602_v17 = vld [vmem:[#allocation9 + $0x3a0] sm:$0xff] }
 0x2e1   :  { %4375 = vmatpush1.bf16.msra.mxu1 %v4374_v40  ;;  %v2851_v40 = vld [vmem:[#allocation12 + $0x218] sm:$0xff]  ;;  %v4450_v38 = vadd.f32 %v4977_v4, %v1209_v28 }
 0x2e3   :  { %4251 = vmatpush1.bf16.msra.mxu0 %v4250_v27  ;;  %v4376_v27 = vpack.c.bf16 %v2847_v26, %v2845_v25  ;;  %v2611_v25 = vld [vmem:[#allocation9 + $0x3e8] sm:$0xff]  ;;  %v2613_v26 = vld [vmem:[#allocation9 + $0x3f8] sm:$0xff] }
 0x2e4   :  { %4253 = vmatprep.subr.bf16.mxu0 %v4252_v32  ;;  %v4280_v32 = vpack.c.bf16 %v2581_v24, %v2579_v23  ;;  %v2606_v23 = vld [vmem:[#allocation9 + $0x3c0] sm:$0xff]  ;;  %v2608_v24 = vld [vmem:[#allocation9 + $0x3d0] sm:$0xff]  ;;  %v4312_v29 = vpack.c.bf16 %v2613_v26, %v2611_v25 }
 0x2e5   :  { %4377 = vmatprep.subr.bf16.mxu1 %v4376_v27  ;;  %v4310_v27 = vpack.c.bf16 %v2608_v24, %v2606_v23  ;;  %v2867_v23 = vld [vmem:[#allocation12 + $0x298] sm:$0xff]  ;;  %v2864_v26 = vld [vmem:[#allocation12 + $0x280] sm:$0xff] }
 0x2e6   :  { %2691 = vmatmul.mubr.f32.vlgmr.msra.gmra.mrb[8].mxu0 %v2470_v42  ;;  %4379 = vmatpush1.bf16.msra.mxu1 %v4378_v31  ;;  %v4282_v42 = vpack.c.bf16 %v2580_v34, %v2578_v33  ;;  %v2612_v31 = vld [vmem:[#allocation9 + $0x3f0] sm:$0xff]  ;;  %v4448_v33 = vadd.f32 %v4969_v52, %v1209_v28  ;;  %v4451_v34 = vadd.f32 %v4981_v8, %v5004_v35 }
 0x2e7   :  { %2696 = vmatprep.mubr.f32.mxu0 %v2479_v48  ;;  %4255 = vmatpush1.bf16.msra.mxu0 %v4254_v41  ;;  %v4380_v41 = vpack.c.bf16 %v2851_v40, %v2849_v39  ;;  %v2480_v40 = vmax.f32 %v4450_v38, 0.0  ;;  %v2869_v28 = vld [vmem:[#allocation12 + $0x2a8] sm:$0xff] }
 0x2e8   :  { %4257 = vmatprep.subr.bf16.mxu0 %v4256_v43  ;;  %v2582_v43 = vld [vmem:[#allocation9 + $0x300] sm:$0xff]  ;;  %v2472_v37 = vmax.f32 %v4448_v33, 0.0  ;;  %v2481_v39 = vmax.f32 %v4451_v34, 0.0  ;;  %v2870_v33 = vld [vmem:[#allocation12 + $0x2b0] sm:$0xff]  ;;  %v2873_v34 = vld [vmem:[#allocation12 + $0x2c8] sm:$0xff] }
 0x2e9   :  { %4381 = vmatprep.subr.bf16.mxu1 %v4380_v41  ;;  %v4286_v48 = vpack.c.bf16 %v2584_v44, %v2582_v43  ;;  %v1216_v41 = vsub.s32 4, %v4983_v36  ;;  %v1228_v43 = vsub.s32 7, %v4983_v36 }
 0x2ea   :  { %2697 = vmatmul.mubr.f32.gmra.mrb[10].mxu0 %v2478_v54  ;;  %v2591_v54 = vld [vmem:[#allocation9 + $0x348] sm:$0xff] }
 0x2eb   :  { %4259 = vmatpush1.bf16.msra.mxu0 %v4258_v60  ;;  %2767 = vmatprep.mubr.f32.mxu0 %v2473_v58  ;;  %v2588_v60 = vld [vmem:[#allocation9 + $0x330] sm:$0xff]  ;;  %v2590_v58 = vld [vmem:[#allocation9 + $0x340] sm:$0xff] }
 0x2ec   :  { %4261 = vmatprep.subr.bf16.mxu0 %v4260_v55  ;;  %v2593_v55 = vld [vmem:[#allocation9 + $0x358] sm:$0xff]  ;;  %v4290_v57 = vpack.c.bf16 %v2588_v60, %v2586_v5  ;;  %v2853_v60 = vld [vmem:[#allocation12 + $0x228] sm:$0xff] }
 0x2ed   :  { %v4292_v63 = vpack.c.bf16 %v2593_v55, %v2591_v54  ;;  %v2855_v54 = vld [vmem:[#allocation12 + $0x238] sm:$0xff] }
 0x2ef   :  { %4263 = vmatpush1.bf16.msra.mxu0 %v4262_v56  ;;  %v2597_v56 = vld [vmem:[#allocation9 + $0x378] sm:$0xff] }
 0x2f0   :  { %4265 = vmatprep.subr.bf16.mxu0 %v4264_v62  ;;  %v4294_v62 = vpack.c.bf16 %v2592_v59, %v2590_v58  ;;  %v4296_v0 = vpack.c.bf16 %v2597_v56, %v2595_v61 }
 0x2f3   :  { %4267 = vmatpush1.bf16.msra.mxu0 %v4266_v7  ;;  %v2601_v7 = vld [vmem:[#allocation9 + $0x398] sm:$0xff] }
 0x2f4   :  { %4269 = vmatprep.subr.bf16.mxu0 %v4268_v9  ;;  %v4298_v9 = vpack.c.bf16 %v2596_v2, %v2594_v1  ;;  %v4300_v10 = vpack.c.bf16 %v2601_v7, %v2599_v6  ;;  %v2854_v1 = vld [vmem:[#allocation12 + $0x230] sm:$0xff] }
 0x2f7   :  { %4271 = vmatpush1.bf16.msra.mxu0 %v4270_v14  ;;  %v2605_v14 = vld [vmem:[#allocation9 + $0x3b8] sm:$0xff] }
 0x2f8   :  { %4273 = vmatprep.subr.bf16.mxu0 %v4272_v15  ;;  %v4302_v15 = vpack.c.bf16 %v2600_v12, %v2598_v11  ;;  %v4304_v16 = vpack.c.bf16 %v2605_v14, %v2603_v13  ;;  %v2856_v14 = vld [vmem:[#allocation12 + $0x240] sm:$0xff] }
 0x2fb   :  { %4275 = vmatpush1.bf16.msra.mxu0 %v4274_v20  ;;  %v2609_v20 = vld [vmem:[#allocation9 + $0x3d8] sm:$0xff] }
 0x2fc   :  { %4277 = vmatprep.subr.bf16.mxu0 %v4276_v21  ;;  %v4306_v21 = vpack.c.bf16 %v2604_v18, %v2602_v17  ;;  %v4308_v22 = vpack.c.bf16 %v2609_v20, %v2607_v19  ;;  %v2861_v17 = vld [vmem:[#allocation12 + $0x268] sm:$0xff]  ;;  %v2863_v18 = vld [vmem:[#allocation12 + $0x278] sm:$0xff] }
 0x2fd   :  { %v4392_v20 = vpack.c.bf16 %v2863_v18, %v2861_v17  ;;  %v2896_v18 = vld [vmem:[#allocation12 + $0x380] sm:$0xff] }
 0x2ff   :  { %4279 = vmatpush1.bf16.msra.mxu0 %v4278_v30  ;;  %v2610_v30 = vld [vmem:[#allocation9 + $0x3e0] sm:$0xff] }
 0x300   :  { %4281 = vmatprep.subr.bf16.mxu0 %v4280_v32  ;;  %v4314_v32 = vpack.c.bf16 %v2612_v31, %v2610_v30 }
 0x303   :  { %4283 = vmatpush1.bf16.msra.mxu0 %v4282_v42  ;;  %v1220_v42 = vsub.s32 5, %v4983_v36 }
 0x304   :  { %4285 = vmatprep.subr.bf16.mxu0 %v4284_v47  ;;  %v1217_v47 = vrot.slane %v4988_v51, %v1216_v41  ;;  %v2874_v41 = vld [vmem:[#allocation12 + $0x2d0] sm:$0xff] }
 0x305   :  { %v1221_v52 = vrot.slane %v4988_v51, %v1220_v42  ;;  %v2877_v42 = vld [vmem:[#allocation12 + $0x2e8] sm:$0xff] }
 0x307   :  { %4287 = vmatpush1.bf16.msra.mxu0 %v4286_v48 }
 0x308   :  { %4289 = vmatprep.subr.bf16.mxu0 %v4288_v49  ;;  %v5025_v49 = vrot.slane %v4988_v51, %v1228_v43  ;;  %v2857_v51 = vld [vmem:[#allocation12 + $0x248] sm:$0xff] }
 0x30b   :  { %4291 = vmatpush1.bf16.msra.mxu0 %v4290_v57 }
 0x30c   :  { %4293 = vmatprep.subr.bf16.mxu0 %v4292_v63  ;;  %v4382_v63 = vpack.c.bf16 %v2850_v46, %v2848_v45  ;;  %v2883_v45 = vld [vmem:[#allocation12 + $0x318] sm:$0xff] }
 0x30f   :  { %4295 = vmatpush1.bf16.msra.mxu0 %v4294_v62  ;;  %v4384_v62 = vpack.c.bf16 %v2855_v54, %v2853_v60  ;;  %v2882_v60 = vld [vmem:[#allocation12 + $0x310] sm:$0xff]  ;;  %v2885_v54 = vld [vmem:[#allocation12 + $0x328] sm:$0xff] }
 0x310   :  { %4297 = vmatprep.subr.bf16.mxu0 %v4296_v0  ;;  %v2852_v0 = vld [vmem:[#allocation12 + $0x220] sm:$0xff] }
 0x311   :  { %v4386_v11 = vpack.c.bf16 %v2854_v1, %v2852_v0 }
 0x313   :  { %4299 = vmatpush1.bf16.msra.mxu0 %v4298_v9  ;;  %v2859_v9 = vld [vmem:[#allocation12 + $0x258] sm:$0xff] }
 0x314   :  { %4301 = vmatprep.subr.bf16.mxu0 %v4300_v10  ;;  %v4388_v13 = vpack.c.bf16 %v2859_v9, %v2857_v51  ;;  %v2893_v51 = vld [vmem:[#allocation12 + $0x368] sm:$0xff]  ;;  %v2895_v9 = vld [vmem:[#allocation12 + $0x378] sm:$0xff] }
 0x317   :  { %4303 = vmatpush1.bf16.msra.mxu0 %v4302_v15  ;;  %v2858_v15 = vld [vmem:[#allocation12 + $0x250] sm:$0xff] }
 0x318   :  { %4305 = vmatprep.subr.bf16.mxu0 %v4304_v16  ;;  %v4390_v19 = vpack.c.bf16 %v2858_v15, %v2856_v14  ;;  %v2897_v14 = vld [vmem:[#allocation12 + $0x388] sm:$0xff]  ;;  %v2899_v15 = vld [vmem:[#allocation12 + $0x398] sm:$0xff] }
 0x319   :  { %v4428_v17 = vpack.c.bf16 %v2899_v15, %v2897_v14 }
 0x31b   :  { %4307 = vmatpush1.bf16.msra.mxu0 %v4306_v21  ;;  %v2860_v21 = vld [vmem:[#allocation12 + $0x260] sm:$0xff] }
 0x31c   :  { %4309 = vmatprep.subr.bf16.mxu0 %v4308_v22  ;;  %v2865_v22 = vld [vmem:[#allocation12 + $0x288] sm:$0xff]  ;;  %v4394_v24 = vpack.c.bf16 %v2862_v53, %v2860_v21  ;;  %v2903_v21 = vld [vmem:[#allocation12 + $0x3b8] sm:$0xff] }
 0x31d   :  { %v4396_v25 = vpack.c.bf16 %v2867_v23, %v2865_v22  ;;  %v2900_v23 = vld [vmem:[#allocation12 + $0x3a0] sm:$0xff] }
 0x31f   :  { %4311 = vmatpush1.bf16.msra.mxu0 %v4310_v27  ;;  %v2866_v27 = vld [vmem:[#allocation12 + $0x290] sm:$0xff] }
 0x320   :  { %4313 = vmatprep.subr.bf16.mxu0 %v4312_v29  ;;  %v2871_v29 = vld [vmem:[#allocation12 + $0x2b8] sm:$0xff]  ;;  %v4398_v30 = vpack.c.bf16 %v2866_v27, %v2864_v26 }
 0x321   :  { %v4400_v31 = vpack.c.bf16 %v2871_v29, %v2869_v28  ;;  %v2907_v26 = vld [vmem:[#allocation12 + $0x3d8] sm:$0xff]  ;;  %v1224_v28 = vsub.s32 6, %v4983_v36 }
 0x323   :  { %4315 = vmatpush1.bf16.msra.mxu0 %v4314_v32  ;;  %v2868_v32 = vld [vmem:[#allocation12 + $0x2a0] sm:$0xff] }
 0x324   :  { %v4402_v38 = vpack.c.bf16 %v2870_v33, %v2868_v32  ;;  %v2909_v32 = vld [vmem:[#allocation12 + $0x3e8] sm:$0xff]  ;;  %v2911_v33 = vld [vmem:[#allocation12 + $0x3f8] sm:$0xff] }
 0x326   :  { %2768 = vmatmul.mubr.f32.vlgmr.msra.gmra.mrb[8].mxu0 %v2472_v37  ;;  %v2875_v37 = vld [vmem:[#allocation12 + $0x2d8] sm:$0xff] }
 0x327   :  { %2773 = vmatprep.mubr.f32.mxu0 %v2481_v39  ;;  %v4404_v39 = vpack.c.bf16 %v2875_v37, %v2873_v34  ;;  %v4553_v37 = vld [vmem:[#allocation8] sm:$0xff] }
 0x32a   :  { %2774 = vmatmul.mubr.f32.gmra.mrb[10].mxu0 %v2480_v40  ;;  %v2872_v40 = vld [vmem:[#allocation12 + $0x2c0] sm:$0xff] }
 0x379   :  { %v2151_v8 = vpop.f32.mrb[4].mxu0 }
 0x37a   :  { %v4452_v35 = vadd.f32 %v2151_v8, %v1217_v47  ;;  %v5022_v44 = vpop.f32.mrb[4].mxu1  ;;  %v2153_v4 = vpop.f32.mrb[5].mxu0  ;;  %v2876_v8 = vld [vmem:[#allocation12 + $0x2e0] sm:$0xff] }
 0x37b   :  { %v4453_v48 = vadd.f32 %v2153_v4, %v1221_v52  ;;  %v2461_v5 = vpop.f32.mrb[5].mxu1  ;;  %v2881_v4 = vld [vmem:[#allocation12 + $0x308] sm:$0xff] }
 0x37c   :  { %v2474_v58 = vmax.f32 %v4452_v35, 0.0  ;;  %v4457_v2 = vadd.f32 %v2461_v5, %v5025_v49  ;;  %v2878_v35 = vld [vmem:[#allocation12 + $0x2f0] sm:$0xff]  ;;  %v2880_v5 = vld [vmem:[#allocation12 + $0x300] sm:$0xff] }
 0x37d   :  { %v2475_v55 = vmax.f32 %v4453_v48, 0.0  ;;  %v2157_v57 = vpop.f32.mrb[6].mxu0  ;;  %v4410_v46 = vpack.c.bf16 %v2878_v35, %v2876_v8  ;;  %v4412_v48 = vpack.c.bf16 %v2883_v45, %v2881_v4  ;;  %v2614_v4 = vld [vmem:[#allocation11] sm:$0x3] }
 0x37e   :  { %v4454_v59 = vadd.f32 %v2157_v57, %v1217_v47  ;;  %v5027_v61 = vpop.f32.mrb[6].mxu1  ;;  %v2159_v56 = vpop.f32.mrb[7].mxu0  ;;  %v2477_v16 = vmax.f32 %v4457_v2, 0.0  ;;  %v2879_v47 = vld [vmem:[#allocation12 + $0x2f8] sm:$0xff]  ;;  %v4414_v57 = vpack.c.bf16 %v2882_v60, %v2880_v5  ;;  %v2888_v2 = vld [vmem:[#allocation12 + $0x340] sm:$0xff]  ;;  %v2619_v45 = vrot.slane %v2614_v4, %v4997_v3 }
 0x37f   :  { %v4455_v6 = vadd.f32 %v2159_v56, %v1221_v52  ;;  %v5030_v7 = vpop.f32.mrb[7].mxu1  ;;  %2988 = vmatprep.mubr.f32.mxu1 %v2475_v55  ;;  %v4406_v52 = vpack.c.bf16 %v2874_v41, %v2872_v40  ;;  %v4408_v43 = vpack.c.bf16 %v2879_v47, %v2877_v42  ;;  %v2887_v55 = vld [vmem:[#allocation12 + $0x338] sm:$0xff]  ;;  %v2889_v56 = vld [vmem:[#allocation12 + $0x348] sm:$0xff]  ;;  %v2908_v40 = vld [vmem:[#allocation12 + $0x3e0] sm:$0xff] }
 0x380   :  { %2989 = vmatmul.mubr.f32.vlgmr.msra.gmra.mrb[8].mxu1 %v2474_v58  ;;  %v2482_v12 = vmax.f32 %v4454_v59, 0.0  ;;  %v2884_v58 = vld [vmem:[#allocation12 + $0x320] sm:$0xff]  ;;  %v2886_v59 = vld [vmem:[#allocation12 + $0x330] sm:$0xff]  ;;  %v4459_v36 = vadd.f32 %v5030_v7, %v5025_v49 }
 0x381   :  { %v2483_v10 = vmax.f32 %v4455_v6, 0.0  ;;  %4383 = vmatpush1.bf16.msra.mxu1 %v4382_v63  ;;  %v4416_v63 = vpack.c.bf16 %v2887_v55, %v2885_v54  ;;  %v4418_v0 = vpack.c.bf16 %v2886_v59, %v2884_v58  ;;  %v2890_v6 = vld [vmem:[#allocation12 + $0x350] sm:$0xff] }
 0x382   :  { %4385 = vmatprep.subr.bf16.mxu1 %v4384_v62  ;;  %v2891_v62 = vld [vmem:[#allocation12 + $0x358] sm:$0xff]  ;;  %v2910_v41 = vld [vmem:[#allocation12 + $0x3f0] sm:$0xff]  ;;  %v2485_v8 = vmax.f32 %v4459_v36, 0.0 }
 0x383   :  { %2994 = vmatprep.mubr.f32.mxu1 %v2483_v10  ;;  %v4420_v1 = vpack.c.bf16 %v2891_v62, %v2889_v56  ;;  %v4422_v10 = vpack.c.bf16 %v2890_v6, %v2888_v2  ;;  %v4442_v42 = vpack.c.bf16 %v2910_v41, %v2908_v40 }
 0x384   :  { %2995 = vmatmul.mubr.f32.gmra.mrb[10].mxu1 %v2482_v12  ;;  %v2892_v12 = vld [vmem:[#allocation12 + $0x360] sm:$0xff] }
 0x385   :  { %4387 = vmatpush1.bf16.msra.mxu1 %v4386_v11  ;;  %3065 = vmatprep.mubr.f32.mxu1 %v2477_v16  ;;  %v4424_v11 = vpack.c.bf16 %v2895_v9, %v2893_v51 }
 0x386   :  { %4389 = vmatprep.subr.bf16.mxu1 %v4388_v13  ;;  %v2894_v13 = vld [vmem:[#allocation12 + $0x370] sm:$0xff] }
 0x387   :  { %v4426_v16 = vpack.c.bf16 %v2894_v13, %v2892_v12 }
 0x389   :  { %4391 = vmatpush1.bf16.msra.mxu1 %v4390_v19  ;;  %v2898_v19 = vld [vmem:[#allocation12 + $0x390] sm:$0xff] }
 0x38a   :  { %4393 = vmatprep.subr.bf16.mxu1 %v4392_v20  ;;  %v2901_v20 = vld [vmem:[#allocation12 + $0x3a8] sm:$0xff]  ;;  %v4430_v53 = vpack.c.bf16 %v2898_v19, %v2896_v18 }
 0x38b   :  { %v4432_v22 = vpack.c.bf16 %v2903_v21, %v2901_v20 }
 0x38d   :  { %4395 = vmatpush1.bf16.msra.mxu1 %v4394_v24  ;;  %v2902_v24 = vld [vmem:[#allocation12 + $0x3b0] sm:$0xff] }
 0x38e   :  { %4397 = vmatprep.subr.bf16.mxu1 %v4396_v25  ;;  %v2905_v25 = vld [vmem:[#allocation12 + $0x3c8] sm:$0xff]  ;;  %v4434_v27 = vpack.c.bf16 %v2902_v24, %v2900_v23 }
 0x38f   :  { %v4436_v29 = vpack.c.bf16 %v2907_v26, %v2905_v25 }
 0x391   :  { %4399 = vmatpush1.bf16.msra.mxu1 %v4398_v30  ;;  %v2904_v30 = vld [vmem:[#allocation12 + $0x3c0] sm:$0xff] }
 0x392   :  { %4401 = vmatprep.subr.bf16.mxu1 %v4400_v31  ;;  %v2906_v31 = vld [vmem:[#allocation12 + $0x3d0] sm:$0xff] }
 0x393   :  { %v4438_v34 = vpack.c.bf16 %v2906_v31, %v2904_v30 }
 0x395   :  { %4403 = vmatpush1.bf16.msra.mxu1 %v4402_v38  ;;  %v1225_v38 = vrot.slane %v4553_v37, %v1224_v28 }
 0x396   :  { %4405 = vmatprep.subr.bf16.mxu1 %v4404_v39  ;;  %v4440_v39 = vpack.c.bf16 %v2911_v33, %v2909_v32 }
 0x397   :  { %v4456_v47 = vadd.f32 %v5022_v44, %v1225_v38 }
 0x399   :  { %4407 = vmatpush1.bf16.msra.mxu1 %v4406_v52  ;;  %v2476_v52 = vmax.f32 %v4456_v47, 0.0 }
 0x39a   :  { %4409 = vmatprep.subr.bf16.mxu1 %v4408_v43  ;;  %v4458_v43 = vadd.f32 %v5027_v61, %v1225_v38  ;;  %v3163_v38 = vld [vmem:[#allocation3] ss:$0 sm:$0xff] }
 0x39c   :  { %v2484_v35 = vmax.f32 %v4458_v43, 0.0 }
 0x39d   :  { %4411 = vmatpush1.bf16.msra.mxu1 %v4410_v46  ;;  %v2623_v46 = vrot.slane %v2614_v4, %v4986_v50 }
 0x39e   :  { %4413 = vmatprep.subr.bf16.mxu1 %v4412_v48  ;;  %v3082_v48 = vld [vmem:[#allocation15] sm:$0x3] }
 0x39f   :  { %v3087_v49 = vrot.slane %v3082_v48, %v4997_v3  ;;  %v3091_v54 = vrot.slane %v3082_v48, %v4986_v50 }
 0x3a1   :  { %4415 = vmatpush1.bf16.msra.mxu1 %v4414_v57 }
 0x3a2   :  { %4417 = vmatprep.subr.bf16.mxu1 %v4416_v63 }
 0x3a5   :  { %4419 = vmatpush1.bf16.msra.mxu1 %v4418_v0 }
 0x3a6   :  { %4421 = vmatprep.subr.bf16.mxu1 %v4420_v1 }
 0x3a9   :  { %4423 = vmatpush1.bf16.msra.mxu1 %v4422_v10  ;;  %v2912_v10 = vld [vmem:[#allocation14] sm:$0x3] }
 0x3aa   :  { %4425 = vmatprep.subr.bf16.mxu1 %v4424_v11  ;;  %v3162_v11 = vld [vmem:[#allocation2] ss:$0 sm:$0xff]  ;;  %v2917_v13 = vrot.slane %v2912_v10, %v4997_v3  ;;  %v2921_v15 = vrot.slane %v2912_v10, %v4986_v50 }
 0x3ad   :  { %4427 = vmatpush1.bf16.msra.mxu1 %v4426_v16  ;;  %v3116_v16 = vld [vmem:[#allocation17] sm:$0x3] }
 0x3ae   :  { %4429 = vmatprep.subr.bf16.mxu1 %v4428_v17  ;;  %v3121_v21 = vrot.slane %v3116_v16, %v4997_v3  ;;  %v3125_v23 = vrot.slane %v3116_v16, %v4986_v50 }
 0x3b1   :  { %4431 = vmatpush1.bf16.msra.mxu1 %v4430_v53 }
 0x3b2   :  { %4433 = vmatprep.subr.bf16.mxu1 %v4432_v22 }
 0x3b5   :  { %4435 = vmatpush1.bf16.msra.mxu1 %v4434_v27 }
 0x3b6   :  { %4437 = vmatprep.subr.bf16.mxu1 %v4436_v29 }
 0x3b9   :  { %4439 = vmatpush1.bf16.msra.mxu1 %v4438_v34 }
 0x3ba   :  { %4441 = vmatprep.subr.bf16.mxu1 %v4440_v39 }
 0x3bd   :  { %4443 = vmatpush1.bf16.msra.mxu1 %v4442_v42 }
 0x3c0   :  { %3066 = vmatmul.mubr.f32.vlgmr.msra.gmra.mrb[8].mxu1 %v2476_v52 }
 0x3c1   :  { %3071 = vmatprep.mubr.f32.mxu1 %v2485_v8 }
 0x3c4   :  { %3072 = vmatmul.mubr.f32.gmra.mrb[10].mxu1 %v2484_v35 }
 0x3f9   :  { %v2769_v44 = vpop.f32.mrb[8].mxu0 }
 0x3fa   :  { %v4460_v5 = vadd.f32 %v2769_v44, %v2619_v45  ;;  %v2771_v60 = vpop.f32.mrb[9].mxu0 }
 0x3fb   :  { %v4461_v7 = vadd.f32 %v2771_v60, %v2623_v46 }
 0x3fc   :  { %v2780_v61 = vmax.f32 %v4460_v5, 0.0 }
 0x3fd   :  { %v2781_v55 = vmax.f32 %v4461_v7, 0.0  ;;  %v2775_v57 = vpop.f32.mrb[10].mxu0 }
 0x3fe   :  { %v4462_v63 = vadd.f32 %v2775_v57, %v2619_v45  ;;  %v2777_v58 = vpop.f32.mrb[11].mxu0  ;;  %v3094_v59 = vmul.f32 %v3087_v49, %v2780_v61 }
 0x3ff   :  { %v4463_v56 = vadd.f32 %v2777_v58, %v2623_v46  ;;  %v3095_v62 = vmul.f32 %v3091_v54, %v2781_v55 }
 0x400   :  { %v2782_v0 = vmax.f32 %v4462_v63, 0.0 }
 0x401   :  { %v2783_v1 = vmax.f32 %v4463_v56, 0.0  ;;  %v3098_v2 = vadd.f32 %v3095_v62, %v3094_v59 }
 0x402   :  { %v3096_v6 = vmul.f32 %v3087_v49, %v2782_v0 }
 0x403   :  { %v3097_v51 = vmul.f32 %v3091_v54, %v2783_v1  ;;  %3099 = vadd.xlane.f32.xlu0 %v3098_v2 }
 0x405   :  { %v3101_v9 = vadd.f32 %v3097_v51, %v3096_v6 }
 0x407   :  { %3102 = vadd.xlane.f32.xlu0 %v3101_v9 }
 0x490   :  { %v3100_v12 = vpop.xlane.xlu0 %3099 }
 0x491   :  { %v3111_v14 = vadd.f32 %v3162_v11, %v3100_v12 }
 0x493   :  { %3114 = vst.msk [vmem:[%s5071_s11] sm:$0xff] %vm3113_vm0, %v3111_v14  ;;  %v3067_v17 = vpop.f32.mrb[8].mxu1 }
 0x494   :  { %v4464_v18 = vadd.f32 %v3067_v17, %v2917_v13  ;;  %v3069_v19 = vpop.f32.mrb[9].mxu1  ;;  %v3103_v20 = vpop.xlane.xlu0 %3102 }
 0x495   :  { %v4465_v53 = vadd.f32 %v3069_v19, %v2921_v15  ;;  %v3112_v22 = vadd.f32 %v3162_v11, %v3103_v20 }
 0x496   :  { %v3078_v24 = vmax.f32 %v4464_v18, 0.0 }
 0x497   :  { %v3079_v25 = vmax.f32 %v4465_v53, 0.0  ;;  %3115 = vst.msk [vmem:[%s5071_s11 + $0x8] sm:$0xff] %vm3113_vm0, %v3112_v22  ;;  %v3073_v26 = vpop.f32.mrb[10].mxu1 }
 0x498   :  { %v4466_v27 = vadd.f32 %v3073_v26, %v2917_v13  ;;  %v3075_v28 = vpop.f32.mrb[11].mxu1  ;;  %v3128_v29 = vmul.f32 %v3121_v21, %v3078_v24 }
 0x499   :  { %v4467_v30 = vadd.f32 %v3075_v28, %v2921_v15  ;;  %v3129_v31 = vmul.f32 %v3125_v23, %v3079_v25 }
 0x49a   :  { %v3080_v32 = vmax.f32 %v4466_v27, 0.0 }
 0x49b   :  { %v3081_v33 = vmax.f32 %v4467_v30, 0.0  ;;  %v3132_v3 = vadd.f32 %v3129_v31, %v3128_v29 }
 0x49c   :  { %v3130_v34 = vmul.f32 %v3121_v21, %v3080_v32 }
 0x49d   :  { %v3131_v37 = vmul.f32 %v3125_v23, %v3081_v33  ;;  %3133 = vadd.xlane.f32.xlu1 %v3132_v3 }
 0x49f   :  { %v3135_v50 = vadd.f32 %v3131_v37, %v3130_v34 }
 0x4a1   :  { %3136 = vadd.xlane.f32.xlu1 %v3135_v50 }
 0x52a   :  { %v3134_v39 = vpop.xlane.xlu1 %3133 }
 0x52b   :  { %v3145_v40 = vadd.f32 %v3163_v38, %v3134_v39 }
 0x52d   :  { %3147 = vst.msk [vmem:[%s5072_s12] sm:$0xff] %vm3113_vm0, %v3145_v40 }
 0x52e   :  { %v3137_v41 = vpop.xlane.xlu1 %3136 }
 0x52f   :  { %v3146_v42 = vadd.f32 %v3163_v38, %v3137_v41 }
 0x531   :  { %3148 = vst.msk [vmem:[%s5072_s12 + $0x8] sm:$0xff] %vm3113_vm0, %v3146_v42 }
 0x532   :  { %3157 = vsyncpa [#allocation5], 1 }
 0x533   :  { %3158 = vsyncpa [#allocation7], 1 }
 0x534   :  { %3159 = vsyncpa [#allocation10], 1 }
 0x535   :  { %3160 = vsyncpa [#allocation13], 1 }
 0x536   :  { %3161 = vsyncpa [#allocation16], 1 }

</bundles_post_ra>
